<compile_context>
chip_gen: v6e
topology: v6e:2x2x1
jax: 0.10.0
libtpu: 0.0.40
codegen_flags: <defaults>
</compile_context>

<pallas_src>
import functools

import jax
import jax.numpy as jnp
from jax.experimental import pallas as pl
from jax.experimental.pallas import tpu as pltpu


def _round_up(x, m):
    return (x + m - 1) // m * m


# ----------------------------------------------------------------------------
# Pallas kernel: one GRU layer, grid = (num_dir, num_time_chunks)
# ----------------------------------------------------------------------------
def _gru_layer_kernel(x_ref,      # (Tc*Bp, F_in)  bf16 — this direction's time chunk
                      wih_ref,    # (1, F_in, 3Hp) bf16 — W_ih^T
                      whh_ref,    # (1, Hp,   3Hp) bf16 — W_hh^T
                      bih_ref,    # (1, 1,    3Hp) f32  — b_ih with b_hr/b_hz folded in
                      bhn_ref,    # (1, 1,    Hp)  f32  — n-gate hidden bias b_hn
                      hids_ref,   # out: (Tc, Bp, Hp) bf16 — this direction's lane slab
                      hlast_ref,  # out: (1, Bp, Hp)  f32  — final hidden state
                      gx_scr,     # scratch: (Tc*Bp, 3Hp) bf16
                      h_scr):     # scratch: (Bp, Hp) f32 — carried across time chunks
    d = pl.program_id(0)          # direction
    c = pl.program_id(1)          # time chunk
    Tc, Bp, Hp = hids_ref.shape

    @pl.when(c == 0)
    def _():
        h_scr[...] = jnp.zeros_like(h_scr)

    # --- hoisted, time-parallel input projection for this chunk --------------
    # One bf16 MXU matmul with f32 accumulation; folded bias; stored bf16.
    gx_scr[...] = (jnp.dot(x_ref[...], wih_ref[0],
                           preferred_element_type=jnp.float32)
                   + bih_ref[0]).astype(gx_scr.dtype)

    whh = whh_ref[0]                                    # (Hp, 3Hp) bf16, resident
    bhn = jnp.broadcast_to(bhn_ref[0], (Bp, Hp))        # hoisted broadcast (f32)

    # Forward direction walks local time 0..Tc-1, backward walks Tc-1..0.
    # (The chunk itself is already the reversed chunk for d == 1, picked by
    #  the index_map, so global time is processed strictly in order.)
    t0 = d * (Tc - 1)
    sign = 1 - 2 * d

    def step(i, h):
        t = t0 + sign * i
        row0 = pl.multiple_of(t * Bp, Bp)                # packed-tile aligned
        gx_t = gx_scr[pl.ds(row0, Bp), :].astype(jnp.float32)     # (Bp, 3Hp)

        gh = jnp.dot(h.astype(jnp.bfloat16), whh,
                     preferred_element_type=jnp.float32)          # (Bp, 3Hp)
        r = jax.nn.sigmoid(gx_t[:, :Hp] + gh[:, :Hp])
        z = jax.nn.sigmoid(gx_t[:, Hp:2 * Hp] + gh[:, Hp:2 * Hp])
        n = jnp.tanh(gx_t[:, 2 * Hp:] + r * (gh[:, 2 * Hp:] + bhn))
        h_new = (1.0 - z) * n + z * h

        hids_ref[t] = h_new.astype(hids_ref.dtype)       # lane-dense store
        return h_new

    h_last = jax.lax.fori_loop(0, Tc, step, h_scr[...],
                               unroll=(Tc if Tc <= 8 else 4))
    h_scr[...] = h_last
    hlast_ref[0] = h_last


# ----------------------------------------------------------------------------
# Wrapper: chunk-size / VMEM budgeting + pallas_call
# ----------------------------------------------------------------------------
def _pick_time_chunk(T, Bp, F_in, Hp, budget_bytes=12 << 20):
    """Largest divisor of T whose per-chunk VMEM (2x x-chunk + 2x hids-chunk +
    gx scratch, all bf16) fits the budget.  Tc=1 is the always-valid floor."""
    def per_chunk_bytes(Tc):
        return Tc * Bp * 2 * (2 * F_in + 2 * Hp + 3 * Hp)
    best = 1
    for Tc in range(1, T + 1):
        if T % Tc == 0 and per_chunk_bytes(Tc) <= budget_bytes:
            best = Tc
    return best


def _vmem_limit_bytes(Tc, Bp, F_in, Hp):
    G3 = 3 * Hp
    need = (2 * Tc * Bp * F_in * 2          # x chunk, double-buffered, bf16
            + 2 * Tc * Bp * Hp * 2          # hids chunk, double-buffered, bf16
            + Tc * Bp * G3 * 2              # gx scratch, bf16
            + 2 * (F_in + Hp) * G3 * 2      # weights (allow a double buffer), bf16
            + 2 * (G3 + Hp) * 4             # biases
            + 3 * Bp * Hp * 4)              # h scratch + hlast
    return int(min(max(need + (8 << 20), 32 << 20), 64 << 20))


def gru_layer_pallas(x_flat, wih_T, whh_T, bih, bhn, *, T, Bp, Tc=None):
    """One GRU layer (all directions) over a time-chunked, streamed sequence.

    x_flat: (T*Bp, F_in) bf16 — time-major, batch-padded, flattened.
    wih_T:  (num_dir, F_in, 3Hp) bf16   whh_T: (num_dir, Hp, 3Hp) bf16
    bih:    (num_dir, 1, 3Hp) f32       bhn:   (num_dir, 1, Hp)  f32
    returns hids (T, Bp, num_dir*Hp) bf16, h_last (num_dir, Bp, Hp) f32
    """
    num_dir, F_in, G3 = wih_T.shape
    Hp = G3 // 3
    if Tc is None:
        Tc = _pick_time_chunk(T, Bp, F_in, Hp)
    nC = T // Tc
    vmem_limit = _vmem_limit_bytes(Tc, Bp, F_in, Hp)

    # Block index along time for (direction, chunk): forward walks chunks
    # 0..nC-1, backward walks nC-1..0 so the recurrence sees time in order.
    def t_block(d, c):
        return c + d * (nC - 1 - 2 * c)

    def build(single_buffer_weights):
        def wspec(shape, index_map):
            # Weight/bias blocks are constant across the time axis — a second
            # pipeline buffer is pure VMEM waste.
            if single_buffer_weights and hasattr(pl, "Buffered"):
                try:
                    return pl.BlockSpec(shape, index_map,
                                        pipeline_mode=pl.Buffered(1))
                except TypeError:
                    pass
            return pl.BlockSpec(shape, index_map)

        grid_spec = pltpu.PrefetchScalarGridSpec(
            num_scalar_prefetch=0,
            grid=(num_dir, nC),
            in_specs=[
                pl.BlockSpec((Tc * Bp, F_in), lambda d, c: (t_block(d, c), 0)),
                wspec((1, F_in, G3), lambda d, c: (d, 0, 0)),
                wspec((1, Hp, G3), lambda d, c: (d, 0, 0)),
                wspec((1, 1, G3), lambda d, c: (d, 0, 0)),
                wspec((1, 1, Hp), lambda d, c: (d, 0, 0)),
            ],
            out_specs=[
                pl.BlockSpec((Tc, Bp, Hp), lambda d, c: (t_block(d, c), 0, d)),
                pl.BlockSpec((1, Bp, Hp), lambda d, c: (d, 0, 0)),
            ],
            scratch_shapes=[pltpu.VMEM((Tc * Bp, G3), jnp.bfloat16),
                            pltpu.VMEM((Bp, Hp), jnp.float32)],
        )
        return pl.pallas_call(
            _gru_layer_kernel,
            out_shape=(jax.ShapeDtypeStruct((T, Bp, num_dir * Hp), jnp.bfloat16),
                       jax.ShapeDtypeStruct((num_dir, Bp, Hp), jnp.float32)),
            grid_spec=grid_spec,
            compiler_params=pltpu.CompilerParams(
                dimension_semantics=("parallel", "arbitrary"),
                vmem_limit_bytes=vmem_limit),
        )

    try:
        return build(True)(x_flat, wih_T, whh_T, bih, bhn)
    except Exception:
        # Fallback: default (double-buffered) weight blocks.
        return build(False)(x_flat, wih_T, whh_T, bih, bhn)


# ----------------------------------------------------------------------------
# Parameter prep: raw (PyTorch-layout) weights + padded/packed kernel weights
# ----------------------------------------------------------------------------
def _pad_gate_cols(w_T, H, Hp):
    """(F, 3H) -> (F, 3Hp): gate g's H columns placed at lanes [g*Hp, g*Hp+H)."""
    F = w_T.shape[0]
    out = jnp.zeros((F, 3 * Hp), w_T.dtype)
    for g in range(3):
        out = out.at[:, g * Hp:g * Hp + H].set(w_T[:, g * H:(g + 1) * H])
    return out


def _pad_rows_grouped(w, H, Hp, num_groups):
    """(num_groups*H, C) -> (num_groups*Hp, C): group g's rows at [g*Hp, g*Hp+H)."""
    C = w.shape[1]
    out = jnp.zeros((num_groups * Hp, C), w.dtype)
    for g in range(num_groups):
        out = out.at[g * Hp:g * Hp + H, :].set(w[g * H:(g + 1) * H, :])
    return out


def _pad_gate_vec(b, H, Hp):
    out = jnp.zeros((3 * Hp,), b.dtype)
    for g in range(3):
        out = out.at[g * Hp:g * Hp + H].set(b[g * H:(g + 1) * H])
    return out


def _bf16_round(x):
    # Round through bf16 so the f32 reference and the bf16 kernel use the
    # exact same effective weights (isolates accumulation/rounding error).
    return x.astype(jnp.bfloat16).astype(jnp.float32)


def init_encoder_params(key, vocab_size, input_size, hidden_size,
                        bidirectional, n_layers):
    num_dir = 2 if bidirectional else 1
    H = hidden_size
    Hp = _round_up(H, 128)                      # lane-dense gate padding
    keys = jax.random.split(key, 1 + 4 * n_layers * num_dir)
    orth = jax.nn.initializers.orthogonal()

    params = {"embedding": _bf16_round(
                  jax.random.normal(keys[0], (vocab_size, input_size),
                                    jnp.float32) * 0.1),
              "rnn": {}, "rnn_raw": {}, "Hp": Hp}
    k = 1
    for layer in range(n_layers):
        f_in_raw = input_size if layer == 0 else num_dir * H
        wihs, whhs, bihs, bhns = [], [], [], []
        for d in range(num_dir):
            w_ih = _bf16_round(jnp.asarray(
                orth(keys[k], (3 * H, f_in_raw), jnp.float32))); k += 1
            w_hh = _bf16_round(jnp.asarray(
                orth(keys[k], (3 * H, H), jnp.float32))); k += 1
            b_ih = jax.random.normal(keys[k], (3 * H,), jnp.float32) * 0.05; k += 1
            b_hh = jax.random.normal(keys[k], (3 * H,), jnp.float32) * 0.05; k += 1
            params["rnn_raw"][(layer, d)] = {"w_ih": w_ih, "w_hh": w_hh,
                                             "b_ih": b_ih, "b_hh": b_hh}
            # Padded, pre-transposed, gate-lane-aligned, bf16 kernel weights.
            wih_T = _pad_gate_cols(w_ih.T, H, Hp)                 # (f_in, 3Hp)
            if layer > 0:                                         # padded input layout
                wih_T = _pad_rows_grouped(wih_T, H, Hp, num_dir)  # (nd*Hp, 3Hp)
            whh_T = _pad_rows_grouped(_pad_gate_cols(w_hh.T, H, Hp), H, Hp, 1)
            wihs.append(wih_T.astype(jnp.bfloat16))
            whhs.append(whh_T.astype(jnp.bfloat16))
            # Fold the r/z halves of b_hh into b_ih (they sit outside r*(...)).
            b_fold = jnp.concatenate([b_ih[:2 * H] + b_hh[:2 * H], b_ih[2 * H:]])
            bihs.append(_pad_gate_vec(b_fold, H, Hp).reshape(1, 3 * Hp))
            bhns.append(jnp.zeros((Hp,), jnp.float32).at[:H]
                        .set(b_hh[2 * H:]).reshape(1, Hp))
        params["rnn"][layer] = {"wih_T": jnp.stack(wihs),   # (nd, F_in_p, 3Hp) bf16
                                "whh_T": jnp.stack(whhs),   # (nd, Hp, 3Hp)    bf16
                                "bih": jnp.stack(bihs),     # (nd, 1, 3Hp)     f32
                                "bhn": jnp.stack(bhns)}     # (nd, 1, Hp)      f32
    return params


# ----------------------------------------------------------------------------
# Encoder forward (Pallas path)
# ----------------------------------------------------------------------------
def encoder_forward(params, token_ids, *, hidden_size, bidirectional, n_layers,
                    noise_radius=0.2, noise=False, noise_key=None):
    """Mirrors Encoder.forward(inputs, input_lens=None, noise=...)."""
    num_dir = 2 if bidirectional else 1
    H = hidden_size
    Hp = params["Hp"]

    emb = params["embedding"][token_ids]                    # (B, T, E) f32
    B, T, E = emb.shape
    Bp = _round_up(B, 16)     # bf16 packed-sublane alignment + taller MXU LHS

    x = jnp.transpose(emb, (1, 0, 2)).astype(jnp.bfloat16)  # time-major (T, B, E)
    if Bp != B:
        x = jnp.pad(x, ((0, 0), (0, Bp - B), (0, 0)))
    layer_in = x.reshape(T * Bp, E)

    hids = hlast = None
    for layer in range(n_layers):
        p = params["rnn"][layer]
        hids, hlast = gru_layer_pallas(layer_in, p["wih_T"], p["whh_T"],
                                       p["bih"], p["bhn"], T=T, Bp=Bp)
        # (T, Bp, num_dir*Hp) bf16 is already the next layer's input layout.
        layer_in = hids.reshape(T * Bp, num_dir * Hp)

    # hids: (T, Bp, num_dir*Hp) bf16; strip padding on the final outputs only.
    hids4 = hids.reshape(T, Bp, num_dir, Hp)[:, :B, :, :H].astype(jnp.float32)
    hids_out = jnp.transpose(hids4, (1, 0, 2, 3)).reshape(B, T, num_dir * H)

    # enc == h_n[-1].transpose(1,0).reshape(B, -1) == concat(fwd_final, bwd_final)
    enc = jnp.transpose(hlast[:, :B, :H], (1, 0, 2)).reshape(B, num_dir * H)

    if noise and noise_radius > 0:
        enc = enc + noise_radius * jax.random.normal(noise_key, enc.shape,
                                                     jnp.float32)
    return enc, hids_out


# ----------------------------------------------------------------------------
# Pure-JAX f32 reference (PyTorch GRU semantics) for correctness checking
# ----------------------------------------------------------------------------
def encoder_forward_ref(params, token_ids, *, hidden_size, bidirectional,
                        n_layers):
    num_dir = 2 if bidirectional else 1
    H = hidden_size
    emb = params["embedding"][token_ids]
    x = jnp.transpose(emb, (1, 0, 2))               # (T, B, E)
    B = x.shape[1]

    layer_in = x
    finals = None
    for layer in range(n_layers):
        outs, finals = [], []
        for d in range(num_dir):
            w = params["rnn_raw"][(layer, d)]
            xi = layer_in if d == 0 else jnp.flip(layer_in, axis=0)

            def step(h, x_t, w=w):
                gx = x_t @ w["w_ih"].T + w["b_ih"]
                gh = h @ w["w_hh"].T + w["b_hh"]
                r = jax.nn.sigmoid(gx[:, :H] + gh[:, :H])
                z = jax.nn.sigmoid(gx[:, H:2 * H] + gh[:, H:2 * H])
                n = jnp.tanh(gx[:, 2 * H:] + r * gh[:, 2 * H:])
                h_new = (1.0 - z) * n + z * h
                return h_new, h_new

            h0 = jnp.zeros((B, H), jnp.float32)
            h_last, hids = jax.lax.scan(step, h0, xi)
            if d == 1:
                hids = jnp.flip(hids, axis=0)
            outs.append(hids)
            finals.append(h_last)
        layer_in = jnp.concatenate(outs, axis=-1)

    hids_out = jnp.transpose(layer_in, (1, 0, 2))
    enc = jnp.concatenate(finals, axis=-1)
    return enc, hids_out


# ----------------------------------------------------------------------------
# Demo / self-test
# ----------------------------------------------------------------------------
if __name__ == "__main__":
    vocab_size = 20
    batch = 2
    seq_len = 8
    input_size = 16       # embedding dim == GRU input_size
    hidden_size = 32
    noise_radius = 0.2

    key = jax.random.PRNGKey(0)
    pkey, dkey = jax.random.split(key)
    token_ids = jax.random.randint(dkey, (batch, seq_len), 0, vocab_size)

    for bidirectional, n_layers in [(True, 1), (True, 2), (False, 1)]:
        params = init_encoder_params(pkey, vocab_size, input_size, hidden_size,
                                     bidirectional, n_layers)
        fwd = functools.partial(encoder_forward, hidden_size=hidden_size,
                                bidirectional=bidirectional, n_layers=n_layers,
                                noise_radius=noise_radius, noise=False)
        enc, hids = fwd(params, token_ids)                      # Pallas path
        enc = jax.block_until_ready(enc)
        hids = jax.block_until_ready(hids)

        enc_ref, hids_ref = encoder_forward_ref(
            params, token_ids, hidden_size=hidden_size,
            bidirectional=bidirectional, n_layers=n_layers)

        num_dir = 2 if bidirectional else 1
        assert enc.shape == (batch, num_dir * hidden_size)
        assert hids.shape == (batch, seq_len, num_dir * hidden_size)
        # bf16 MXU operands / bf16 gx & inter-layer stream -> loosened tolerance.
        assert jnp.allclose(enc, enc_ref, atol=2e-2, rtol=2e-2), \
            f"enc mismatch (bidir={bidirectional}, layers={n_layers})"
        assert jnp.allclose(hids, hids_ref, atol=2e-2, rtol=2e-2), \
            f"hids mismatch (bidir={bidirectional}, layers={n_layers})"

    print("KERNEL_OK")
</pallas_src>

<mosaic_0001>
module attributes {stable_mosaic.version = 11 : i64} {
  func.func @_gru_layer_kernel(%arg0: i32, %arg1: i32, %arg2: memref<128x16xbf16, #tpu.memory_space<vmem>>, %arg3: memref<1x16x384xbf16, #tpu.memory_space<vmem>>, %arg4: memref<1x128x384xbf16, #tpu.memory_space<vmem>>, %arg5: memref<1x1x384xf32, #tpu.memory_space<vmem>>, %arg6: memref<1x1x128xf32, #tpu.memory_space<vmem>>, %arg7: memref<8x16x128xbf16, #tpu.memory_space<vmem>>, %arg8: memref<1x16x128xf32, #tpu.memory_space<vmem>>, %arg9: memref<128x384xbf16, #tpu.memory_space<vmem>>, %arg10: memref<16x128xf32, #tpu.memory_space<vmem>>) attributes {dimension_semantics = [#tpu.dimension_semantics<parallel>, #tpu.dimension_semantics<arbitrary>], iteration_bounds = array<i64: 2, 1>, scalar_prefetch = 0 : i64, scratch_operands = 2 : i64, tpu.core_type = #tpu.core_type<tc>, window_params = [{transform_indices = @transform_0, window_bounds = array<i64: 128, 16>}, {pipeline_mode = #tpu.pipeline_mode<synchronous>, transform_indices = @transform_1, window_bounds = array<i64: 1, 16, 384>}, {pipeline_mode = #tpu.pipeline_mode<synchronous>, transform_indices = @transform_2, window_bounds = array<i64: 1, 128, 384>}, {pipeline_mode = #tpu.pipeline_mode<synchronous>, transform_indices = @transform_3, window_bounds = array<i64: 1, 1, 384>}, {pipeline_mode = #tpu.pipeline_mode<synchronous>, transform_indices = @transform_4, window_bounds = array<i64: 1, 1, 128>}, {transform_indices = @transform_5, window_bounds = array<i64: 8, 16, 128>}, {transform_indices = @transform_6, window_bounds = array<i64: 1, 16, 128>}]} {
    %c0_i32 = arith.constant 0 : i32
    %0 = arith.cmpi eq, %arg1, %c0_i32 : i32
    %1 = arith.extui %0 : i1 to i32
    %c0_i32_0 = arith.constant 0 : i32
    %2 = arith.cmpi ne, %1, %c0_i32_0 : i32
    scf.if %2 {
      %cst_90 = arith.constant 0.000000e+00 : f32
      %355 = vector.broadcast %cst_90 : f32 to vector<16x128xf32>
      %c0_91 = arith.constant 0 : index
      %c0_92 = arith.constant 0 : index
      %356 = vector.load %arg10[%c0_91, %c0_92] : memref<16x128xf32, #tpu.memory_space<vmem>>, vector<16x128xf32>
      tpu.vector_store %arg10[%c0_91, %c0_92], %355 {strides = array<i32>} : memref<16x128xf32, #tpu.memory_space<vmem>>, vector<16x128xf32>,
    } else {
    }
    %c0 = arith.constant 0 : index
    %c0_1 = arith.constant 0 : index
    %3 = vector.load %arg2[%c0, %c0_1] : memref<128x16xbf16, #tpu.memory_space<vmem>>, vector<128x16xbf16>
    %c0_2 = arith.constant 0 : index
    %c0_3 = arith.constant 0 : index
    %c0_4 = arith.constant 0 : index
    %4 = vector.load %arg3[%c0_2, %c0_3, %c0_4] : memref<1x16x384xbf16, #tpu.memory_space<vmem>>, vector<1x16x384xbf16>
    %5 = vector.shape_cast %4 : vector<1x16x384xbf16> to vector<16x384xbf16>
    %cst = arith.constant dense<0.000000e+00> : vector<128x384xf32>
    %6 = tpu.matmul %3, %5, %cst {dimension_numbers = #tpu.dot_dimension_numbers<[1], [0], [0], [1], [0, 0, 1, 1], [], []>} : vector<128x16xbf16>, vector<16x384xbf16>, vector<128x384xf32> -> vector<128x384xf32>
    %c0_5 = arith.constant 0 : index
    %c0_6 = arith.constant 0 : index
    %c0_7 = arith.constant 0 : index
    %7 = vector.load %arg5[%c0_5, %c0_6, %c0_7] : memref<1x1x384xf32, #tpu.memory_space<vmem>>, vector<1x1x384xf32>
    %8 = vector.shape_cast %7 : vector<1x1x384xf32> to vector<1x384xf32>
    %9 = vector.broadcast %8 : vector<1x384xf32> to vector<128x384xf32>
    %10 = arith.addf %6, %9 : vector<128x384xf32>
    %11 = arith.truncf %10 : vector<128x384xf32> to vector<128x384xbf16>
    %c0_8 = arith.constant 0 : index
    %c0_9 = arith.constant 0 : index
    %12 = vector.load %arg9[%c0_8, %c0_9] : memref<128x384xbf16, #tpu.memory_space<vmem>>, vector<128x384xbf16>
    tpu.vector_store %arg9[%c0_8, %c0_9], %11 {strides = array<i32>} : memref<128x384xbf16, #tpu.memory_space<vmem>>, vector<128x384xbf16>,
    %c0_10 = arith.constant 0 : index
    %c0_11 = arith.constant 0 : index
    %c0_12 = arith.constant 0 : index
    %13 = vector.load %arg4[%c0_10, %c0_11, %c0_12] : memref<1x128x384xbf16, #tpu.memory_space<vmem>>, vector<1x128x384xbf16>
    %14 = vector.shape_cast %13 : vector<1x128x384xbf16> to vector<128x384xbf16>
    %c0_13 = arith.constant 0 : index
    %c0_14 = arith.constant 0 : index
    %c0_15 = arith.constant 0 : index
    %15 = vector.load %arg6[%c0_13, %c0_14, %c0_15] : memref<1x1x128xf32, #tpu.memory_space<vmem>>, vector<1x1x128xf32>
    %16 = vector.shape_cast %15 : vector<1x1x128xf32> to vector<1x128xf32>
    %17 = vector.shape_cast %16 : vector<1x128xf32> to vector<1x128xf32>
    %18 = vector.broadcast %17 : vector<1x128xf32> to vector<16x128xf32>
    %c7_i32 = arith.constant 7 : i32
    %19 = arith.muli %arg0, %c7_i32 : i32
    %c2_i32 = arith.constant 2 : i32
    %20 = arith.muli %c2_i32, %arg0 : i32
    %c1_i32 = arith.constant 1 : i32
    %21 = arith.subi %c1_i32, %20 : i32
    %c0_16 = arith.constant 0 : index
    %c0_17 = arith.constant 0 : index
    %22 = vector.load %arg10[%c0_16, %c0_17] : memref<16x128xf32, #tpu.memory_space<vmem>>, vector<16x128xf32>
    %c0_i32_18 = arith.constant 0 : i32
    %23 = arith.muli %21, %c0_i32_18 : i32
    %24 = arith.addi %19, %23 : i32
    %c16_i32 = arith.constant 16 : i32
    %25 = arith.muli %24, %c16_i32 : i32
    %26 = tpu.assume_multiple %25, 16 : i32
    %27 = arith.index_cast %26 : i32 to index
    %c0_19 = arith.constant 0 : index
    %28 = vector.load %arg9[%27, %c0_19] : memref<128x384xbf16, #tpu.memory_space<vmem>>, vector<16x384xbf16>
    %29 = arith.extf %28 : vector<16x384xbf16> to vector<16x384xf32>
    %30 = arith.truncf %22 : vector<16x128xf32> to vector<16x128xbf16>
    %cst_20 = arith.constant dense<0.000000e+00> : vector<16x384xf32>
    %31 = tpu.matmul %30, %14, %cst_20 {dimension_numbers = #tpu.dot_dimension_numbers<[1], [0], [0], [1], [0, 0, 1, 1], [], []>} : vector<16x128xbf16>, vector<128x384xbf16>, vector<16x384xf32> -> vector<16x384xf32>
    %32 = vector.extract_strided_slice %29 {offsets = [0, 0], sizes = [16, 128], strides = [1, 1]} : vector<16x384xf32> to vector<16x128xf32>
    %33 = vector.extract_strided_slice %31 {offsets = [0, 0], sizes = [16, 128], strides = [1, 1]} : vector<16x384xf32> to vector<16x128xf32>
    %34 = arith.addf %32, %33 : vector<16x128xf32>
    %35 = arith.negf %34 : vector<16x128xf32>
    %36 = math.exp %35 : vector<16x128xf32>
    %cst_21 = arith.constant 1.000000e+00 : f32
    %37 = vector.broadcast %cst_21 : f32 to vector<16x128xf32>
    %38 = arith.addf %37, %36 : vector<16x128xf32>
    %39 = arith.divf %37, %38 : vector<16x128xf32>
    %40 = vector.extract_strided_slice %29 {offsets = [0, 128], sizes = [16, 128], strides = [1, 1]} : vector<16x384xf32> to vector<16x128xf32>
    %41 = vector.extract_strided_slice %31 {offsets = [0, 128], sizes = [16, 128], strides = [1, 1]} : vector<16x384xf32> to vector<16x128xf32>
    %42 = arith.addf %40, %41 : vector<16x128xf32>
    %43 = arith.negf %42 : vector<16x128xf32>
    %44 = math.exp %43 : vector<16x128xf32>
    %cst_22 = arith.constant 1.000000e+00 : f32
    %45 = vector.broadcast %cst_22 : f32 to vector<16x128xf32>
    %46 = arith.addf %45, %44 : vector<16x128xf32>
    %47 = arith.divf %45, %46 : vector<16x128xf32>
    %48 = vector.extract_strided_slice %29 {offsets = [0, 256], sizes = [16, 128], strides = [1, 1]} : vector<16x384xf32> to vector<16x128xf32>
    %49 = vector.extract_strided_slice %31 {offsets = [0, 256], sizes = [16, 128], strides = [1, 1]} : vector<16x384xf32> to vector<16x128xf32>
    %50 = arith.addf %49, %18 : vector<16x128xf32>
    %51 = arith.mulf %39, %50 : vector<16x128xf32>
    %52 = arith.addf %48, %51 : vector<16x128xf32>
    %53 = math.tanh %52 : vector<16x128xf32>
    %cst_23 = arith.constant 1.000000e+00 : f32
    %54 = vector.broadcast %cst_23 : f32 to vector<16x128xf32>
    %55 = arith.subf %54, %47 : vector<16x128xf32>
    %56 = arith.mulf %55, %53 : vector<16x128xf32>
    %57 = arith.mulf %47, %22 : vector<16x128xf32>
    %58 = arith.addf %56, %57 : vector<16x128xf32>
    %59 = arith.truncf %58 : vector<16x128xf32> to vector<16x128xbf16>
    %60 = arith.index_cast %24 : i32 to index
    %c0_24 = arith.constant 0 : index
    %c0_25 = arith.constant 0 : index
    %61 = vector.load %arg7[%60, %c0_24, %c0_25] : memref<8x16x128xbf16, #tpu.memory_space<vmem>>, vector<1x16x128xbf16>
    %62 = vector.shape_cast %61 : vector<1x16x128xbf16> to vector<16x128xbf16>
    %63 = vector.shape_cast %59 : vector<16x128xbf16> to vector<1x16x128xbf16>
    tpu.vector_store %arg7[%60, %c0_24, %c0_25], %63 {strides = array<i32>} : memref<8x16x128xbf16, #tpu.memory_space<vmem>>, vector<1x16x128xbf16>,
    %c1_i32_26 = arith.constant 1 : i32
    %64 = arith.muli %21, %c1_i32_26 : i32
    %65 = arith.addi %19, %64 : i32
    %c16_i32_27 = arith.constant 16 : i32
    %66 = arith.muli %65, %c16_i32_27 : i32
    %67 = tpu.assume_multiple %66, 16 : i32
    %68 = arith.index_cast %67 : i32 to index
    %c0_28 = arith.constant 0 : index
    %69 = vector.load %arg9[%68, %c0_28] : memref<128x384xbf16, #tpu.memory_space<vmem>>, vector<16x384xbf16>
    %70 = arith.extf %69 : vector<16x384xbf16> to vector<16x384xf32>
    %71 = arith.truncf %58 : vector<16x128xf32> to vector<16x128xbf16>
    %cst_29 = arith.constant dense<0.000000e+00> : vector<16x384xf32>
    %72 = tpu.matmul %71, %14, %cst_29 {dimension_numbers = #tpu.dot_dimension_numbers<[1], [0], [0], [1], [0, 0, 1, 1], [], []>} : vector<16x128xbf16>, vector<128x384xbf16>, vector<16x384xf32> -> vector<16x384xf32>
    %73 = vector.extract_strided_slice %70 {offsets = [0, 0], sizes = [16, 128], strides = [1, 1]} : vector<16x384xf32> to vector<16x128xf32>
    %74 = vector.extract_strided_slice %72 {offsets = [0, 0], sizes = [16, 128], strides = [1, 1]} : vector<16x384xf32> to vector<16x128xf32>
    %75 = arith.addf %73, %74 : vector<16x128xf32>
    %76 = arith.negf %75 : vector<16x128xf32>
    %77 = math.exp %76 : vector<16x128xf32>
    %cst_30 = arith.constant 1.000000e+00 : f32
    %78 = vector.broadcast %cst_30 : f32 to vector<16x128xf32>
    %79 = arith.addf %78, %77 : vector<16x128xf32>
    %80 = arith.divf %78, %79 : vector<16x128xf32>
    %81 = vector.extract_strided_slice %70 {offsets = [0, 128], sizes = [16, 128], strides = [1, 1]} : vector<16x384xf32> to vector<16x128xf32>
    %82 = vector.extract_strided_slice %72 {offsets = [0, 128], sizes = [16, 128], strides = [1, 1]} : vector<16x384xf32> to vector<16x128xf32>
    %83 = arith.addf %81, %82 : vector<16x128xf32>
    %84 = arith.negf %83 : vector<16x128xf32>
    %85 = math.exp %84 : vector<16x128xf32>
    %cst_31 = arith.constant 1.000000e+00 : f32
    %86 = vector.broadcast %cst_31 : f32 to vector<16x128xf32>
    %87 = arith.addf %86, %85 : vector<16x128xf32>
    %88 = arith.divf %86, %87 : vector<16x128xf32>
    %89 = vector.extract_strided_slice %70 {offsets = [0, 256], sizes = [16, 128], strides = [1, 1]} : vector<16x384xf32> to vector<16x128xf32>
    %90 = vector.extract_strided_slice %72 {offsets = [0, 256], sizes = [16, 128], strides = [1, 1]} : vector<16x384xf32> to vector<16x128xf32>
    %91 = arith.addf %90, %18 : vector<16x128xf32>
    %92 = arith.mulf %80, %91 : vector<16x128xf32>
    %93 = arith.addf %89, %92 : vector<16x128xf32>
    %94 = math.tanh %93 : vector<16x128xf32>
    %cst_32 = arith.constant 1.000000e+00 : f32
    %95 = vector.broadcast %cst_32 : f32 to vector<16x128xf32>
    %96 = arith.subf %95, %88 : vector<16x128xf32>
    %97 = arith.mulf %96, %94 : vector<16x128xf32>
    %98 = arith.mulf %88, %58 : vector<16x128xf32>
    %99 = arith.addf %97, %98 : vector<16x128xf32>
    %100 = arith.truncf %99 : vector<16x128xf32> to vector<16x128xbf16>
    %101 = arith.index_cast %65 : i32 to index
    %c0_33 = arith.constant 0 : index
    %c0_34 = arith.constant 0 : index
    %102 = vector.load %arg7[%101, %c0_33, %c0_34] : memref<8x16x128xbf16, #tpu.memory_space<vmem>>, vector<1x16x128xbf16>
    %103 = vector.shape_cast %102 : vector<1x16x128xbf16> to vector<16x128xbf16>
    %104 = vector.shape_cast %100 : vector<16x128xbf16> to vector<1x16x128xbf16>
    tpu.vector_store %arg7[%101, %c0_33, %c0_34], %104 {strides = array<i32>} : memref<8x16x128xbf16, #tpu.memory_space<vmem>>, vector<1x16x128xbf16>,
    %c2_i32_35 = arith.constant 2 : i32
    %105 = arith.muli %21, %c2_i32_35 : i32
    %106 = arith.addi %19, %105 : i32
    %c16_i32_36 = arith.constant 16 : i32
    %107 = arith.muli %106, %c16_i32_36 : i32
    %108 = tpu.assume_multiple %107, 16 : i32
    %109 = arith.index_cast %108 : i32 to index
    %c0_37 = arith.constant 0 : index
    %110 = vector.load %arg9[%109, %c0_37] : memref<128x384xbf16, #tpu.memory_space<vmem>>, vector<16x384xbf16>
    %111 = arith.extf %110 : vector<16x384xbf16> to vector<16x384xf32>
    %112 = arith.truncf %99 : vector<16x128xf32> to vector<16x128xbf16>
    %cst_38 = arith.constant dense<0.000000e+00> : vector<16x384xf32>
    %113 = tpu.matmul %112, %14, %cst_38 {dimension_numbers = #tpu.dot_dimension_numbers<[1], [0], [0], [1], [0, 0, 1, 1], [], []>} : vector<16x128xbf16>, vector<128x384xbf16>, vector<16x384xf32> -> vector<16x384xf32>
    %114 = vector.extract_strided_slice %111 {offsets = [0, 0], sizes = [16, 128], strides = [1, 1]} : vector<16x384xf32> to vector<16x128xf32>
    %115 = vector.extract_strided_slice %113 {offsets = [0, 0], sizes = [16, 128], strides = [1, 1]} : vector<16x384xf32> to vector<16x128xf32>
    %116 = arith.addf %114, %115 : vector<16x128xf32>
    %117 = arith.negf %116 : vector<16x128xf32>
    %118 = math.exp %117 : vector<16x128xf32>
    %cst_39 = arith.constant 1.000000e+00 : f32
    %119 = vector.broadcast %cst_39 : f32 to vector<16x128xf32>
    %120 = arith.addf %119, %118 : vector<16x128xf32>
    %121 = arith.divf %119, %120 : vector<16x128xf32>
    %122 = vector.extract_strided_slice %111 {offsets = [0, 128], sizes = [16, 128], strides = [1, 1]} : vector<16x384xf32> to vector<16x128xf32>
    %123 = vector.extract_strided_slice %113 {offsets = [0, 128], sizes = [16, 128], strides = [1, 1]} : vector<16x384xf32> to vector<16x128xf32>
    %124 = arith.addf %122, %123 : vector<16x128xf32>
    %125 = arith.negf %124 : vector<16x128xf32>
    %126 = math.exp %125 : vector<16x128xf32>
    %cst_40 = arith.constant 1.000000e+00 : f32
    %127 = vector.broadcast %cst_40 : f32 to vector<16x128xf32>
    %128 = arith.addf %127, %126 : vector<16x128xf32>
    %129 = arith.divf %127, %128 : vector<16x128xf32>
    %130 = vector.extract_strided_slice %111 {offsets = [0, 256], sizes = [16, 128], strides = [1, 1]} : vector<16x384xf32> to vector<16x128xf32>
    %131 = vector.extract_strided_slice %113 {offsets = [0, 256], sizes = [16, 128], strides = [1, 1]} : vector<16x384xf32> to vector<16x128xf32>
    %132 = arith.addf %131, %18 : vector<16x128xf32>
    %133 = arith.mulf %121, %132 : vector<16x128xf32>
    %134 = arith.addf %130, %133 : vector<16x128xf32>
    %135 = math.tanh %134 : vector<16x128xf32>
    %cst_41 = arith.constant 1.000000e+00 : f32
    %136 = vector.broadcast %cst_41 : f32 to vector<16x128xf32>
    %137 = arith.subf %136, %129 : vector<16x128xf32>
    %138 = arith.mulf %137, %135 : vector<16x128xf32>
    %139 = arith.mulf %129, %99 : vector<16x128xf32>
    %140 = arith.addf %138, %139 : vector<16x128xf32>
    %141 = arith.truncf %140 : vector<16x128xf32> to vector<16x128xbf16>
    %142 = arith.index_cast %106 : i32 to index
    %c0_42 = arith.constant 0 : index
    %c0_43 = arith.constant 0 : index
    %143 = vector.load %arg7[%142, %c0_42, %c0_43] : memref<8x16x128xbf16, #tpu.memory_space<vmem>>, vector<1x16x128xbf16>
    %144 = vector.shape_cast %143 : vector<1x16x128xbf16> to vector<16x128xbf16>
    %145 = vector.shape_cast %141 : vector<16x128xbf16> to vector<1x16x128xbf16>
    tpu.vector_store %arg7[%142, %c0_42, %c0_43], %145 {strides = array<i32>} : memref<8x16x128xbf16, #tpu.memory_space<vmem>>, vector<1x16x128xbf16>,
    %c3_i32 = arith.constant 3 : i32
    %146 = arith.muli %21, %c3_i32 : i32
    %147 = arith.addi %19, %146 : i32
    %c16_i32_44 = arith.constant 16 : i32
    %148 = arith.muli %147, %c16_i32_44 : i32
    %149 = tpu.assume_multiple %148, 16 : i32
    %150 = arith.index_cast %149 : i32 to index
    %c0_45 = arith.constant 0 : index
    %151 = vector.load %arg9[%150, %c0_45] : memref<128x384xbf16, #tpu.memory_space<vmem>>, vector<16x384xbf16>
    %152 = arith.extf %151 : vector<16x384xbf16> to vector<16x384xf32>
    %153 = arith.truncf %140 : vector<16x128xf32> to vector<16x128xbf16>
    %cst_46 = arith.constant dense<0.000000e+00> : vector<16x384xf32>
    %154 = tpu.matmul %153, %14, %cst_46 {dimension_numbers = #tpu.dot_dimension_numbers<[1], [0], [0], [1], [0, 0, 1, 1], [], []>} : vector<16x128xbf16>, vector<128x384xbf16>, vector<16x384xf32> -> vector<16x384xf32>
    %155 = vector.extract_strided_slice %152 {offsets = [0, 0], sizes = [16, 128], strides = [1, 1]} : vector<16x384xf32> to vector<16x128xf32>
    %156 = vector.extract_strided_slice %154 {offsets = [0, 0], sizes = [16, 128], strides = [1, 1]} : vector<16x384xf32> to vector<16x128xf32>
    %157 = arith.addf %155, %156 : vector<16x128xf32>
    %158 = arith.negf %157 : vector<16x128xf32>
    %159 = math.exp %158 : vector<16x128xf32>
    %cst_47 = arith.constant 1.000000e+00 : f32
    %160 = vector.broadcast %cst_47 : f32 to vector<16x128xf32>
    %161 = arith.addf %160, %159 : vector<16x128xf32>
    %162 = arith.divf %160, %161 : vector<16x128xf32>
    %163 = vector.extract_strided_slice %152 {offsets = [0, 128], sizes = [16, 128], strides = [1, 1]} : vector<16x384xf32> to vector<16x128xf32>
    %164 = vector.extract_strided_slice %154 {offsets = [0, 128], sizes = [16, 128], strides = [1, 1]} : vector<16x384xf32> to vector<16x128xf32>
    %165 = arith.addf %163, %164 : vector<16x128xf32>
    %166 = arith.negf %165 : vector<16x128xf32>
    %167 = math.exp %166 : vector<16x128xf32>
    %cst_48 = arith.constant 1.000000e+00 : f32
    %168 = vector.broadcast %cst_48 : f32 to vector<16x128xf32>
    %169 = arith.addf %168, %167 : vector<16x128xf32>
    %170 = arith.divf %168, %169 : vector<16x128xf32>
    %171 = vector.extract_strided_slice %152 {offsets = [0, 256], sizes = [16, 128], strides = [1, 1]} : vector<16x384xf32> to vector<16x128xf32>
    %172 = vector.extract_strided_slice %154 {offsets = [0, 256], sizes = [16, 128], strides = [1, 1]} : vector<16x384xf32> to vector<16x128xf32>
    %173 = arith.addf %172, %18 : vector<16x128xf32>
    %174 = arith.mulf %162, %173 : vector<16x128xf32>
    %175 = arith.addf %171, %174 : vector<16x128xf32>
    %176 = math.tanh %175 : vector<16x128xf32>
    %cst_49 = arith.constant 1.000000e+00 : f32
    %177 = vector.broadcast %cst_49 : f32 to vector<16x128xf32>
    %178 = arith.subf %177, %170 : vector<16x128xf32>
    %179 = arith.mulf %178, %176 : vector<16x128xf32>
    %180 = arith.mulf %170, %140 : vector<16x128xf32>
    %181 = arith.addf %179, %180 : vector<16x128xf32>
    %182 = arith.truncf %181 : vector<16x128xf32> to vector<16x128xbf16>
    %183 = arith.index_cast %147 : i32 to index
    %c0_50 = arith.constant 0 : index
    %c0_51 = arith.constant 0 : index
    %184 = vector.load %arg7[%183, %c0_50, %c0_51] : memref<8x16x128xbf16, #tpu.memory_space<vmem>>, vector<1x16x128xbf16>
    %185 = vector.shape_cast %184 : vector<1x16x128xbf16> to vector<16x128xbf16>
    %186 = vector.shape_cast %182 : vector<16x128xbf16> to vector<1x16x128xbf16>
    tpu.vector_store %arg7[%183, %c0_50, %c0_51], %186 {strides = array<i32>} : memref<8x16x128xbf16, #tpu.memory_space<vmem>>, vector<1x16x128xbf16>,
    %c4_i32 = arith.constant 4 : i32
    %187 = arith.muli %21, %c4_i32 : i32
    %188 = arith.addi %19, %187 : i32
    %c16_i32_52 = arith.constant 16 : i32
    %189 = arith.muli %188, %c16_i32_52 : i32
    %190 = tpu.assume_multiple %189, 16 : i32
    %191 = arith.index_cast %190 : i32 to index
    %c0_53 = arith.constant 0 : index
    %192 = vector.load %arg9[%191, %c0_53] : memref<128x384xbf16, #tpu.memory_space<vmem>>, vector<16x384xbf16>
    %193 = arith.extf %192 : vector<16x384xbf16> to vector<16x384xf32>
    %194 = arith.truncf %181 : vector<16x128xf32> to vector<16x128xbf16>
    %cst_54 = arith.constant dense<0.000000e+00> : vector<16x384xf32>
    %195 = tpu.matmul %194, %14, %cst_54 {dimension_numbers = #tpu.dot_dimension_numbers<[1], [0], [0], [1], [0, 0, 1, 1], [], []>} : vector<16x128xbf16>, vector<128x384xbf16>, vector<16x384xf32> -> vector<16x384xf32>
    %196 = vector.extract_strided_slice %193 {offsets = [0, 0], sizes = [16, 128], strides = [1, 1]} : vector<16x384xf32> to vector<16x128xf32>
    %197 = vector.extract_strided_slice %195 {offsets = [0, 0], sizes = [16, 128], strides = [1, 1]} : vector<16x384xf32> to vector<16x128xf32>
    %198 = arith.addf %196, %197 : vector<16x128xf32>
    %199 = arith.negf %198 : vector<16x128xf32>
    %200 = math.exp %199 : vector<16x128xf32>
    %cst_55 = arith.constant 1.000000e+00 : f32
    %201 = vector.broadcast %cst_55 : f32 to vector<16x128xf32>
    %202 = arith.addf %201, %200 : vector<16x128xf32>
    %203 = arith.divf %201, %202 : vector<16x128xf32>
    %204 = vector.extract_strided_slice %193 {offsets = [0, 128], sizes = [16, 128], strides = [1, 1]} : vector<16x384xf32> to vector<16x128xf32>
    %205 = vector.extract_strided_slice %195 {offsets = [0, 128], sizes = [16, 128], strides = [1, 1]} : vector<16x384xf32> to vector<16x128xf32>
    %206 = arith.addf %204, %205 : vector<16x128xf32>
    %207 = arith.negf %206 : vector<16x128xf32>
    %208 = math.exp %207 : vector<16x128xf32>
    %cst_56 = arith.constant 1.000000e+00 : f32
    %209 = vector.broadcast %cst_56 : f32 to vector<16x128xf32>
    %210 = arith.addf %209, %208 : vector<16x128xf32>
    %211 = arith.divf %209, %210 : vector<16x128xf32>
    %212 = vector.extract_strided_slice %193 {offsets = [0, 256], sizes = [16, 128], strides = [1, 1]} : vector<16x384xf32> to vector<16x128xf32>
    %213 = vector.extract_strided_slice %195 {offsets = [0, 256], sizes = [16, 128], strides = [1, 1]} : vector<16x384xf32> to vector<16x128xf32>
    %214 = arith.addf %213, %18 : vector<16x128xf32>
    %215 = arith.mulf %203, %214 : vector<16x128xf32>
    %216 = arith.addf %212, %215 : vector<16x128xf32>
    %217 = math.tanh %216 : vector<16x128xf32>
    %cst_57 = arith.constant 1.000000e+00 : f32
    %218 = vector.broadcast %cst_57 : f32 to vector<16x128xf32>
    %219 = arith.subf %218, %211 : vector<16x128xf32>
    %220 = arith.mulf %219, %217 : vector<16x128xf32>
    %221 = arith.mulf %211, %181 : vector<16x128xf32>
    %222 = arith.addf %220, %221 : vector<16x128xf32>
    %223 = arith.truncf %222 : vector<16x128xf32> to vector<16x128xbf16>
    %224 = arith.index_cast %188 : i32 to index
    %c0_58 = arith.constant 0 : index
    %c0_59 = arith.constant 0 : index
    %225 = vector.load %arg7[%224, %c0_58, %c0_59] : memref<8x16x128xbf16, #tpu.memory_space<vmem>>, vector<1x16x128xbf16>
    %226 = vector.shape_cast %225 : vector<1x16x128xbf16> to vector<16x128xbf16>
    %227 = vector.shape_cast %223 : vector<16x128xbf16> to vector<1x16x128xbf16>
    tpu.vector_store %arg7[%224, %c0_58, %c0_59], %227 {strides = array<i32>} : memref<8x16x128xbf16, #tpu.memory_space<vmem>>, vector<1x16x128xbf16>,
    %c5_i32 = arith.constant 5 : i32
    %228 = arith.muli %21, %c5_i32 : i32
    %229 = arith.addi %19, %228 : i32
    %c16_i32_60 = arith.constant 16 : i32
    %230 = arith.muli %229, %c16_i32_60 : i32
    %231 = tpu.assume_multiple %230, 16 : i32
    %232 = arith.index_cast %231 : i32 to index
    %c0_61 = arith.constant 0 : index
    %233 = vector.load %arg9[%232, %c0_61] : memref<128x384xbf16, #tpu.memory_space<vmem>>, vector<16x384xbf16>
    %234 = arith.extf %233 : vector<16x384xbf16> to vector<16x384xf32>
    %235 = arith.truncf %222 : vector<16x128xf32> to vector<16x128xbf16>
    %cst_62 = arith.constant dense<0.000000e+00> : vector<16x384xf32>
    %236 = tpu.matmul %235, %14, %cst_62 {dimension_numbers = #tpu.dot_dimension_numbers<[1], [0], [0], [1], [0, 0, 1, 1], [], []>} : vector<16x128xbf16>, vector<128x384xbf16>, vector<16x384xf32> -> vector<16x384xf32>
    %237 = vector.extract_strided_slice %234 {offsets = [0, 0], sizes = [16, 128], strides = [1, 1]} : vector<16x384xf32> to vector<16x128xf32>
    %238 = vector.extract_strided_slice %236 {offsets = [0, 0], sizes = [16, 128], strides = [1, 1]} : vector<16x384xf32> to vector<16x128xf32>
    %239 = arith.addf %237, %238 : vector<16x128xf32>
    %240 = arith.negf %239 : vector<16x128xf32>
    %241 = math.exp %240 : vector<16x128xf32>
    %cst_63 = arith.constant 1.000000e+00 : f32
    %242 = vector.broadcast %cst_63 : f32 to vector<16x128xf32>
    %243 = arith.addf %242, %241 : vector<16x128xf32>
    %244 = arith.divf %242, %243 : vector<16x128xf32>
    %245 = vector.extract_strided_slice %234 {offsets = [0, 128], sizes = [16, 128], strides = [1, 1]} : vector<16x384xf32> to vector<16x128xf32>
    %246 = vector.extract_strided_slice %236 {offsets = [0, 128], sizes = [16, 128], strides = [1, 1]} : vector<16x384xf32> to vector<16x128xf32>
    %247 = arith.addf %245, %246 : vector<16x128xf32>
    %248 = arith.negf %247 : vector<16x128xf32>
    %249 = math.exp %248 : vector<16x128xf32>
    %cst_64 = arith.constant 1.000000e+00 : f32
    %250 = vector.broadcast %cst_64 : f32 to vector<16x128xf32>
    %251 = arith.addf %250, %249 : vector<16x128xf32>
    %252 = arith.divf %250, %251 : vector<16x128xf32>
    %253 = vector.extract_strided_slice %234 {offsets = [0, 256], sizes = [16, 128], strides = [1, 1]} : vector<16x384xf32> to vector<16x128xf32>
    %254 = vector.extract_strided_slice %236 {offsets = [0, 256], sizes = [16, 128], strides = [1, 1]} : vector<16x384xf32> to vector<16x128xf32>
    %255 = arith.addf %254, %18 : vector<16x128xf32>
    %256 = arith.mulf %244, %255 : vector<16x128xf32>
    %257 = arith.addf %253, %256 : vector<16x128xf32>
    %258 = math.tanh %257 : vector<16x128xf32>
    %cst_65 = arith.constant 1.000000e+00 : f32
    %259 = vector.broadcast %cst_65 : f32 to vector<16x128xf32>
    %260 = arith.subf %259, %252 : vector<16x128xf32>
    %261 = arith.mulf %260, %258 : vector<16x128xf32>
    %262 = arith.mulf %252, %222 : vector<16x128xf32>
    %263 = arith.addf %261, %262 : vector<16x128xf32>
    %264 = arith.truncf %263 : vector<16x128xf32> to vector<16x128xbf16>
    %265 = arith.index_cast %229 : i32 to index
    %c0_66 = arith.constant 0 : index
    %c0_67 = arith.constant 0 : index
    %266 = vector.load %arg7[%265, %c0_66, %c0_67] : memref<8x16x128xbf16, #tpu.memory_space<vmem>>, vector<1x16x128xbf16>
    %267 = vector.shape_cast %266 : vector<1x16x128xbf16> to vector<16x128xbf16>
    %268 = vector.shape_cast %264 : vector<16x128xbf16> to vector<1x16x128xbf16>
    tpu.vector_store %arg7[%265, %c0_66, %c0_67], %268 {strides = array<i32>} : memref<8x16x128xbf16, #tpu.memory_space<vmem>>, vector<1x16x128xbf16>,
    %c6_i32 = arith.constant 6 : i32
    %269 = arith.muli %21, %c6_i32 : i32
    %270 = arith.addi %19, %269 : i32
    %c16_i32_68 = arith.constant 16 : i32
    %271 = arith.muli %270, %c16_i32_68 : i32
    %272 = tpu.assume_multiple %271, 16 : i32
    %273 = arith.index_cast %272 : i32 to index
    %c0_69 = arith.constant 0 : index
    %274 = vector.load %arg9[%273, %c0_69] : memref<128x384xbf16, #tpu.memory_space<vmem>>, vector<16x384xbf16>
    %275 = arith.extf %274 : vector<16x384xbf16> to vector<16x384xf32>
    %276 = arith.truncf %263 : vector<16x128xf32> to vector<16x128xbf16>
    %cst_70 = arith.constant dense<0.000000e+00> : vector<16x384xf32>
    %277 = tpu.matmul %276, %14, %cst_70 {dimension_numbers = #tpu.dot_dimension_numbers<[1], [0], [0], [1], [0, 0, 1, 1], [], []>} : vector<16x128xbf16>, vector<128x384xbf16>, vector<16x384xf32> -> vector<16x384xf32>
    %278 = vector.extract_strided_slice %275 {offsets = [0, 0], sizes = [16, 128], strides = [1, 1]} : vector<16x384xf32> to vector<16x128xf32>
    %279 = vector.extract_strided_slice %277 {offsets = [0, 0], sizes = [16, 128], strides = [1, 1]} : vector<16x384xf32> to vector<16x128xf32>
    %280 = arith.addf %278, %279 : vector<16x128xf32>
    %281 = arith.negf %280 : vector<16x128xf32>
    %282 = math.exp %281 : vector<16x128xf32>
    %cst_71 = arith.constant 1.000000e+00 : f32
    %283 = vector.broadcast %cst_71 : f32 to vector<16x128xf32>
    %284 = arith.addf %283, %282 : vector<16x128xf32>
    %285 = arith.divf %283, %284 : vector<16x128xf32>
    %286 = vector.extract_strided_slice %275 {offsets = [0, 128], sizes = [16, 128], strides = [1, 1]} : vector<16x384xf32> to vector<16x128xf32>
    %287 = vector.extract_strided_slice %277 {offsets = [0, 128], sizes = [16, 128], strides = [1, 1]} : vector<16x384xf32> to vector<16x128xf32>
    %288 = arith.addf %286, %287 : vector<16x128xf32>
    %289 = arith.negf %288 : vector<16x128xf32>
    %290 = math.exp %289 : vector<16x128xf32>
    %cst_72 = arith.constant 1.000000e+00 : f32
    %291 = vector.broadcast %cst_72 : f32 to vector<16x128xf32>
    %292 = arith.addf %291, %290 : vector<16x128xf32>
    %293 = arith.divf %291, %292 : vector<16x128xf32>
    %294 = vector.extract_strided_slice %275 {offsets = [0, 256], sizes = [16, 128], strides = [1, 1]} : vector<16x384xf32> to vector<16x128xf32>
    %295 = vector.extract_strided_slice %277 {offsets = [0, 256], sizes = [16, 128], strides = [1, 1]} : vector<16x384xf32> to vector<16x128xf32>
    %296 = arith.addf %295, %18 : vector<16x128xf32>
    %297 = arith.mulf %285, %296 : vector<16x128xf32>
    %298 = arith.addf %294, %297 : vector<16x128xf32>
    %299 = math.tanh %298 : vector<16x128xf32>
    %cst_73 = arith.constant 1.000000e+00 : f32
    %300 = vector.broadcast %cst_73 : f32 to vector<16x128xf32>
    %301 = arith.subf %300, %293 : vector<16x128xf32>
    %302 = arith.mulf %301, %299 : vector<16x128xf32>
    %303 = arith.mulf %293, %263 : vector<16x128xf32>
    %304 = arith.addf %302, %303 : vector<16x128xf32>
    %305 = arith.truncf %304 : vector<16x128xf32> to vector<16x128xbf16>
    %306 = arith.index_cast %270 : i32 to index
    %c0_74 = arith.constant 0 : index
    %c0_75 = arith.constant 0 : index
    %307 = vector.load %arg7[%306, %c0_74, %c0_75] : memref<8x16x128xbf16, #tpu.memory_space<vmem>>, vector<1x16x128xbf16>
    %308 = vector.shape_cast %307 : vector<1x16x128xbf16> to vector<16x128xbf16>
    %309 = vector.shape_cast %305 : vector<16x128xbf16> to vector<1x16x128xbf16>
    tpu.vector_store %arg7[%306, %c0_74, %c0_75], %309 {strides = array<i32>} : memref<8x16x128xbf16, #tpu.memory_space<vmem>>, vector<1x16x128xbf16>,
    %c7_i32_76 = arith.constant 7 : i32
    %310 = arith.muli %21, %c7_i32_76 : i32
    %311 = arith.addi %19, %310 : i32
    %c16_i32_77 = arith.constant 16 : i32
    %312 = arith.muli %311, %c16_i32_77 : i32
    %313 = tpu.assume_multiple %312, 16 : i32
    %314 = arith.index_cast %313 : i32 to index
    %c0_78 = arith.constant 0 : index
    %315 = vector.load %arg9[%314, %c0_78] : memref<128x384xbf16, #tpu.memory_space<vmem>>, vector<16x384xbf16>
    %316 = arith.extf %315 : vector<16x384xbf16> to vector<16x384xf32>
    %317 = arith.truncf %304 : vector<16x128xf32> to vector<16x128xbf16>
    %cst_79 = arith.constant dense<0.000000e+00> : vector<16x384xf32>
    %318 = tpu.matmul %317, %14, %cst_79 {dimension_numbers = #tpu.dot_dimension_numbers<[1], [0], [0], [1], [0, 0, 1, 1], [], []>} : vector<16x128xbf16>, vector<128x384xbf16>, vector<16x384xf32> -> vector<16x384xf32>
    %319 = vector.extract_strided_slice %316 {offsets = [0, 0], sizes = [16, 128], strides = [1, 1]} : vector<16x384xf32> to vector<16x128xf32>
    %320 = vector.extract_strided_slice %318 {offsets = [0, 0], sizes = [16, 128], strides = [1, 1]} : vector<16x384xf32> to vector<16x128xf32>
    %321 = arith.addf %319, %320 : vector<16x128xf32>
    %322 = arith.negf %321 : vector<16x128xf32>
    %323 = math.exp %322 : vector<16x128xf32>
    %cst_80 = arith.constant 1.000000e+00 : f32
    %324 = vector.broadcast %cst_80 : f32 to vector<16x128xf32>
    %325 = arith.addf %324, %323 : vector<16x128xf32>
    %326 = arith.divf %324, %325 : vector<16x128xf32>
    %327 = vector.extract_strided_slice %316 {offsets = [0, 128], sizes = [16, 128], strides = [1, 1]} : vector<16x384xf32> to vector<16x128xf32>
    %328 = vector.extract_strided_slice %318 {offsets = [0, 128], sizes = [16, 128], strides = [1, 1]} : vector<16x384xf32> to vector<16x128xf32>
    %329 = arith.addf %327, %328 : vector<16x128xf32>
    %330 = arith.negf %329 : vector<16x128xf32>
    %331 = math.exp %330 : vector<16x128xf32>
    %cst_81 = arith.constant 1.000000e+00 : f32
    %332 = vector.broadcast %cst_81 : f32 to vector<16x128xf32>
    %333 = arith.addf %332, %331 : vector<16x128xf32>
    %334 = arith.divf %332, %333 : vector<16x128xf32>
    %335 = vector.extract_strided_slice %316 {offsets = [0, 256], sizes = [16, 128], strides = [1, 1]} : vector<16x384xf32> to vector<16x128xf32>
    %336 = vector.extract_strided_slice %318 {offsets = [0, 256], sizes = [16, 128], strides = [1, 1]} : vector<16x384xf32> to vector<16x128xf32>
    %337 = arith.addf %336, %18 : vector<16x128xf32>
    %338 = arith.mulf %326, %337 : vector<16x128xf32>
    %339 = arith.addf %335, %338 : vector<16x128xf32>
    %340 = math.tanh %339 : vector<16x128xf32>
    %cst_82 = arith.constant 1.000000e+00 : f32
    %341 = vector.broadcast %cst_82 : f32 to vector<16x128xf32>
    %342 = arith.subf %341, %334 : vector<16x128xf32>
    %343 = arith.mulf %342, %340 : vector<16x128xf32>
    %344 = arith.mulf %334, %304 : vector<16x128xf32>
    %345 = arith.addf %343, %344 : vector<16x128xf32>
    %346 = arith.truncf %345 : vector<16x128xf32> to vector<16x128xbf16>
    %347 = arith.index_cast %311 : i32 to index
    %c0_83 = arith.constant 0 : index
    %c0_84 = arith.constant 0 : index
    %348 = vector.load %arg7[%347, %c0_83, %c0_84] : memref<8x16x128xbf16, #tpu.memory_space<vmem>>, vector<1x16x128xbf16>
    %349 = vector.shape_cast %348 : vector<1x16x128xbf16> to vector<16x128xbf16>
    %350 = vector.shape_cast %346 : vector<16x128xbf16> to vector<1x16x128xbf16>
    tpu.vector_store %arg7[%347, %c0_83, %c0_84], %350 {strides = array<i32>} : memref<8x16x128xbf16, #tpu.memory_space<vmem>>, vector<1x16x128xbf16>,
    %c8_i32 = arith.constant 8 : i32
    %c0_85 = arith.constant 0 : index
    %c0_86 = arith.constant 0 : index
    %351 = vector.load %arg10[%c0_85, %c0_86] : memref<16x128xf32, #tpu.memory_space<vmem>>, vector<16x128xf32>
    tpu.vector_store %arg10[%c0_85, %c0_86], %345 {strides = array<i32>} : memref<16x128xf32, #tpu.memory_space<vmem>>, vector<16x128xf32>,
    %c0_87 = arith.constant 0 : index
    %c0_88 = arith.constant 0 : index
    %c0_89 = arith.constant 0 : index
    %352 = vector.load %arg8[%c0_87, %c0_88, %c0_89] : memref<1x16x128xf32, #tpu.memory_space<vmem>>, vector<1x16x128xf32>
    %353 = vector.shape_cast %352 : vector<1x16x128xf32> to vector<16x128xf32>
    %354 = vector.shape_cast %345 : vector<16x128xf32> to vector<1x16x128xf32>
    tpu.vector_store %arg8[%c0_87, %c0_88, %c0_89], %354 {strides = array<i32>} : memref<1x16x128xf32, #tpu.memory_space<vmem>>, vector<1x16x128xf32>,
    return
  }
  func.func @transform_0(%arg0: i32, %arg1: i32) -> (i32, i32) {
    %c2_i32 = arith.constant 2 : i32
    %0 = arith.muli %c2_i32, %arg1 : i32
    %c0_i32 = arith.constant 0 : i32
    %1 = arith.subi %c0_i32, %0 : i32
    %2 = arith.muli %arg0, %1 : i32
    %3 = arith.addi %arg1, %2 : i32
    %c0_i32_0 = arith.constant 0 : i32
    %c0_i32_1 = arith.constant 0 : i32
    return %3, %c0_i32_0 : i32, i32
  }
  func.func @transform_1(%arg0: i32, %arg1: i32) -> (i32, i32, i32) {
    %c0_i32 = arith.constant 0 : i32
    %c0_i32_0 = arith.constant 0 : i32
    %c0_i32_1 = arith.constant 0 : i32
    return %arg0, %c0_i32, %c0_i32_0 : i32, i32, i32
  }
  func.func @transform_2(%arg0: i32, %arg1: i32) -> (i32, i32, i32) {
    %c0_i32 = arith.constant 0 : i32
    %c0_i32_0 = arith.constant 0 : i32
    %c0_i32_1 = arith.constant 0 : i32
    return %arg0, %c0_i32, %c0_i32_0 : i32, i32, i32
  }
  func.func @transform_3(%arg0: i32, %arg1: i32) -> (i32, i32, i32) {
    %c0_i32 = arith.constant 0 : i32
    %c0_i32_0 = arith.constant 0 : i32
    %c0_i32_1 = arith.constant 0 : i32
    return %arg0, %c0_i32, %c0_i32_0 : i32, i32, i32
  }
  func.func @transform_4(%arg0: i32, %arg1: i32) -> (i32, i32, i32) {
    %c0_i32 = arith.constant 0 : i32
    %c0_i32_0 = arith.constant 0 : i32
    %c0_i32_1 = arith.constant 0 : i32
    return %arg0, %c0_i32, %c0_i32_0 : i32, i32, i32
  }
  func.func @transform_5(%arg0: i32, %arg1: i32) -> (i32, i32, i32) {
    %c2_i32 = arith.constant 2 : i32
    %0 = arith.muli %c2_i32, %arg1 : i32
    %c0_i32 = arith.constant 0 : i32
    %1 = arith.subi %c0_i32, %0 : i32
    %2 = arith.muli %arg0, %1 : i32
    %3 = arith.addi %arg1, %2 : i32
    %c0_i32_0 = arith.constant 0 : i32
    %c0_i32_1 = arith.constant 0 : i32
    return %3, %c0_i32_0, %arg0 : i32, i32, i32
  }
  func.func @transform_6(%arg0: i32, %arg1: i32) -> (i32, i32, i32) {
    %c0_i32 = arith.constant 0 : i32
    %c0_i32_0 = arith.constant 0 : i32
    %c0_i32_1 = arith.constant 0 : i32
    return %arg0, %c0_i32, %c0_i32_0 : i32, i32, i32
  }
}

module attributes {stable_mosaic.version = 11 : i64} {
  func.func @_gru_layer_kernel(%arg0: i32, %arg1: i32, %arg2: memref<128x16xbf16, #tpu.memory_space<vmem>>, %arg3: memref<1x16x384xbf16, #tpu.memory_space<vmem>>, %arg4: memref<1x128x384xbf16, #tpu.memory_space<vmem>>, %arg5: memref<1x1x384xf32, #tpu.memory_space<vmem>>, %arg6: memref<1x1x128xf32, #tpu.memory_space<vmem>>, %arg7: memref<8x16x128xbf16, #tpu.memory_space<vmem>>, %arg8: memref<1x16x128xf32, #tpu.memory_space<vmem>>, %arg9: memref<128x384xbf16, #tpu.memory_space<vmem>>, %arg10: memref<16x128xf32, #tpu.memory_space<vmem>>) attributes {dimension_semantics = [#tpu.dimension_semantics<parallel>, #tpu.dimension_semantics<arbitrary>], iteration_bounds = array<i64: 2, 1>, scalar_prefetch = 0 : i64, scratch_operands = 2 : i64, tpu.core_type = #tpu.core_type<tc>, window_params = [{transform_indices = @transform_0, window_bounds = array<i64: 128, 16>}, {transform_indices = @transform_1, window_bounds = array<i64: 1, 16, 384>}, {transform_indices = @transform_2, window_bounds = array<i64: 1, 128, 384>}, {transform_indices = @transform_3, window_bounds = array<i64: 1, 1, 384>}, {transform_indices = @transform_4, window_bounds = array<i64: 1, 1, 128>}, {transform_indices = @transform_5, window_bounds = array<i64: 8, 16, 128>}, {transform_indices = @transform_6, window_bounds = array<i64: 1, 16, 128>}]} {
    %c0_i32 = arith.constant 0 : i32
    %0 = arith.cmpi eq, %arg1, %c0_i32 : i32
    %1 = arith.extui %0 : i1 to i32
    %c0_i32_0 = arith.constant 0 : i32
    %2 = arith.cmpi ne, %1, %c0_i32_0 : i32
    scf.if %2 {
      %cst_90 = arith.constant 0.000000e+00 : f32
      %355 = vector.broadcast %cst_90 : f32 to vector<16x128xf32>
      %c0_91 = arith.constant 0 : index
      %c0_92 = arith.constant 0 : index
      %356 = vector.load %arg10[%c0_91, %c0_92] : memref<16x128xf32, #tpu.memory_space<vmem>>, vector<16x128xf32>
      tpu.vector_store %arg10[%c0_91, %c0_92], %355 {strides = array<i32>} : memref<16x128xf32, #tpu.memory_space<vmem>>, vector<16x128xf32>,
    } else {
    }
    %c0 = arith.constant 0 : index
    %c0_1 = arith.constant 0 : index
    %3 = vector.load %arg2[%c0, %c0_1] : memref<128x16xbf16, #tpu.memory_space<vmem>>, vector<128x16xbf16>
    %c0_2 = arith.constant 0 : index
    %c0_3 = arith.constant 0 : index
    %c0_4 = arith.constant 0 : index
    %4 = vector.load %arg3[%c0_2, %c0_3, %c0_4] : memref<1x16x384xbf16, #tpu.memory_space<vmem>>, vector<1x16x384xbf16>
    %5 = vector.shape_cast %4 : vector<1x16x384xbf16> to vector<16x384xbf16>
    %cst = arith.constant dense<0.000000e+00> : vector<128x384xf32>
    %6 = tpu.matmul %3, %5, %cst {dimension_numbers = #tpu.dot_dimension_numbers<[1], [0], [0], [1], [0, 0, 1, 1], [], []>} : vector<128x16xbf16>, vector<16x384xbf16>, vector<128x384xf32> -> vector<128x384xf32>
    %c0_5 = arith.constant 0 : index
    %c0_6 = arith.constant 0 : index
    %c0_7 = arith.constant 0 : index
    %7 = vector.load %arg5[%c0_5, %c0_6, %c0_7] : memref<1x1x384xf32, #tpu.memory_space<vmem>>, vector<1x1x384xf32>
    %8 = vector.shape_cast %7 : vector<1x1x384xf32> to vector<1x384xf32>
    %9 = vector.broadcast %8 : vector<1x384xf32> to vector<128x384xf32>
    %10 = arith.addf %6, %9 : vector<128x384xf32>
    %11 = arith.truncf %10 : vector<128x384xf32> to vector<128x384xbf16>
    %c0_8 = arith.constant 0 : index
    %c0_9 = arith.constant 0 : index
    %12 = vector.load %arg9[%c0_8, %c0_9] : memref<128x384xbf16, #tpu.memory_space<vmem>>, vector<128x384xbf16>
    tpu.vector_store %arg9[%c0_8, %c0_9], %11 {strides = array<i32>} : memref<128x384xbf16, #tpu.memory_space<vmem>>, vector<128x384xbf16>,
    %c0_10 = arith.constant 0 : index
    %c0_11 = arith.constant 0 : index
    %c0_12 = arith.constant 0 : index
    %13 = vector.load %arg4[%c0_10, %c0_11, %c0_12] : memref<1x128x384xbf16, #tpu.memory_space<vmem>>, vector<1x128x384xbf16>
    %14 = vector.shape_cast %13 : vector<1x128x384xbf16> to vector<128x384xbf16>
    %c0_13 = arith.constant 0 : index
    %c0_14 = arith.constant 0 : index
    %c0_15 = arith.constant 0 : index
    %15 = vector.load %arg6[%c0_13, %c0_14, %c0_15] : memref<1x1x128xf32, #tpu.memory_space<vmem>>, vector<1x1x128xf32>
    %16 = vector.shape_cast %15 : vector<1x1x128xf32> to vector<1x128xf32>
    %17 = vector.shape_cast %16 : vector<1x128xf32> to vector<1x128xf32>
    %18 = vector.broadcast %17 : vector<1x128xf32> to vector<16x128xf32>
    %c7_i32 = arith.constant 7 : i32
    %19 = arith.muli %arg0, %c7_i32 : i32
    %c2_i32 = arith.constant 2 : i32
    %20 = arith.muli %c2_i32, %arg0 : i32
    %c1_i32 = arith.constant 1 : i32
    %21 = arith.subi %c1_i32, %20 : i32
    %c0_16 = arith.constant 0 : index
    %c0_17 = arith.constant 0 : index
    %22 = vector.load %arg10[%c0_16, %c0_17] : memref<16x128xf32, #tpu.memory_space<vmem>>, vector<16x128xf32>
    %c0_i32_18 = arith.constant 0 : i32
    %23 = arith.muli %21, %c0_i32_18 : i32
    %24 = arith.addi %19, %23 : i32
    %c16_i32 = arith.constant 16 : i32
    %25 = arith.muli %24, %c16_i32 : i32
    %26 = tpu.assume_multiple %25, 16 : i32
    %27 = arith.index_cast %26 : i32 to index
    %c0_19 = arith.constant 0 : index
    %28 = vector.load %arg9[%27, %c0_19] : memref<128x384xbf16, #tpu.memory_space<vmem>>, vector<16x384xbf16>
    %29 = arith.extf %28 : vector<16x384xbf16> to vector<16x384xf32>
    %30 = arith.truncf %22 : vector<16x128xf32> to vector<16x128xbf16>
    %cst_20 = arith.constant dense<0.000000e+00> : vector<16x384xf32>
    %31 = tpu.matmul %30, %14, %cst_20 {dimension_numbers = #tpu.dot_dimension_numbers<[1], [0], [0], [1], [0, 0, 1, 1], [], []>} : vector<16x128xbf16>, vector<128x384xbf16>, vector<16x384xf32> -> vector<16x384xf32>
    %32 = vector.extract_strided_slice %29 {offsets = [0, 0], sizes = [16, 128], strides = [1, 1]} : vector<16x384xf32> to vector<16x128xf32>
    %33 = vector.extract_strided_slice %31 {offsets = [0, 0], sizes = [16, 128], strides = [1, 1]} : vector<16x384xf32> to vector<16x128xf32>
    %34 = arith.addf %32, %33 : vector<16x128xf32>
    %35 = arith.negf %34 : vector<16x128xf32>
    %36 = math.exp %35 : vector<16x128xf32>
    %cst_21 = arith.constant 1.000000e+00 : f32
    %37 = vector.broadcast %cst_21 : f32 to vector<16x128xf32>
    %38 = arith.addf %37, %36 : vector<16x128xf32>
    %39 = arith.divf %37, %38 : vector<16x128xf32>
    %40 = vector.extract_strided_slice %29 {offsets = [0, 128], sizes = [16, 128], strides = [1, 1]} : vector<16x384xf32> to vector<16x128xf32>
    %41 = vector.extract_strided_slice %31 {offsets = [0, 128], sizes = [16, 128], strides = [1, 1]} : vector<16x384xf32> to vector<16x128xf32>
    %42 = arith.addf %40, %41 : vector<16x128xf32>
    %43 = arith.negf %42 : vector<16x128xf32>
    %44 = math.exp %43 : vector<16x128xf32>
    %cst_22 = arith.constant 1.000000e+00 : f32
    %45 = vector.broadcast %cst_22 : f32 to vector<16x128xf32>
    %46 = arith.addf %45, %44 : vector<16x128xf32>
    %47 = arith.divf %45, %46 : vector<16x128xf32>
    %48 = vector.extract_strided_slice %29 {offsets = [0, 256], sizes = [16, 128], strides = [1, 1]} : vector<16x384xf32> to vector<16x128xf32>
    %49 = vector.extract_strided_slice %31 {offsets = [0, 256], sizes = [16, 128], strides = [1, 1]} : vector<16x384xf32> to vector<16x128xf32>
    %50 = arith.addf %49, %18 : vector<16x128xf32>
    %51 = arith.mulf %39, %50 : vector<16x128xf32>
    %52 = arith.addf %48, %51 : vector<16x128xf32>
    %53 = math.tanh %52 : vector<16x128xf32>
    %cst_23 = arith.constant 1.000000e+00 : f32
    %54 = vector.broadcast %cst_23 : f32 to vector<16x128xf32>
    %55 = arith.subf %54, %47 : vector<16x128xf32>
    %56 = arith.mulf %55, %53 : vector<16x128xf32>
    %57 = arith.mulf %47, %22 : vector<16x128xf32>
    %58 = arith.addf %56, %57 : vector<16x128xf32>
    %59 = arith.truncf %58 : vector<16x128xf32> to vector<16x128xbf16>
    %60 = arith.index_cast %24 : i32 to index
    %c0_24 = arith.constant 0 : index
    %c0_25 = arith.constant 0 : index
    %61 = vector.load %arg7[%60, %c0_24, %c0_25] : memref<8x16x128xbf16, #tpu.memory_space<vmem>>, vector<1x16x128xbf16>
    %62 = vector.shape_cast %61 : vector<1x16x128xbf16> to vector<16x128xbf16>
    %63 = vector.shape_cast %59 : vector<16x128xbf16> to vector<1x16x128xbf16>
    tpu.vector_store %arg7[%60, %c0_24, %c0_25], %63 {strides = array<i32>} : memref<8x16x128xbf16, #tpu.memory_space<vmem>>, vector<1x16x128xbf16>,
    %c1_i32_26 = arith.constant 1 : i32
    %64 = arith.muli %21, %c1_i32_26 : i32
    %65 = arith.addi %19, %64 : i32
    %c16_i32_27 = arith.constant 16 : i32
    %66 = arith.muli %65, %c16_i32_27 : i32
    %67 = tpu.assume_multiple %66, 16 : i32
    %68 = arith.index_cast %67 : i32 to index
    %c0_28 = arith.constant 0 : index
    %69 = vector.load %arg9[%68, %c0_28] : memref<128x384xbf16, #tpu.memory_space<vmem>>, vector<16x384xbf16>
    %70 = arith.extf %69 : vector<16x384xbf16> to vector<16x384xf32>
    %71 = arith.truncf %58 : vector<16x128xf32> to vector<16x128xbf16>
    %cst_29 = arith.constant dense<0.000000e+00> : vector<16x384xf32>
    %72 = tpu.matmul %71, %14, %cst_29 {dimension_numbers = #tpu.dot_dimension_numbers<[1], [0], [0], [1], [0, 0, 1, 1], [], []>} : vector<16x128xbf16>, vector<128x384xbf16>, vector<16x384xf32> -> vector<16x384xf32>
    %73 = vector.extract_strided_slice %70 {offsets = [0, 0], sizes = [16, 128], strides = [1, 1]} : vector<16x384xf32> to vector<16x128xf32>
    %74 = vector.extract_strided_slice %72 {offsets = [0, 0], sizes = [16, 128], strides = [1, 1]} : vector<16x384xf32> to vector<16x128xf32>
    %75 = arith.addf %73, %74 : vector<16x128xf32>
    %76 = arith.negf %75 : vector<16x128xf32>
    %77 = math.exp %76 : vector<16x128xf32>
    %cst_30 = arith.constant 1.000000e+00 : f32
    %78 = vector.broadcast %cst_30 : f32 to vector<16x128xf32>
    %79 = arith.addf %78, %77 : vector<16x128xf32>
    %80 = arith.divf %78, %79 : vector<16x128xf32>
    %81 = vector.extract_strided_slice %70 {offsets = [0, 128], sizes = [16, 128], strides = [1, 1]} : vector<16x384xf32> to vector<16x128xf32>
    %82 = vector.extract_strided_slice %72 {offsets = [0, 128], sizes = [16, 128], strides = [1, 1]} : vector<16x384xf32> to vector<16x128xf32>
    %83 = arith.addf %81, %82 : vector<16x128xf32>
    %84 = arith.negf %83 : vector<16x128xf32>
    %85 = math.exp %84 : vector<16x128xf32>
    %cst_31 = arith.constant 1.000000e+00 : f32
    %86 = vector.broadcast %cst_31 : f32 to vector<16x128xf32>
    %87 = arith.addf %86, %85 : vector<16x128xf32>
    %88 = arith.divf %86, %87 : vector<16x128xf32>
    %89 = vector.extract_strided_slice %70 {offsets = [0, 256], sizes = [16, 128], strides = [1, 1]} : vector<16x384xf32> to vector<16x128xf32>
    %90 = vector.extract_strided_slice %72 {offsets = [0, 256], sizes = [16, 128], strides = [1, 1]} : vector<16x384xf32> to vector<16x128xf32>
    %91 = arith.addf %90, %18 : vector<16x128xf32>
    %92 = arith.mulf %80, %91 : vector<16x128xf32>
    %93 = arith.addf %89, %92 : vector<16x128xf32>
    %94 = math.tanh %93 : vector<16x128xf32>
    %cst_32 = arith.constant 1.000000e+00 : f32
    %95 = vector.broadcast %cst_32 : f32 to vector<16x128xf32>
    %96 = arith.subf %95, %88 : vector<16x128xf32>
    %97 = arith.mulf %96, %94 : vector<16x128xf32>
    %98 = arith.mulf %88, %58 : vector<16x128xf32>
    %99 = arith.addf %97, %98 : vector<16x128xf32>
    %100 = arith.truncf %99 : vector<16x128xf32> to vector<16x128xbf16>
    %101 = arith.index_cast %65 : i32 to index
    %c0_33 = arith.constant 0 : index
    %c0_34 = arith.constant 0 : index
    %102 = vector.load %arg7[%101, %c0_33, %c0_34] : memref<8x16x128xbf16, #tpu.memory_space<vmem>>, vector<1x16x128xbf16>
    %103 = vector.shape_cast %102 : vector<1x16x128xbf16> to vector<16x128xbf16>
    %104 = vector.shape_cast %100 : vector<16x128xbf16> to vector<1x16x128xbf16>
    tpu.vector_store %arg7[%101, %c0_33, %c0_34], %104 {strides = array<i32>} : memref<8x16x128xbf16, #tpu.memory_space<vmem>>, vector<1x16x128xbf16>,
    %c2_i32_35 = arith.constant 2 : i32
    %105 = arith.muli %21, %c2_i32_35 : i32
    %106 = arith.addi %19, %105 : i32
    %c16_i32_36 = arith.constant 16 : i32
    %107 = arith.muli %106, %c16_i32_36 : i32
    %108 = tpu.assume_multiple %107, 16 : i32
    %109 = arith.index_cast %108 : i32 to index
    %c0_37 = arith.constant 0 : index
    %110 = vector.load %arg9[%109, %c0_37] : memref<128x384xbf16, #tpu.memory_space<vmem>>, vector<16x384xbf16>
    %111 = arith.extf %110 : vector<16x384xbf16> to vector<16x384xf32>
    %112 = arith.truncf %99 : vector<16x128xf32> to vector<16x128xbf16>
    %cst_38 = arith.constant dense<0.000000e+00> : vector<16x384xf32>
    %113 = tpu.matmul %112, %14, %cst_38 {dimension_numbers = #tpu.dot_dimension_numbers<[1], [0], [0], [1], [0, 0, 1, 1], [], []>} : vector<16x128xbf16>, vector<128x384xbf16>, vector<16x384xf32> -> vector<16x384xf32>
    %114 = vector.extract_strided_slice %111 {offsets = [0, 0], sizes = [16, 128], strides = [1, 1]} : vector<16x384xf32> to vector<16x128xf32>
    %115 = vector.extract_strided_slice %113 {offsets = [0, 0], sizes = [16, 128], strides = [1, 1]} : vector<16x384xf32> to vector<16x128xf32>
    %116 = arith.addf %114, %115 : vector<16x128xf32>
    %117 = arith.negf %116 : vector<16x128xf32>
    %118 = math.exp %117 : vector<16x128xf32>
    %cst_39 = arith.constant 1.000000e+00 : f32
    %119 = vector.broadcast %cst_39 : f32 to vector<16x128xf32>
    %120 = arith.addf %119, %118 : vector<16x128xf32>
    %121 = arith.divf %119, %120 : vector<16x128xf32>
    %122 = vector.extract_strided_slice %111 {offsets = [0, 128], sizes = [16, 128], strides = [1, 1]} : vector<16x384xf32> to vector<16x128xf32>
    %123 = vector.extract_strided_slice %113 {offsets = [0, 128], sizes = [16, 128], strides = [1, 1]} : vector<16x384xf32> to vector<16x128xf32>
    %124 = arith.addf %122, %123 : vector<16x128xf32>
    %125 = arith.negf %124 : vector<16x128xf32>
    %126 = math.exp %125 : vector<16x128xf32>
    %cst_40 = arith.constant 1.000000e+00 : f32
    %127 = vector.broadcast %cst_40 : f32 to vector<16x128xf32>
    %128 = arith.addf %127, %126 : vector<16x128xf32>
    %129 = arith.divf %127, %128 : vector<16x128xf32>
    %130 = vector.extract_strided_slice %111 {offsets = [0, 256], sizes = [16, 128], strides = [1, 1]} : vector<16x384xf32> to vector<16x128xf32>
    %131 = vector.extract_strided_slice %113 {offsets = [0, 256], sizes = [16, 128], strides = [1, 1]} : vector<16x384xf32> to vector<16x128xf32>
    %132 = arith.addf %131, %18 : vector<16x128xf32>
    %133 = arith.mulf %121, %132 : vector<16x128xf32>
    %134 = arith.addf %130, %133 : vector<16x128xf32>
    %135 = math.tanh %134 : vector<16x128xf32>
    %cst_41 = arith.constant 1.000000e+00 : f32
    %136 = vector.broadcast %cst_41 : f32 to vector<16x128xf32>
    %137 = arith.subf %136, %129 : vector<16x128xf32>
    %138 = arith.mulf %137, %135 : vector<16x128xf32>
    %139 = arith.mulf %129, %99 : vector<16x128xf32>
    %140 = arith.addf %138, %139 : vector<16x128xf32>
    %141 = arith.truncf %140 : vector<16x128xf32> to vector<16x128xbf16>
    %142 = arith.index_cast %106 : i32 to index
    %c0_42 = arith.constant 0 : index
    %c0_43 = arith.constant 0 : index
    %143 = vector.load %arg7[%142, %c0_42, %c0_43] : memref<8x16x128xbf16, #tpu.memory_space<vmem>>, vector<1x16x128xbf16>
    %144 = vector.shape_cast %143 : vector<1x16x128xbf16> to vector<16x128xbf16>
    %145 = vector.shape_cast %141 : vector<16x128xbf16> to vector<1x16x128xbf16>
    tpu.vector_store %arg7[%142, %c0_42, %c0_43], %145 {strides = array<i32>} : memref<8x16x128xbf16, #tpu.memory_space<vmem>>, vector<1x16x128xbf16>,
    %c3_i32 = arith.constant 3 : i32
    %146 = arith.muli %21, %c3_i32 : i32
    %147 = arith.addi %19, %146 : i32
    %c16_i32_44 = arith.constant 16 : i32
    %148 = arith.muli %147, %c16_i32_44 : i32
    %149 = tpu.assume_multiple %148, 16 : i32
    %150 = arith.index_cast %149 : i32 to index
    %c0_45 = arith.constant 0 : index
    %151 = vector.load %arg9[%150, %c0_45] : memref<128x384xbf16, #tpu.memory_space<vmem>>, vector<16x384xbf16>
    %152 = arith.extf %151 : vector<16x384xbf16> to vector<16x384xf32>
    %153 = arith.truncf %140 : vector<16x128xf32> to vector<16x128xbf16>
    %cst_46 = arith.constant dense<0.000000e+00> : vector<16x384xf32>
    %154 = tpu.matmul %153, %14, %cst_46 {dimension_numbers = #tpu.dot_dimension_numbers<[1], [0], [0], [1], [0, 0, 1, 1], [], []>} : vector<16x128xbf16>, vector<128x384xbf16>, vector<16x384xf32> -> vector<16x384xf32>
    %155 = vector.extract_strided_slice %152 {offsets = [0, 0], sizes = [16, 128], strides = [1, 1]} : vector<16x384xf32> to vector<16x128xf32>
    %156 = vector.extract_strided_slice %154 {offsets = [0, 0], sizes = [16, 128], strides = [1, 1]} : vector<16x384xf32> to vector<16x128xf32>
    %157 = arith.addf %155, %156 : vector<16x128xf32>
    %158 = arith.negf %157 : vector<16x128xf32>
    %159 = math.exp %158 : vector<16x128xf32>
    %cst_47 = arith.constant 1.000000e+00 : f32
    %160 = vector.broadcast %cst_47 : f32 to vector<16x128xf32>
    %161 = arith.addf %160, %159 : vector<16x128xf32>
    %162 = arith.divf %160, %161 : vector<16x128xf32>
    %163 = vector.extract_strided_slice %152 {offsets = [0, 128], sizes = [16, 128], strides = [1, 1]} : vector<16x384xf32> to vector<16x128xf32>
    %164 = vector.extract_strided_slice %154 {offsets = [0, 128], sizes = [16, 128], strides = [1, 1]} : vector<16x384xf32> to vector<16x128xf32>
    %165 = arith.addf %163, %164 : vector<16x128xf32>
    %166 = arith.negf %165 : vector<16x128xf32>
    %167 = math.exp %166 : vector<16x128xf32>
    %cst_48 = arith.constant 1.000000e+00 : f32
    %168 = vector.broadcast %cst_48 : f32 to vector<16x128xf32>
    %169 = arith.addf %168, %167 : vector<16x128xf32>
    %170 = arith.divf %168, %169 : vector<16x128xf32>
    %171 = vector.extract_strided_slice %152 {offsets = [0, 256], sizes = [16, 128], strides = [1, 1]} : vector<16x384xf32> to vector<16x128xf32>
    %172 = vector.extract_strided_slice %154 {offsets = [0, 256], sizes = [16, 128], strides = [1, 1]} : vector<16x384xf32> to vector<16x128xf32>
    %173 = arith.addf %172, %18 : vector<16x128xf32>
    %174 = arith.mulf %162, %173 : vector<16x128xf32>
    %175 = arith.addf %171, %174 : vector<16x128xf32>
    %176 = math.tanh %175 : vector<16x128xf32>
    %cst_49 = arith.constant 1.000000e+00 : f32
    %177 = vector.broadcast %cst_49 : f32 to vector<16x128xf32>
    %178 = arith.subf %177, %170 : vector<16x128xf32>
    %179 = arith.mulf %178, %176 : vector<16x128xf32>
    %180 = arith.mulf %170, %140 : vector<16x128xf32>
    %181 = arith.addf %179, %180 : vector<16x128xf32>
    %182 = arith.truncf %181 : vector<16x128xf32> to vector<16x128xbf16>
    %183 = arith.index_cast %147 : i32 to index
    %c0_50 = arith.constant 0 : index
    %c0_51 = arith.constant 0 : index
    %184 = vector.load %arg7[%183, %c0_50, %c0_51] : memref<8x16x128xbf16, #tpu.memory_space<vmem>>, vector<1x16x128xbf16>
    %185 = vector.shape_cast %184 : vector<1x16x128xbf16> to vector<16x128xbf16>
    %186 = vector.shape_cast %182 : vector<16x128xbf16> to vector<1x16x128xbf16>
    tpu.vector_store %arg7[%183, %c0_50, %c0_51], %186 {strides = array<i32>} : memref<8x16x128xbf16, #tpu.memory_space<vmem>>, vector<1x16x128xbf16>,
    %c4_i32 = arith.constant 4 : i32
    %187 = arith.muli %21, %c4_i32 : i32
    %188 = arith.addi %19, %187 : i32
    %c16_i32_52 = arith.constant 16 : i32
    %189 = arith.muli %188, %c16_i32_52 : i32
    %190 = tpu.assume_multiple %189, 16 : i32
    %191 = arith.index_cast %190 : i32 to index
    %c0_53 = arith.constant 0 : index
    %192 = vector.load %arg9[%191, %c0_53] : memref<128x384xbf16, #tpu.memory_space<vmem>>, vector<16x384xbf16>
    %193 = arith.extf %192 : vector<16x384xbf16> to vector<16x384xf32>
    %194 = arith.truncf %181 : vector<16x128xf32> to vector<16x128xbf16>
    %cst_54 = arith.constant dense<0.000000e+00> : vector<16x384xf32>
    %195 = tpu.matmul %194, %14, %cst_54 {dimension_numbers = #tpu.dot_dimension_numbers<[1], [0], [0], [1], [0, 0, 1, 1], [], []>} : vector<16x128xbf16>, vector<128x384xbf16>, vector<16x384xf32> -> vector<16x384xf32>
    %196 = vector.extract_strided_slice %193 {offsets = [0, 0], sizes = [16, 128], strides = [1, 1]} : vector<16x384xf32> to vector<16x128xf32>
    %197 = vector.extract_strided_slice %195 {offsets = [0, 0], sizes = [16, 128], strides = [1, 1]} : vector<16x384xf32> to vector<16x128xf32>
    %198 = arith.addf %196, %197 : vector<16x128xf32>
    %199 = arith.negf %198 : vector<16x128xf32>
    %200 = math.exp %199 : vector<16x128xf32>
    %cst_55 = arith.constant 1.000000e+00 : f32
    %201 = vector.broadcast %cst_55 : f32 to vector<16x128xf32>
    %202 = arith.addf %201, %200 : vector<16x128xf32>
    %203 = arith.divf %201, %202 : vector<16x128xf32>
    %204 = vector.extract_strided_slice %193 {offsets = [0, 128], sizes = [16, 128], strides = [1, 1]} : vector<16x384xf32> to vector<16x128xf32>
    %205 = vector.extract_strided_slice %195 {offsets = [0, 128], sizes = [16, 128], strides = [1, 1]} : vector<16x384xf32> to vector<16x128xf32>
    %206 = arith.addf %204, %205 : vector<16x128xf32>
    %207 = arith.negf %206 : vector<16x128xf32>
    %208 = math.exp %207 : vector<16x128xf32>
    %cst_56 = arith.constant 1.000000e+00 : f32
    %209 = vector.broadcast %cst_56 : f32 to vector<16x128xf32>
    %210 = arith.addf %209, %208 : vector<16x128xf32>
    %211 = arith.divf %209, %210 : vector<16x128xf32>
    %212 = vector.extract_strided_slice %193 {offsets = [0, 256], sizes = [16, 128], strides = [1, 1]} : vector<16x384xf32> to vector<16x128xf32>
    %213 = vector.extract_strided_slice %195 {offsets = [0, 256], sizes = [16, 128], strides = [1, 1]} : vector<16x384xf32> to vector<16x128xf32>
    %214 = arith.addf %213, %18 : vector<16x128xf32>
    %215 = arith.mulf %203, %214 : vector<16x128xf32>
    %216 = arith.addf %212, %215 : vector<16x128xf32>
    %217 = math.tanh %216 : vector<16x128xf32>
    %cst_57 = arith.constant 1.000000e+00 : f32
    %218 = vector.broadcast %cst_57 : f32 to vector<16x128xf32>
    %219 = arith.subf %218, %211 : vector<16x128xf32>
    %220 = arith.mulf %219, %217 : vector<16x128xf32>
    %221 = arith.mulf %211, %181 : vector<16x128xf32>
    %222 = arith.addf %220, %221 : vector<16x128xf32>
    %223 = arith.truncf %222 : vector<16x128xf32> to vector<16x128xbf16>
    %224 = arith.index_cast %188 : i32 to index
    %c0_58 = arith.constant 0 : index
    %c0_59 = arith.constant 0 : index
    %225 = vector.load %arg7[%224, %c0_58, %c0_59] : memref<8x16x128xbf16, #tpu.memory_space<vmem>>, vector<1x16x128xbf16>
    %226 = vector.shape_cast %225 : vector<1x16x128xbf16> to vector<16x128xbf16>
    %227 = vector.shape_cast %223 : vector<16x128xbf16> to vector<1x16x128xbf16>
    tpu.vector_store %arg7[%224, %c0_58, %c0_59], %227 {strides = array<i32>} : memref<8x16x128xbf16, #tpu.memory_space<vmem>>, vector<1x16x128xbf16>,
    %c5_i32 = arith.constant 5 : i32
    %228 = arith.muli %21, %c5_i32 : i32
    %229 = arith.addi %19, %228 : i32
    %c16_i32_60 = arith.constant 16 : i32
    %230 = arith.muli %229, %c16_i32_60 : i32
    %231 = tpu.assume_multiple %230, 16 : i32
    %232 = arith.index_cast %231 : i32 to index
    %c0_61 = arith.constant 0 : index
    %233 = vector.load %arg9[%232, %c0_61] : memref<128x384xbf16, #tpu.memory_space<vmem>>, vector<16x384xbf16>
    %234 = arith.extf %233 : vector<16x384xbf16> to vector<16x384xf32>
    %235 = arith.truncf %222 : vector<16x128xf32> to vector<16x128xbf16>
    %cst_62 = arith.constant dense<0.000000e+00> : vector<16x384xf32>
    %236 = tpu.matmul %235, %14, %cst_62 {dimension_numbers = #tpu.dot_dimension_numbers<[1], [0], [0], [1], [0, 0, 1, 1], [], []>} : vector<16x128xbf16>, vector<128x384xbf16>, vector<16x384xf32> -> vector<16x384xf32>
    %237 = vector.extract_strided_slice %234 {offsets = [0, 0], sizes = [16, 128], strides = [1, 1]} : vector<16x384xf32> to vector<16x128xf32>
    %238 = vector.extract_strided_slice %236 {offsets = [0, 0], sizes = [16, 128], strides = [1, 1]} : vector<16x384xf32> to vector<16x128xf32>
    %239 = arith.addf %237, %238 : vector<16x128xf32>
    %240 = arith.negf %239 : vector<16x128xf32>
    %241 = math.exp %240 : vector<16x128xf32>
    %cst_63 = arith.constant 1.000000e+00 : f32
    %242 = vector.broadcast %cst_63 : f32 to vector<16x128xf32>
    %243 = arith.addf %242, %241 : vector<16x128xf32>
    %244 = arith.divf %242, %243 : vector<16x128xf32>
    %245 = vector.extract_strided_slice %234 {offsets = [0, 128], sizes = [16, 128], strides = [1, 1]} : vector<16x384xf32> to vector<16x128xf32>
    %246 = vector.extract_strided_slice %236 {offsets = [0, 128], sizes = [16, 128], strides = [1, 1]} : vector<16x384xf32> to vector<16x128xf32>
    %247 = arith.addf %245, %246 : vector<16x128xf32>
    %248 = arith.negf %247 : vector<16x128xf32>
    %249 = math.exp %248 : vector<16x128xf32>
    %cst_64 = arith.constant 1.000000e+00 : f32
    %250 = vector.broadcast %cst_64 : f32 to vector<16x128xf32>
    %251 = arith.addf %250, %249 : vector<16x128xf32>
    %252 = arith.divf %250, %251 : vector<16x128xf32>
    %253 = vector.extract_strided_slice %234 {offsets = [0, 256], sizes = [16, 128], strides = [1, 1]} : vector<16x384xf32> to vector<16x128xf32>
    %254 = vector.extract_strided_slice %236 {offsets = [0, 256], sizes = [16, 128], strides = [1, 1]} : vector<16x384xf32> to vector<16x128xf32>
    %255 = arith.addf %254, %18 : vector<16x128xf32>
    %256 = arith.mulf %244, %255 : vector<16x128xf32>
    %257 = arith.addf %253, %256 : vector<16x128xf32>
    %258 = math.tanh %257 : vector<16x128xf32>
    %cst_65 = arith.constant 1.000000e+00 : f32
    %259 = vector.broadcast %cst_65 : f32 to vector<16x128xf32>
    %260 = arith.subf %259, %252 : vector<16x128xf32>
    %261 = arith.mulf %260, %258 : vector<16x128xf32>
    %262 = arith.mulf %252, %222 : vector<16x128xf32>
    %263 = arith.addf %261, %262 : vector<16x128xf32>
    %264 = arith.truncf %263 : vector<16x128xf32> to vector<16x128xbf16>
    %265 = arith.index_cast %229 : i32 to index
    %c0_66 = arith.constant 0 : index
    %c0_67 = arith.constant 0 : index
    %266 = vector.load %arg7[%265, %c0_66, %c0_67] : memref<8x16x128xbf16, #tpu.memory_space<vmem>>, vector<1x16x128xbf16>
    %267 = vector.shape_cast %266 : vector<1x16x128xbf16> to vector<16x128xbf16>
    %268 = vector.shape_cast %264 : vector<16x128xbf16> to vector<1x16x128xbf16>
    tpu.vector_store %arg7[%265, %c0_66, %c0_67], %268 {strides = array<i32>} : memref<8x16x128xbf16, #tpu.memory_space<vmem>>, vector<1x16x128xbf16>,
    %c6_i32 = arith.constant 6 : i32
    %269 = arith.muli %21, %c6_i32 : i32
    %270 = arith.addi %19, %269 : i32
    %c16_i32_68 = arith.constant 16 : i32
    %271 = arith.muli %270, %c16_i32_68 : i32
    %272 = tpu.assume_multiple %271, 16 : i32
    %273 = arith.index_cast %272 : i32 to index
    %c0_69 = arith.constant 0 : index
    %274 = vector.load %arg9[%273, %c0_69] : memref<128x384xbf16, #tpu.memory_space<vmem>>, vector<16x384xbf16>
    %275 = arith.extf %274 : vector<16x384xbf16> to vector<16x384xf32>
    %276 = arith.truncf %263 : vector<16x128xf32> to vector<16x128xbf16>
    %cst_70 = arith.constant dense<0.000000e+00> : vector<16x384xf32>
    %277 = tpu.matmul %276, %14, %cst_70 {dimension_numbers = #tpu.dot_dimension_numbers<[1], [0], [0], [1], [0, 0, 1, 1], [], []>} : vector<16x128xbf16>, vector<128x384xbf16>, vector<16x384xf32> -> vector<16x384xf32>
    %278 = vector.extract_strided_slice %275 {offsets = [0, 0], sizes = [16, 128], strides = [1, 1]} : vector<16x384xf32> to vector<16x128xf32>
    %279 = vector.extract_strided_slice %277 {offsets = [0, 0], sizes = [16, 128], strides = [1, 1]} : vector<16x384xf32> to vector<16x128xf32>
    %280 = arith.addf %278, %279 : vector<16x128xf32>
    %281 = arith.negf %280 : vector<16x128xf32>
    %282 = math.exp %281 : vector<16x128xf32>
    %cst_71 = arith.constant 1.000000e+00 : f32
    %283 = vector.broadcast %cst_71 : f32 to vector<16x128xf32>
    %284 = arith.addf %283, %282 : vector<16x128xf32>
    %285 = arith.divf %283, %284 : vector<16x128xf32>
    %286 = vector.extract_strided_slice %275 {offsets = [0, 128], sizes = [16, 128], strides = [1, 1]} : vector<16x384xf32> to vector<16x128xf32>
    %287 = vector.extract_strided_slice %277 {offsets = [0, 128], sizes = [16, 128], strides = [1, 1]} : vector<16x384xf32> to vector<16x128xf32>
    %288 = arith.addf %286, %287 : vector<16x128xf32>
    %289 = arith.negf %288 : vector<16x128xf32>
    %290 = math.exp %289 : vector<16x128xf32>
    %cst_72 = arith.constant 1.000000e+00 : f32
    %291 = vector.broadcast %cst_72 : f32 to vector<16x128xf32>
    %292 = arith.addf %291, %290 : vector<16x128xf32>
    %293 = arith.divf %291, %292 : vector<16x128xf32>
    %294 = vector.extract_strided_slice %275 {offsets = [0, 256], sizes = [16, 128], strides = [1, 1]} : vector<16x384xf32> to vector<16x128xf32>
    %295 = vector.extract_strided_slice %277 {offsets = [0, 256], sizes = [16, 128], strides = [1, 1]} : vector<16x384xf32> to vector<16x128xf32>
    %296 = arith.addf %295, %18 : vector<16x128xf32>
    %297 = arith.mulf %285, %296 : vector<16x128xf32>
    %298 = arith.addf %294, %297 : vector<16x128xf32>
    %299 = math.tanh %298 : vector<16x128xf32>
    %cst_73 = arith.constant 1.000000e+00 : f32
    %300 = vector.broadcast %cst_73 : f32 to vector<16x128xf32>
    %301 = arith.subf %300, %293 : vector<16x128xf32>
    %302 = arith.mulf %301, %299 : vector<16x128xf32>
    %303 = arith.mulf %293, %263 : vector<16x128xf32>
    %304 = arith.addf %302, %303 : vector<16x128xf32>
    %305 = arith.truncf %304 : vector<16x128xf32> to vector<16x128xbf16>
    %306 = arith.index_cast %270 : i32 to index
    %c0_74 = arith.constant 0 : index
    %c0_75 = arith.constant 0 : index
    %307 = vector.load %arg7[%306, %c0_74, %c0_75] : memref<8x16x128xbf16, #tpu.memory_space<vmem>>, vector<1x16x128xbf16>
    %308 = vector.shape_cast %307 : vector<1x16x128xbf16> to vector<16x128xbf16>
    %309 = vector.shape_cast %305 : vector<16x128xbf16> to vector<1x16x128xbf16>
    tpu.vector_store %arg7[%306, %c0_74, %c0_75], %309 {strides = array<i32>} : memref<8x16x128xbf16, #tpu.memory_space<vmem>>, vector<1x16x128xbf16>,
    %c7_i32_76 = arith.constant 7 : i32
    %310 = arith.muli %21, %c7_i32_76 : i32
    %311 = arith.addi %19, %310 : i32
    %c16_i32_77 = arith.constant 16 : i32
    %312 = arith.muli %311, %c16_i32_77 : i32
    %313 = tpu.assume_multiple %312, 16 : i32
    %314 = arith.index_cast %313 : i32 to index
    %c0_78 = arith.constant 0 : index
    %315 = vector.load %arg9[%314, %c0_78] : memref<128x384xbf16, #tpu.memory_space<vmem>>, vector<16x384xbf16>
    %316 = arith.extf %315 : vector<16x384xbf16> to vector<16x384xf32>
    %317 = arith.truncf %304 : vector<16x128xf32> to vector<16x128xbf16>
    %cst_79 = arith.constant dense<0.000000e+00> : vector<16x384xf32>
    %318 = tpu.matmul %317, %14, %cst_79 {dimension_numbers = #tpu.dot_dimension_numbers<[1], [0], [0], [1], [0, 0, 1, 1], [], []>} : vector<16x128xbf16>, vector<128x384xbf16>, vector<16x384xf32> -> vector<16x384xf32>
    %319 = vector.extract_strided_slice %316 {offsets = [0, 0], sizes = [16, 128], strides = [1, 1]} : vector<16x384xf32> to vector<16x128xf32>
    %320 = vector.extract_strided_slice %318 {offsets = [0, 0], sizes = [16, 128], strides = [1, 1]} : vector<16x384xf32> to vector<16x128xf32>
    %321 = arith.addf %319, %320 : vector<16x128xf32>
    %322 = arith.negf %321 : vector<16x128xf32>
    %323 = math.exp %322 : vector<16x128xf32>
    %cst_80 = arith.constant 1.000000e+00 : f32
    %324 = vector.broadcast %cst_80 : f32 to vector<16x128xf32>
    %325 = arith.addf %324, %323 : vector<16x128xf32>
    %326 = arith.divf %324, %325 : vector<16x128xf32>
    %327 = vector.extract_strided_slice %316 {offsets = [0, 128], sizes = [16, 128], strides = [1, 1]} : vector<16x384xf32> to vector<16x128xf32>
    %328 = vector.extract_strided_slice %318 {offsets = [0, 128], sizes = [16, 128], strides = [1, 1]} : vector<16x384xf32> to vector<16x128xf32>
    %329 = arith.addf %327, %328 : vector<16x128xf32>
    %330 = arith.negf %329 : vector<16x128xf32>
    %331 = math.exp %330 : vector<16x128xf32>
    %cst_81 = arith.constant 1.000000e+00 : f32
    %332 = vector.broadcast %cst_81 : f32 to vector<16x128xf32>
    %333 = arith.addf %332, %331 : vector<16x128xf32>
    %334 = arith.divf %332, %333 : vector<16x128xf32>
    %335 = vector.extract_strided_slice %316 {offsets = [0, 256], sizes = [16, 128], strides = [1, 1]} : vector<16x384xf32> to vector<16x128xf32>
    %336 = vector.extract_strided_slice %318 {offsets = [0, 256], sizes = [16, 128], strides = [1, 1]} : vector<16x384xf32> to vector<16x128xf32>
    %337 = arith.addf %336, %18 : vector<16x128xf32>
    %338 = arith.mulf %326, %337 : vector<16x128xf32>
    %339 = arith.addf %335, %338 : vector<16x128xf32>
    %340 = math.tanh %339 : vector<16x128xf32>
    %cst_82 = arith.constant 1.000000e+00 : f32
    %341 = vector.broadcast %cst_82 : f32 to vector<16x128xf32>
    %342 = arith.subf %341, %334 : vector<16x128xf32>
    %343 = arith.mulf %342, %340 : vector<16x128xf32>
    %344 = arith.mulf %334, %304 : vector<16x128xf32>
    %345 = arith.addf %343, %344 : vector<16x128xf32>
    %346 = arith.truncf %345 : vector<16x128xf32> to vector<16x128xbf16>
    %347 = arith.index_cast %311 : i32 to index
    %c0_83 = arith.constant 0 : index
    %c0_84 = arith.constant 0 : index
    %348 = vector.load %arg7[%347, %c0_83, %c0_84] : memref<8x16x128xbf16, #tpu.memory_space<vmem>>, vector<1x16x128xbf16>
    %349 = vector.shape_cast %348 : vector<1x16x128xbf16> to vector<16x128xbf16>
    %350 = vector.shape_cast %346 : vector<16x128xbf16> to vector<1x16x128xbf16>
    tpu.vector_store %arg7[%347, %c0_83, %c0_84], %350 {strides = array<i32>} : memref<8x16x128xbf16, #tpu.memory_space<vmem>>, vector<1x16x128xbf16>,
    %c8_i32 = arith.constant 8 : i32
    %c0_85 = arith.constant 0 : index
    %c0_86 = arith.constant 0 : index
    %351 = vector.load %arg10[%c0_85, %c0_86] : memref<16x128xf32, #tpu.memory_space<vmem>>, vector<16x128xf32>
    tpu.vector_store %arg10[%c0_85, %c0_86], %345 {strides = array<i32>} : memref<16x128xf32, #tpu.memory_space<vmem>>, vector<16x128xf32>,
    %c0_87 = arith.constant 0 : index
    %c0_88 = arith.constant 0 : index
    %c0_89 = arith.constant 0 : index
    %352 = vector.load %arg8[%c0_87, %c0_88, %c0_89] : memref<1x16x128xf32, #tpu.memory_space<vmem>>, vector<1x16x128xf32>
    %353 = vector.shape_cast %352 : vector<1x16x128xf32> to vector<16x128xf32>
    %354 = vector.shape_cast %345 : vector<16x128xf32> to vector<1x16x128xf32>
    tpu.vector_store %arg8[%c0_87, %c0_88, %c0_89], %354 {strides = array<i32>} : memref<1x16x128xf32, #tpu.memory_space<vmem>>, vector<1x16x128xf32>,
    return
  }
  func.func @transform_0(%arg0: i32, %arg1: i32) -> (i32, i32) {
    %c2_i32 = arith.constant 2 : i32
    %0 = arith.muli %c2_i32, %arg1 : i32
    %c0_i32 = arith.constant 0 : i32
    %1 = arith.subi %c0_i32, %0 : i32
    %2 = arith.muli %arg0, %1 : i32
    %3 = arith.addi %arg1, %2 : i32
    %c0_i32_0 = arith.constant 0 : i32
    %c0_i32_1 = arith.constant 0 : i32
    return %3, %c0_i32_0 : i32, i32
  }
  func.func @transform_1(%arg0: i32, %arg1: i32) -> (i32, i32, i32) {
    %c0_i32 = arith.constant 0 : i32
    %c0_i32_0 = arith.constant 0 : i32
    %c0_i32_1 = arith.constant 0 : i32
    return %arg0, %c0_i32, %c0_i32_0 : i32, i32, i32
  }
  func.func @transform_2(%arg0: i32, %arg1: i32) -> (i32, i32, i32) {
    %c0_i32 = arith.constant 0 : i32
    %c0_i32_0 = arith.constant 0 : i32
    %c0_i32_1 = arith.constant 0 : i32
    return %arg0, %c0_i32, %c0_i32_0 : i32, i32, i32
  }
  func.func @transform_3(%arg0: i32, %arg1: i32) -> (i32, i32, i32) {
    %c0_i32 = arith.constant 0 : i32
    %c0_i32_0 = arith.constant 0 : i32
    %c0_i32_1 = arith.constant 0 : i32
    return %arg0, %c0_i32, %c0_i32_0 : i32, i32, i32
  }
  func.func @transform_4(%arg0: i32, %arg1: i32) -> (i32, i32, i32) {
    %c0_i32 = arith.constant 0 : i32
    %c0_i32_0 = arith.constant 0 : i32
    %c0_i32_1 = arith.constant 0 : i32
    return %arg0, %c0_i32, %c0_i32_0 : i32, i32, i32
  }
  func.func @transform_5(%arg0: i32, %arg1: i32) -> (i32, i32, i32) {
    %c2_i32 = arith.constant 2 : i32
    %0 = arith.muli %c2_i32, %arg1 : i32
    %c0_i32 = arith.constant 0 : i32
    %1 = arith.subi %c0_i32, %0 : i32
    %2 = arith.muli %arg0, %1 : i32
    %3 = arith.addi %arg1, %2 : i32
    %c0_i32_0 = arith.constant 0 : i32
    %c0_i32_1 = arith.constant 0 : i32
    return %3, %c0_i32_0, %arg0 : i32, i32, i32
  }
  func.func @transform_6(%arg0: i32, %arg1: i32) -> (i32, i32, i32) {
    %c0_i32 = arith.constant 0 : i32
    %c0_i32_0 = arith.constant 0 : i32
    %c0_i32_1 = arith.constant 0 : i32
    return %arg0, %c0_i32, %c0_i32_0 : i32, i32, i32
  }
}

</mosaic_0001>

<bundles_post_ra>
// kernel: tpu_custom_call.1
= control target key start
LH: loop header
LB: loop body
LE: loop exit
PB: predicated region body
PF: predicated region fallthrough
CT: control target
= control target key end

     0   :  { %s4540_s0 = inlined_call_operand.vmem [shape: bf16[128,16], index: 0, kind: input, shape index: {}]   ;;  %s4541_s1 = inlined_call_operand.vmem [shape: bf16[2,16,384], index: 1, kind: input, shape index: {}]   ;;  %s4542_s2 = inlined_call_operand.hbm [shape: bf16[2,128,384], index: 2, kind: input, shape index: {}]   ;;  %s4543_s3 = inlined_call_operand.vmem [shape: f32[2,1,384], index: 3, kind: input, shape index: {}]   ;;  %s4544_s4 = inlined_call_operand.vmem [shape: f32[2,1,128], index: 4, kind: input, shape index: {}]   ;;  %s4545_s5 = inlined_call_operand.hbm [shape: bf16[8,16,256], index: 5, kind: output, shape index: {0}]   ;;  %s4546_s6 = inlined_call_operand.hbm [shape: f32[2,16,128], index: 6, kind: output, shape index: {1}]  }
   0x1   :  { %4552 = sst [smem:[#allocation14_spill]] %s4540_s0 }
   0x2   :  { %4553 = sst [smem:[#allocation15_spill]] %s4541_s1 }
   0x3   :  { %4554 = sst [smem:[#allocation16_spill]] %s4542_s2 }
   0x4   :  { %12 = vsyncpa [#allocation5], 0 }
   0x5   :  { %13 = vsyncpa [#allocation6], 0 }
   0x6   :  { %15 = vsyncpa [#allocation6 + $0x1], 0 }
   0x7   :  { %16 = vsyncpa [#allocation9], 0 }
   0x8   :  { %18 = vsyncpa [#allocation9 + $0x1], 0  ;;  %s3665_s21 = smov 0   ;;  %s3667_s22 = smov 0  }
   0x9   :  { %s3669_s23 = smov 0   ;;  %s3671_s24 = smov 0  }
   0xa   :  { %s3673_s25 = smov 0   ;;  %s3675_s26 = smov 0  }
   0xb LB: > { %s2619_s27 = sadd.s32 4294967295, %s3615_s26   ;;  %s2620_s28 = sadd.s32 4294967294, %s3615_s26   ;;  %s3615_s26 = sphi %s3675_s26, %s24_s26   ;;  %s3611_s25 = sphi %s3673_s25, %s4573_s25   ;;  %s3607_s24 = sphi %s3671_s24, %s4572_s24   ;;  %s3603_s23 = sphi %s3669_s23, %s4571_s23   ;;  %s3599_s22 = sphi %s3667_s22, %s4570_s22   ;;  %s3595_s21 = sphi %s3665_s21, %s4569_s21  }
   0xc   : > { %s36_s29 = sadd.s32 1, %s3611_s25  ;;  %s103_s30 = sadd.s32 1, %s3603_s23 }
   0xd   : > { %p38_p0 = scmp.ge.s32.totalorder %s36_s29, 2  ;;  %p116_p1 = scmp.ne.s32.totalorder %s3599_s22, %s3595_s21 }
   0xe   : > { %p201_p2 = scmp.ne.s32.totalorder %s3603_s23, %s3599_s22  ;;  %p117_p3 = scmp.eq.s32.totalorder %s2619_s27, 0 }
   0xf   : > { %s4575_s29 = smov (%p38_p0, %s36_s29), 0  ;;  %p202_p4 = scmp.eq.s32.totalorder %s2619_s27, 1 }
  0x10   : > { %4555 = sst [smem:[#allocation13_spill]] %s4575_s29  ;;  %s100_s7 = ssub.s32 %s3611_s25, %s4575_s29 }
  0x11   : > { %p208_p5 = scmp.eq.s32.totalorder %s2620_s28, 1  ;;  %p101_p6 = scmp.eq.s32.totalorder %s100_s7, 0 }
  0x12   : > { %p3707_p7 = por %p202_p4, %p201_p2  ;;  %p2621_p9 = scmp.ge.s32.totalorder %s3615_s26, 1 }
  0x13   : > { %p3714_p8 = por %p208_p5, %p116_p1  ;;  %p241_p10 = scmp.lt.s32.totalorder %s3615_s26, 3 }
  0x14   : > { %s4556_s8 = scalar_select %p3707_p7, 1, 0 }
  0x15   : > { %s4557_s9 = scalar_select %p3714_p8, 1, 0 }
  0x16   : > { %s3720_s10 = scalar_select %p101_p6, %s3603_s23, %s103_s30  }
  0x17   : > { %s3168_s11 = smul.u32 3072, %s3607_s24  ;;  %p3727_p11 = por %p117_p3, %p116_p1 }
  0x18   : > { %p3731_p12 = pnand %p2621_p9, %p241_p10  ;;  %s3617_s14 = smov [#allocation4]  }
  0x19   : > { %s4558_s12 = scalar_select %p3727_p11, 1, 0 }
  0x1a   : > { %s4559_s13 = scalar_select %p3731_p12, 1, 0 }
  0x1b   : > { %s264_s15 = sshll.u32 %s3617_s14, 4  ;;  %p3177_p13 = pneg %p3731_p12  ;;  %s265_s15 = int_to_ptr.vmem [resolvable:$true] %s264_s15 }
  0x1c   : > { %s4560_s2 = sld [smem:[#allocation16_spill]] }
  0x1d   : > { %p3742_p0 = pnand %p3177_p13, %p3727_p11 }
  0x1f   : > { %p3479_p2 = pneg %p3742_p0 }
  0x22   : > { %s263_s18 = scalar_lea.hbm %s4560_s2, %s3168_s11  ;;  %s3482_s30 = scalar_lea.hbm %s4560_s2, 6144 }
  0x23   : > { %s3477_s20 = scalar_lea.hbm %s263_s18, 3072  ;;  %p3483_p5 = scmp.lt.s32.totalorder %s263_s18, %s4560_s2 }
  0x24   : > { %p3478_p1 = scmp.ne.s32.totalorder %s263_s18, %s3477_s20  ;;  %p3484_p6 = scmp.lt.s32.totalorder %s3482_s30, %s3477_s20 }
  0x26   : > { %p3480_p3 = pnand %p3479_p2, %p3478_p1  ;;  %p3485_p9 = por %p3484_p6, %p3483_p5 }
  0x28   : > { %p3481_p4 = pneg %p3480_p3 }
  0x2a   : > { %p3486_p10 = pnand %p3485_p9, %p3481_p4 }
  0x2c   : > { %3489 = shalt.err (!%p3486_p10)
}
  0x2d   : > { %s3490_s11 = scalar_lea.vmem %s265_s15, 3072  ;;  %p3498_p11 = scmp.lt.s32.totalorder %s265_s15, %s265_s15 }
  0x2e   : > { %p3491_p13 = scmp.ne.s32.totalorder %s265_s15, %s3490_s11  ;;  %p3499_p12 = scmp.lt.s32.totalorder %s3490_s11, %s3490_s11 }
  0x30   : > { %p3493_p8 = pnand %p3491_p13, %p3479_p2  ;;  %p3500_p1 = por %p3499_p12, %p3498_p11 }
  0x32   : > { %p3494_p7 = pneg %p3493_p8 }
  0x34   : > { %p3501_p3 = pnand %p3500_p1, %p3494_p7 }
  0x36   : > { %3504 = shalt.err (!%p3501_p3)
}
  0x37   : > { %s3618_s16 = smov 192   ;;  %s3619_s17 = smov 12  }
  0x38   : > { %3180 = dma.hbm_to_vmem [thread:$0]  (!%p3742_p0), %s263_s18, 3072, %s265_s15, [#allocation5], %s3618_s16, %s3618_s16, %s3619_s17  }
  0x39   : > { %p4562_p5 = scmp.ne.s32.totalorder %s4559_s13, 0 }
  0x3a   : > { %p4563_p4 = scmp.ne.s32.totalorder (!%p4562_p5), %s4558_s12, 0 }
  0x3b   : > { %310 = sbr.rel (%p4562_p5) target bundleno = 2209 (0x8a1), region = 40 }
  0x40   : > { %3582 = dma.done.wait (%p4563_p4), [#allocation5], 3072  }
  0x41   : > { %3584 = vsyncadd (%p4563_p4), [#allocation5], 4294964224  ;;  %p375_p8 = scmp.lt.s32.totalorder %s3607_s24, 1  ;;  %v3620_v0 = vmov 0   ;;  %s4564_s1 = sld [smem:[#allocation15_spill]]  ;;  %vm492_vm0 = vcmask 130048   ;;  %v421_v38 = vlaneseq }
  0x42   : > { %549 = vmatprep.mubr.bf16.mxu0 %v3620_v0  ;;  %609 = vmatprep.mubr.bf16.mxu1 %v3620_v0  ;;  %s4565_s0 = sld [smem:[#allocation14_spill]]  ;;  %v3621_v6 = vmov 0.0   ;;  %v3786_v7 = vld [vmem:[#allocation4 + $0xac] ss:$12 sps:$4 sm:$0xff]   ;;  %v3805_v11 = vld [vmem:[#allocation4 + $0xa8] ss:$12 sps:$4 sm:$0xff]  }
  0x43   : > { %s3766_s20 = scalar_select %p375_p8, %s3607_s24, 1  ;;  %v3807_v12 = vld [vmem:[#allocation4 + $0xb0] ss:$12 sps:$4 sm:$0xff]   ;;  %v3809_v13 = vld [vmem:[#allocation4 + $0x94] ss:$12 sps:$4 sm:$0xff]   ;;  %vm3622_vm1 = vmmov 0  }
  0x44   : > { %v3816_v14 = vld [vmem:[#allocation4 + $0x90] ss:$12 sps:$4 sm:$0xff]   ;;  %v3818_v15 = vld [vmem:[#allocation4 + $0x98] ss:$12 sps:$4 sm:$0xff]   ;;  %v3839_v21 = vld [vmem:[#allocation4 + $0x80] ss:$12 sps:$4 sm:$0xff]  }
  0x45   : > { %s3169_s15 = smul.u32 24, %s3766_s20  ;;  %v3822_v16 = vld [vmem:[#allocation4 + $0x7c] ss:$12 sps:$4 sm:$0xff]   ;;  %v3828_v18 = vld [vmem:[#allocation4 + $0x78] ss:$12 sps:$4 sm:$0xff]   ;;  %v3623_v37 = vmov 0.0|0.0  }
  0x46   : > { %v3837_v20 = vld [vmem:[#allocation4 + $0x64] ss:$12 sps:$4 sm:$0xff]   ;;  %v3845_v22 = vld [vmem:[#allocation4 + $0x60] ss:$12 sps:$4 sm:$0xff]   ;;  %v3852_v24 = vld [vmem:[#allocation4 + $0x68] ss:$12 sps:$4 sm:$0xff]  }
  0x47   : > { %s379_s19 = scalar_lea.vmem %s4564_s1, %s3169_s15  ;;  %v3849_v23 = vld [vmem:[#allocation4 + $0x4c] ss:$12 sps:$4 sm:$0xff]   ;;  %v3859_v26 = vld [vmem:[#allocation4 + $0x48] ss:$12 sps:$4 sm:$0xff]   ;;  %v3867_v28 = vld [vmem:[#allocation4 + $0x50] ss:$12 sps:$4 sm:$0xff]  }
  0x48   : > { %v3248_v1 = vld [vmem:[%s379_s19 + $0x4] ss:$12 sps:$4 sm:$0xff]   ;;  %v3250_v2 = vld [vmem:[%s379_s19] ss:$12 sps:$4 sm:$0xff]   ;;  %v3253_v5 = vld [vmem:[%s379_s19 + $0x8] ss:$12 sps:$4 sm:$0xff]  }
  0x49   : > { %531 = vmatprep.subr.bf16.mxu0 %v3248_v1  ;;  %3166 = vmatprep.subr.bf16.mxu1 %v3248_v1  ;;  %v3251_v3 = vld [vmem:[%s4565_s0] sm:$0xff]   ;;  %v3778_v4 = vld [vmem:[%s4565_s0 + $0x30] sm:$0xff]   ;;  %v3254_v8 = vld [vmem:[%s4565_s0 + $0x8] sm:$0xff]   ;;  %s2689_s30 = sshll.u32 %s3607_s24, 1  ;;  %s3950_s14 = smul.u32 7, %s3607_s24  ;;  %v422_v39 = vshrl.u32 %v421_v38, 7 }
  0x4a   : > { %532 = vmatpush1.bf16.msra.mxu0 %v3250_v2  ;;  %3167 = vmatpush1.bf16.msra.mxu1 %v3250_v2  ;;  %v3794_v9 = vld [vmem:[%s4565_s0 + $0x38] sm:$0xff]   ;;  %v3256_v10 = vld [vmem:[%s4565_s0 + $0x10] sm:$0xff]   ;;  %v3267_v19 = vld [vmem:[%s4565_s0 + $0x20] sm:$0xff]   ;;  %s3947_s7 = ssub.s32 1, %s2689_s30  ;;  %s3170_s1 = smul.u32 3, %s3766_s20 }
  0x4b   : > { %3006 = vmatprep.subr.bf16.mxu0 %v3621_v6  ;;  %2988 = vmatprep.subr.bf16.mxu1 %v3253_v5  ;;  %v3262_v17 = vld [vmem:[%s4565_s0 + $0x18] sm:$0xff]   ;;  %v3270_v25 = vld [vmem:[%s4565_s0 + $0x28] sm:$0xff]   ;;  %v3862_v27 = vld [vmem:[#allocation4 + $0x34] ss:$12 sps:$4 sm:$0xff]   ;;  %s1884_s11 = smul.u32 5, %s3947_s7  ;;  %s2733_s19 = sshll.u32 %s3947_s7, 1 }
  0x4c   : > { %v3871_v29 = vld [vmem:[#allocation4 + $0x30] ss:$12 sps:$4 sm:$0xff]   ;;  %v3881_v31 = vld [vmem:[#allocation4 + $0x18] ss:$12 sps:$4 sm:$0xff]   ;;  %v3893_v34 = vld [vmem:[#allocation4] ss:$12 sps:$4 sm:$0xff]   ;;  %s3966_s12 = sadd.s32 %s2733_s19, %s3950_s14  ;;  %s383_s29 = scalar_lea.vmem %s4543_s3, %s3170_s1 }
  0x4d   : > { %2640 = vmatmul.mubr.msk.bf16.vlgmr.msra.gmra.mxu0 %vm492_vm0, %v3251_v3  ;;  %2646 = vmatmul.mubr.msk.bf16.vlgmr.msra.gmra.mxu1 %vm492_vm0, %v3778_v4  ;;  %v3876_v30 = vld [vmem:[#allocation4 + $0x1c] ss:$12 sps:$4 sm:$0xff]   ;;  %v3885_v32 = vld [vmem:[#allocation4 + $0x4] ss:$12 sps:$4 sm:$0xff]   ;;  %v3898_v35 = vld [vmem:[#allocation4 + $0x20] ss:$12 sps:$4 sm:$0xff]   ;;  %s3955_s17 = sadd.s32 %s1884_s11, %s3950_s14 }
  0x4e   : > { %559 = vmatprep.mubr.bf16.mxu0 %v3620_v0  ;;  %2989 = vmatpush3.bf16.msra.mxu1 %v3253_v5  ;;  %v3887_v33 = vld [vmem:[#allocation4 + $0x38] ss:$12 sps:$4 sm:$0xff]   ;;  %v3905_v36 = vld [vmem:[#allocation4 + $0x8] ss:$12 sps:$4 sm:$0xff]   ;;  %s2043_s16 = smul.u32 6, %s3947_s7  ;;  %s2754_s30 = sshll.u32 %s3947_s7, 2 }
  0x4f   : > { %619 = vmatprep.mubr.bf16.mxu1 %v3620_v0  ;;  %1108 = vmatprep.subr.bf16.mxu1 %v3786_v7  ;;  %s2202_s15 = smul.u32 7, %s3947_s7  ;;  %s3974_s0 = sadd.s32 %s2754_s30, %s3950_s14  ;;  %v423_v40 = vsub.s32 0, %v422_v39  ;;  %v427_v41 = vsub.s32 1, %v422_v39  ;;  %v419_v42 = vld [vmem:[%s383_s29] sm:$0x7]  ;;  %v431_v2 = vsub.s32 2, %v422_v39 }
  0x50   : > { %3007 = vmatpush3.bf16.msra.mxu0 %v3807_v12  ;;  %s3959_s13 = sadd.s32 %s2043_s16, %s3950_s14  ;;  %s1566_s27 = smul.u32 3, %s3947_s7 }
  0x51   : > { %3008 = vmatprep.subr.bf16.mxu0 %v3621_v6  ;;  %s3962_s18 = sadd.s32 %s2202_s15, %s3950_s14  ;;  %v3980_v43 = vrot.slane %v419_v42, %v423_v40  ;;  %v3982_v44 = vrot.slane %v419_v42, %v427_v41  ;;  %v3996_v38 = vrot.slane %v419_v42, %v431_v2  ;;  %s963_s1 = smul.u32 112, %s3607_s24 }
  0x52   : > { %s3970_s28 = sadd.s32 %s1566_s27, %s3950_s14  ;;  %s4043_s27 = scalar_lea.vmem %s4544_s4, %s3766_s20 }
  0x53   : > { %s964_s2 = sshra.s32 %s963_s1, 3  ;;  %s4052_s20 = sand.u32 1, %s3599_s22  }
  0x54   : > { %3009 = vmatpush3.bf16.msra.mxu0 %v3818_v15  ;;  %s2834_s29 = smul.u32 12, %s964_s2  ;;  %s2626_s30 = sshll.u32 %s4052_s20, 6 }
  0x55   : > { %2641 = vmatmul.mubr.msk.bf16.gmra.mxu0 %vm492_vm0, %v3254_v8  ;;  %2647 = vmatmul.mubr.msk.bf16.gmra.mxu1 %vm492_vm0, %v3794_v9  ;;  %s2837_s11 = smul.u32 56, %s3607_s24  ;;  %s4060_s1 = scalar_lea.vmem [#allocation7], %s2626_s30 }
  0x56   : > { %569 = vmatprep.mubr.bf16.mxu0 %v3620_v0  ;;  %2990 = vmatprep.mubr.msk.bf16.mxu1 %vm492_vm0, %v3251_v3  ;;  %s4035_s16 = scalar_lea.vmem [#allocation2], %s2834_s29  ;;  %s4102_s29 = sadd.s32 %s3947_s7, %s3950_s14 }
  0x57   : > { %3010 = vmatprep.subr.bf16.mxu0 %v3621_v6  ;;  %s1246_s2 = scalar_lea.vmem %s4060_s1, %s2837_s11 [#allocation7]  ;;  %s2841_s7 = sshll.u32 %s4102_s29, 3 }
  0x58   : > { %3011 = vmatpush3.bf16.msra.mxu0 %v3839_v21  ;;  %s1404_s14 = scalar_lea.vmem %s4060_s1, %s2841_s7 [#allocation7]  ;;  %s2734_s11 = sshll.u32 %s3966_s12, 4 }
  0x59   : > { %3012 = vmatprep.subr.bf16.mxu0 %v3621_v6  ;;  %p4566_p11 = scmp.ne.s32.totalorder %s4556_s8, 0 }
  0x5c   : > { %3013 = vmatpush3.bf16.msra.mxu0 %v3852_v24 }
  0x5d   : > { %2642 = vmatmul.mubr.msk.bf16.gmra.mxu0 %vm492_vm0, %v3256_v10  ;;  %2991 = vmatmul.mubr.msk.bf16.vlgmr.msra.gmra.mxu1 %vm492_vm0, %v3254_v8 }
  0x5e   : > { %1109 = vmatpush1.bf16.msra.mxu1 %v3805_v11  ;;  %579 = vmatprep.mubr.bf16.mxu0 %v3620_v0 }
  0x5f   : > { %2994 = vmatprep.mubr.msk.bf16.mxu1 %vm492_vm0, %v3256_v10  ;;  %1110 = vmatprep.subr.bf16.mxu1 %v3809_v13 }
  0x60   : > { %3014 = vmatprep.subr.bf16.mxu0 %v3621_v6 }
  0x61   : > { %3015 = vmatpush3.bf16.msra.mxu0 %v3867_v28 }
  0x62   : > { %1111 = vmatpush1.bf16.msra.mxu1 %v3816_v14  ;;  %3016 = vmatprep.subr.bf16.mxu0 %v3621_v6 }
  0x63   : > { %1112 = vmatprep.subr.bf16.mxu1 %v3822_v16 }
  0x65   : > { %2643 = vmatmul.mubr.msk.bf16.gmra.mxu0 %vm492_vm0, %v3262_v17  ;;  %2995 = vmatmul.mubr.msk.bf16.gmra.mxu1 %vm492_vm0, %v3262_v17 }
  0x66   : > { %1113 = vmatpush1.bf16.msra.mxu1 %v3828_v18  ;;  %589 = vmatprep.mubr.bf16.mxu0 %v3620_v0 }
  0x67   : > { %2998 = vmatprep.mubr.msk.bf16.mxu1 %vm492_vm0, %v3267_v19  ;;  %1114 = vmatprep.subr.bf16.mxu1 %v3837_v20 }
  0x68   : > { %3017 = vmatpush3.bf16.msra.mxu0 %v3887_v33 }
  0x69   : > { %3018 = vmatprep.subr.bf16.mxu0 %v3621_v6 }
  0x6a   : > { %1115 = vmatpush1.bf16.msra.mxu1 %v3845_v22 }
  0x6b   : > { %1116 = vmatprep.subr.bf16.mxu1 %v3849_v23 }
  0x6c   : > { %3019 = vmatpush3.bf16.msra.mxu0 %v3898_v35 }
  0x6d   : > { %2644 = vmatmul.mubr.msk.bf16.gmra.mxu0 %vm492_vm0, %v3267_v19  ;;  %2999 = vmatmul.mubr.msk.bf16.gmra.mxu1 %vm492_vm0, %v3270_v25 }
  0x6e   : > { %1117 = vmatpush1.bf16.msra.mxu1 %v3859_v26  ;;  %599 = vmatprep.mubr.bf16.mxu0 %v3620_v0 }
  0x6f   : > { %3002 = vmatprep.mubr.msk.bf16.mxu1 %vm492_vm0, %v3778_v4  ;;  %1118 = vmatprep.subr.bf16.mxu1 %v3862_v27 }
  0x70   : > { %3020 = vmatprep.subr.bf16.mxu0 %v3621_v6 }
  0x71   : > { %3021 = vmatpush3.bf16.msra.mxu0 %v3905_v36 }
  0x72   : > { %1119 = vmatpush1.bf16.msra.mxu1 %v3871_v29  ;;  %3026 = vmatprep.subr.bf16.mxu0 %v3621_v6 }
  0x73   : > { %1120 = vmatprep.subr.bf16.mxu1 %v3876_v30 }
  0x75   : > { %2645 = vmatmul.mubr.msk.bf16.gmra.mxu0 %vm492_vm0, %v3270_v25  ;;  %3003 = vmatmul.mubr.msk.bf16.gmra.mxu1 %vm492_vm0, %v3794_v9 }
  0x76   : > { %1121 = vmatpush1.bf16.msra.mxu1 %v3881_v31  ;;  %1140 = vmatprep.mubr.bf16.mxu1 %v3620_v0 }
  0x77   : > { %1122 = vmatprep.subr.bf16.mxu1 %v3885_v32  ;;  %3022 = vmatprep.mubr.msk.bf16.mxu0 %vm3622_vm1, %v3621_v6 }
  0x7a   : > { %1123 = vmatpush1.bf16.msra.mxu1 %v3893_v34 }
  0x7b   : > { %1266 = vmatprep.subr.bf16.mxu1 %v3786_v7 }
  0x7d   : > { %1141 = vmatmul.mubr.bf16.vlgmr.msra.gmra.mxu1 %v3623_v37  ;;  %3023 = vmatmul.mubr.bf16.vlgmr.msra.gmra.mxu0 %v3623_v37 }
  0x7e   : > { %1267 = vmatpush1.bf16.msra.mxu1 %v3805_v11  ;;  %1298 = vmatprep.mubr.bf16.mxu1 %v3620_v0 }
  0x7f   : > { %1268 = vmatprep.subr.bf16.mxu1 %v3809_v13  ;;  %3027 = vmatpush3.bf16.msra.mxu0 %v3807_v12 }
  0x80   : > { %3028 = vmatprep.subr.bf16.mxu0 %v3621_v6  ;;  %3042 = vmatprep.mubr.msk.bf16.mxu0 %vm3622_vm1, %v3621_v6 }
  0x82   : > { %1269 = vmatpush1.bf16.msra.mxu1 %v3816_v14 }
  0x83   : > { %1270 = vmatprep.subr.bf16.mxu1 %v3822_v16  ;;  %3029 = vmatpush3.bf16.msra.mxu0 %v3818_v15 }
  0x84   : > { %3030 = vmatprep.subr.bf16.mxu0 %v3621_v6 }
  0x86   : > { %1271 = vmatpush1.bf16.msra.mxu1 %v3828_v18 }
  0x87   : > { %1272 = vmatprep.subr.bf16.mxu1 %v3837_v20  ;;  %3031 = vmatpush3.bf16.msra.mxu0 %v3839_v21 }
  0x88   : > { %3032 = vmatprep.subr.bf16.mxu0 %v3621_v6 }
  0x8a   : > { %1273 = vmatpush1.bf16.msra.mxu1 %v3845_v22 }
  0x8b   : > { %1274 = vmatprep.subr.bf16.mxu1 %v3849_v23  ;;  %3033 = vmatpush3.bf16.msra.mxu0 %v3852_v24 }
  0x8c   : > { %3034 = vmatprep.subr.bf16.mxu0 %v3621_v6 }
  0x8e   : > { %1275 = vmatpush1.bf16.msra.mxu1 %v3859_v26 }
  0x8f   : > { %1276 = vmatprep.subr.bf16.mxu1 %v3862_v27  ;;  %3035 = vmatpush3.bf16.msra.mxu0 %v3867_v28 }
  0x90   : > { %3036 = vmatprep.subr.bf16.mxu0 %v3621_v6 }
  0x92   : > { %1277 = vmatpush1.bf16.msra.mxu1 %v3871_v29 }
  0x93   : > { %1278 = vmatprep.subr.bf16.mxu1 %v3876_v30  ;;  %3037 = vmatpush3.bf16.msra.mxu0 %v3887_v33 }
  0x94   : > { %3038 = vmatprep.subr.bf16.mxu0 %v3621_v6 }
  0x96   : > { %1279 = vmatpush1.bf16.msra.mxu1 %v3881_v31 }
  0x97   : > { %1280 = vmatprep.subr.bf16.mxu1 %v3885_v32  ;;  %3039 = vmatpush3.bf16.msra.mxu0 %v3898_v35 }
  0x98   : > { %3040 = vmatprep.subr.bf16.mxu0 %v3621_v6 }
  0x9a   : > { %1281 = vmatpush1.bf16.msra.mxu1 %v3893_v34 }
  0x9b   : > { %1425 = vmatprep.subr.bf16.mxu1 %v3786_v7  ;;  %3041 = vmatpush3.bf16.msra.mxu0 %v3905_v36 }
  0x9c   : > { %3046 = vmatprep.subr.bf16.mxu0 %v3621_v6 }
 0x10d   : > { %v551_v45 = vpop.f32.mrf.mxu0  ;;  %v611_v46 = vpop.f32.mrf.mxu1 }
 0x10e   : > { %v552_v49 = vadd.f32 %v551_v45, %v3980_v43  ;;  %v612_v50 = vadd.f32 %v611_v46, %v3980_v43 }
 0x10f   : > { %v553_v47 = vpop.f32.mrf.mxu0  ;;  %v613_v48 = vpop.f32.mrf.mxu1 }
 0x110   : > { %v554_v51 = vadd.f32 %v553_v47, %v3982_v44  ;;  %v614_v52 = vadd.f32 %v613_v48, %v3982_v44 }
 0x111   : > { %v555_v53 = vpop.f32.mrf.mxu0  ;;  %v615_v54 = vpop.f32.mrf.mxu1 }
 0x112   : > { %v2802_v55 = vpack.c.bf16 %v554_v51, %v552_v49  ;;  %v2826_v56 = vpack.c.bf16 %v614_v52, %v612_v50  ;;  %v556_v59 = vadd.f32 %v555_v53, %v3980_v43  ;;  %v616_v60 = vadd.f32 %v615_v54, %v3980_v43 }
 0x113   : > { %v557_v57 = vpop.f32.mrf.mxu0  ;;  %v617_v58 = vpop.f32.mrf.mxu1 }
 0x114   : > { %887 = vst [vmem:[#allocation2] sm:$0xff] %v2802_v55  ;;  %911 = vst [vmem:[#allocation2 + $0x90] sm:$0xff] %v2826_v56  ;;  %v558_v61 = vadd.f32 %v557_v57, %v3982_v44  ;;  %v618_v62 = vadd.f32 %v617_v58, %v3982_v44 }
 0x115   : > { %v561_v63 = vpop.f32.mrf.mxu0  ;;  %v621_v1 = vpop.f32.mrf.mxu1 }
 0x116   : > { %v2804_v3 = vpack.c.bf16 %v558_v61, %v556_v59  ;;  %v2828_v4 = vpack.c.bf16 %v618_v62, %v616_v60  ;;  %v562_v9 = vadd.f32 %v561_v63, %v3980_v43  ;;  %v622_v10 = vadd.f32 %v621_v1, %v3980_v43 }
 0x117   : > { %v563_v5 = vpop.f32.mrf.mxu0  ;;  %v623_v8 = vpop.f32.mrf.mxu1 }
 0x118   : > { %889 = vst [vmem:[#allocation2 + $0xc] sm:$0xff] %v2804_v3  ;;  %913 = vst [vmem:[#allocation2 + $0x9c] sm:$0xff] %v2828_v4  ;;  %v564_v17 = vadd.f32 %v563_v5, %v3982_v44  ;;  %v624_v19 = vadd.f32 %v623_v8, %v3982_v44 }
 0x119   : > { %v565_v25 = vpop.f32.mrf.mxu0  ;;  %v625_v37 = vpop.f32.mrf.mxu1 }
 0x11a   : > { %v2806_v40 = vpack.c.bf16 %v564_v17, %v562_v9  ;;  %v2830_v39 = vpack.c.bf16 %v624_v19, %v622_v10  ;;  %v566_v46 = vadd.f32 %v565_v25, %v3980_v43  ;;  %v626_v47 = vadd.f32 %v625_v37, %v3980_v43 }
 0x11b   : > { %v567_v41 = vpop.f32.mrf.mxu0  ;;  %v627_v45 = vpop.f32.mrf.mxu1 }
 0x11c   : > { %891 = vst [vmem:[#allocation2 + $0x18] sm:$0xff] %v2806_v40  ;;  %915 = vst [vmem:[#allocation2 + $0xa8] sm:$0xff] %v2830_v39  ;;  %v568_v48 = vadd.f32 %v567_v41, %v3982_v44  ;;  %v628_v49 = vadd.f32 %v627_v45, %v3982_v44 }
 0x11d   : > { %v571_v50 = vpop.f32.mrf.mxu0  ;;  %v2992_v51 = vpop.f32.mrf.mxu1 }
 0x11e   : > { %v2808_v52 = vpack.c.bf16 %v568_v48, %v566_v46  ;;  %v2832_v53 = vpack.c.bf16 %v628_v49, %v626_v47  ;;  %v673_v42 = vadd.f32 %v2992_v51, %v3996_v38  ;;  %v572_v56 = vadd.f32 %v571_v50, %v3980_v43 }
 0x11f   : > { %v573_v54 = vpop.f32.mrf.mxu0  ;;  %v664_v55 = vpop.f32.mrf.mxu1 }
 0x120   : > { %893 = vst [vmem:[#allocation2 + $0x24] sm:$0xff] %v2808_v52  ;;  %917 = vst [vmem:[#allocation2 + $0xb4] sm:$0xff] %v2832_v53  ;;  %v2807_v57 = vpack.c.bf16 %v673_v42, %v673_v42  ;;  %v574_v58 = vadd.f32 %v573_v54, %v3982_v44  ;;  %v665_v59 = vadd.f32 %v664_v55, %v3996_v38 }
 0x121   : > { %v575_v60 = vpop.f32.mrf.mxu0  ;;  %v2993_v61 = vpop.f32.mrf.mxu1 }
 0x122   : > { %892 = vst [vmem:[#allocation2 + $0x20] sm:$0xf] %v2807_v57  ;;  %v2810_v62 = vpack.c.bf16 %v574_v58, %v572_v56  ;;  %v2803_v63 = vpack.c.bf16 %v665_v59, %v665_v59  ;;  %v676_v1 = vadd.f32 %v2993_v61, %v3996_v38  ;;  %v576_v4 = vadd.f32 %v575_v60, %v3980_v43 }
 0x123   : > { %v577_v2 = vpop.f32.mrf.mxu0  ;;  %v667_v3 = vpop.f32.mrf.mxu1 }
 0x124   : > { %895 = vst [vmem:[#allocation2 + $0x30] sm:$0xff] %v2810_v62  ;;  %888 = vst [vmem:[#allocation2 + $0x8] sm:$0xf] %v2803_v63  ;;  %v2809_v5 = vpack.c.bf16 %v676_v1, %v676_v1  ;;  %v578_v8 = vadd.f32 %v577_v2, %v3982_v44  ;;  %v668_v9 = vadd.f32 %v667_v3, %v3996_v38 }
 0x125   : > { %v581_v10 = vpop.f32.mrf.mxu0  ;;  %v2996_v17 = vpop.f32.mrf.mxu1 }
 0x126   : > { %894 = vst [vmem:[#allocation2 + $0x2c] sm:$0xf] %v2809_v5  ;;  %v2812_v19 = vpack.c.bf16 %v578_v8, %v576_v4  ;;  %v2805_v25 = vpack.c.bf16 %v668_v9, %v668_v9  ;;  %v689_v37 = vadd.f32 %v2996_v17, %v3996_v38  ;;  %v582_v41 = vadd.f32 %v581_v10, %v3980_v43 }
 0x127   : > { %v583_v40 = vpop.f32.mrf.mxu0  ;;  %v680_v39 = vpop.f32.mrf.mxu1 }
 0x128   : > { %897 = vst [vmem:[#allocation2 + $0x3c] sm:$0xff] %v2812_v19  ;;  %890 = vst [vmem:[#allocation2 + $0x14] sm:$0xf] %v2805_v25  ;;  %v2815_v45 = vpack.c.bf16 %v689_v37, %v689_v37  ;;  %v584_v46 = vadd.f32 %v583_v40, %v3982_v44  ;;  %v681_v47 = vadd.f32 %v680_v39, %v3996_v38 }
 0x129   : > { %v585_v48 = vpop.f32.mrf.mxu0  ;;  %v2997_v49 = vpop.f32.mrf.mxu1 }
 0x12a   : > { %900 = vst [vmem:[#allocation2 + $0x50] sm:$0xf] %v2815_v45  ;;  %v2814_v50 = vpack.c.bf16 %v584_v46, %v582_v41  ;;  %v2811_v51 = vpack.c.bf16 %v681_v47, %v681_v47  ;;  %v692_v52 = vadd.f32 %v2997_v49, %v3996_v38  ;;  %v586_v54 = vadd.f32 %v585_v48, %v3980_v43 }
 0x12b   : > { %v587_v53 = vpop.f32.mrf.mxu0  ;;  %v683_v42 = vpop.f32.mrf.mxu1 }
 0x12c   : > { %899 = vst [vmem:[#allocation2 + $0x48] sm:$0xff] %v2814_v50  ;;  %896 = vst [vmem:[#allocation2 + $0x38] sm:$0xf] %v2811_v51  ;;  %v2817_v55 = vpack.c.bf16 %v692_v52, %v692_v52  ;;  %v588_v56 = vadd.f32 %v587_v53, %v3982_v44  ;;  %v684_v57 = vadd.f32 %v683_v42, %v3996_v38 }
 0x12d   : > { %v591_v58 = vpop.f32.mrf.mxu0  ;;  %v3000_v59 = vpop.f32.mrf.mxu1 }
 0x12e   : > { %902 = vst [vmem:[#allocation2 + $0x5c] sm:$0xf] %v2817_v55  ;;  %v2816_v60 = vpack.c.bf16 %v588_v56, %v586_v54  ;;  %v2813_v61 = vpack.c.bf16 %v684_v57, %v684_v57  ;;  %v705_v62 = vadd.f32 %v3000_v59, %v3996_v38  ;;  %v592_v2 = vadd.f32 %v591_v58, %v3980_v43 }
 0x12f   : > { %v593_v63 = vpop.f32.mrf.mxu0  ;;  %v696_v1 = vpop.f32.mrf.mxu1 }
 0x130   : > { %901 = vst [vmem:[#allocation2 + $0x54] sm:$0xff] %v2816_v60  ;;  %898 = vst [vmem:[#allocation2 + $0x44] sm:$0xf] %v2813_v61  ;;  %v2823_v3 = vpack.c.bf16 %v705_v62, %v705_v62  ;;  %v594_v4 = vadd.f32 %v593_v63, %v3982_v44  ;;  %v697_v5 = vadd.f32 %v696_v1, %v3996_v38 }
 0x131   : > { %v595_v8 = vpop.f32.mrf.mxu0  ;;  %v3001_v9 = vpop.f32.mrf.mxu1 }
 0x132   : > { %908 = vst [vmem:[#allocation2 + $0x80] sm:$0xf] %v2823_v3  ;;  %v2818_v10 = vpack.c.bf16 %v594_v4, %v592_v2  ;;  %v2819_v17 = vpack.c.bf16 %v697_v5, %v697_v5  ;;  %v708_v19 = vadd.f32 %v3001_v9, %v3996_v38  ;;  %v596_v40 = vadd.f32 %v595_v8, %v3980_v43 }
 0x133   : > { %v597_v25 = vpop.f32.mrf.mxu0  ;;  %v699_v37 = vpop.f32.mrf.mxu1 }
 0x134   : > { %903 = vst [vmem:[#allocation2 + $0x60] sm:$0xff] %v2818_v10  ;;  %904 = vst [vmem:[#allocation2 + $0x68] sm:$0xf] %v2819_v17  ;;  %v2825_v39 = vpack.c.bf16 %v708_v19, %v708_v19  ;;  %v598_v41 = vadd.f32 %v597_v25, %v3982_v44  ;;  %v700_v45 = vadd.f32 %v699_v37, %v3996_v38 }
 0x135   : > { %v601_v46 = vpop.f32.mrf.mxu0  ;;  %v3004_v47 = vpop.f32.mrf.mxu1 }
 0x136   : > { %910 = vst [vmem:[#allocation2 + $0x8c] sm:$0xf] %v2825_v39  ;;  %v2820_v48 = vpack.c.bf16 %v598_v41, %v596_v40  ;;  %v2821_v49 = vpack.c.bf16 %v700_v45, %v700_v45  ;;  %v721_v50 = vadd.f32 %v3004_v47, %v3996_v38  ;;  %v602_v53 = vadd.f32 %v601_v46, %v3980_v43 }
 0x137   : > { %v603_v51 = vpop.f32.mrf.mxu0  ;;  %v712_v52 = vpop.f32.mrf.mxu1 }
 0x138   : > { %905 = vst [vmem:[#allocation2 + $0x6c] sm:$0xff] %v2820_v48  ;;  %906 = vst [vmem:[#allocation2 + $0x74] sm:$0xf] %v2821_v49  ;;  %v2831_v42 = vpack.c.bf16 %v721_v50, %v721_v50  ;;  %v604_v54 = vadd.f32 %v603_v51, %v3982_v44  ;;  %v713_v55 = vadd.f32 %v712_v52, %v3996_v38 }
 0x139   : > { %v605_v56 = vpop.f32.mrf.mxu0  ;;  %v3005_v57 = vpop.f32.mrf.mxu1 }
 0x13a   : > { %916 = vst [vmem:[#allocation2 + $0xb0] sm:$0xf] %v2831_v42  ;;  %v2822_v58 = vpack.c.bf16 %v604_v54, %v602_v53  ;;  %v2827_v59 = vpack.c.bf16 %v713_v55, %v713_v55  ;;  %v724_v60 = vadd.f32 %v3005_v57, %v3996_v38  ;;  %v606_v63 = vadd.f32 %v605_v56, %v3980_v43 }
 0x13b   : > { %v607_v61 = vpop.f32.mrf.mxu0  ;;  %v715_v62 = vpop.f32.mrf.mxu1 }
 0x13c   : > { %907 = vst [vmem:[#allocation2 + $0x78] sm:$0xff] %v2822_v58  ;;  %912 = vst [vmem:[#allocation2 + $0x98] sm:$0xf] %v2827_v59  ;;  %v2833_v1 = vpack.c.bf16 %v724_v60, %v724_v60  ;;  %v608_v2 = vadd.f32 %v607_v61, %v3982_v44  ;;  %v716_v3 = vadd.f32 %v715_v62, %v3996_v38  ;;  %v4046_v59 = vld [vmem:[%s4043_s27] ss:$0 sm:$0xff] }
 0x13d   : > { %v1142_v8 = vpop.f32.mrf.mxu1  ;;  %v1185_v9 = vpop.f32.mrf.mxu0 }
 0x13e   : > { %918 = vst [vmem:[#allocation2 + $0xbc] sm:$0xf] %v2833_v1  ;;  %v2824_v4 = vpack.c.bf16 %v608_v2, %v606_v63  ;;  %v2829_v5 = vpack.c.bf16 %v716_v3, %v716_v3  ;;  %v1220_v63 = vadd.f32 %v4046_v59, %v1185_v9 }
 0x13f   : > { %v3024_v10 = vpop.f32.mrf.mxu0  ;;  %v1144_v17 = vpop.f32.mrf.mxu1 }
 0x140   : > { %909 = vst [vmem:[#allocation2 + $0x84] sm:$0xff] %v2824_v4  ;;  %914 = vst [vmem:[#allocation2 + $0xa4] sm:$0xf] %v2829_v5 }
 0x141   : > { %v1188_v19 = vpop.f32.mrf.mxu0  ;;  %v1146_v40 = vpop.f32.mrf.mxu1 }
 0x142   : > { %v1221_v4 = vadd.f32 %v4046_v59, %v1188_v19 }
 0x143   : > { %v3025_v37 = vpop.f32.mrf.mxu0  ;;  %v1148_v50 = vpop.f32.mrf.mxu1 }
 0x147   : > { %v969_v43 = vld [vmem:[%s4035_s16] sm:$0xff]  ;;  %v971_v44 = vld [vmem:[%s4035_s16 + $0xc] sm:$0xff]  ;;  %v970_v61 = vld [vmem:[%s4035_s16 + $0x8] ss:$12 sps:$4 sm:$0xff]   ;;  %s2723_s16 = sshll.u32 %s4102_s29, 4 }
 0x148   : > { %v973_v25 = vunpack.c.l.bf16 %v969_v43  ;;  %v976_v38 = vunpack.c.l.bf16 %v971_v44  ;;  %v974_v46 = vunpack.c.h.bf16 %v969_v43  ;;  %v977_v48 = vunpack.c.h.bf16 %v971_v44  ;;  %s1251_s15 = sshra.s32 %s2723_s16, 3 }
 0x149   : > { %v975_v2 = vunpack.c.l.bf16 %v970_v61  ;;  %v978_v10 = vunpack.c.h.bf16 %v970_v61  ;;  %s2838_s19 = smul.u32 12, %s1251_s15  ;;  %s2845_s15 = sshll.u32 %s3966_s12, 3 }
 0x14a   : > { %v1192_v39 = vadd.f32 %v1142_v8, %v973_v25  ;;  %v1193_v41 = vadd.f32 %v1146_v40, %v976_v38  ;;  %v1206_v49 = vadd.f32 %v1144_v17, %v974_v46  ;;  %v1207_v51 = vadd.f32 %v1148_v50, %v977_v48  ;;  %s2744_s12 = sshll.u32 %s3970_s28, 4 }
 0x14b   : > { %s4105_s30 = scalar_lea.vmem [#allocation2], %s2838_s19  ;;  %s1563_s19 = scalar_lea.vmem %s4060_s1, %s2845_s15 [#allocation7] }
 0x14c   : > { %v2715_v45 = vmul.f32 -1.442695, %v1192_v39  ;;  %v2716_v47 = vmul.f32 -1.442695, %v1193_v41  ;;  %v2717_v52 = vmul.f32 -1.442695, %v1206_v49 }
 0x14d   : > { %v2718_v53 = vmul.f32 -1.442695, %v1207_v51  ;;  %v1256_v49 = vld [vmem:[%s4105_s30] sm:$0xff] }
 0x14e   : > { %3292 = vpow2.f32 %v2715_v45  ;;  %v1260_v50 = vunpack.c.l.bf16 %v1256_v49 }
 0x14f   : > { %3294 = vpow2.f32 %v2716_v47 }
 0x150   : > { %3296 = vpow2.f32 %v2717_v52 }
 0x151   : > { %3298 = vpow2.f32 %v2718_v53  ;;  %v1258_v53 = vld [vmem:[%s4105_s30 + $0xc] sm:$0xff] }
 0x15b   : > { %v3293_v42 = vpop.eup %3292 }
 0x15c   : > { %v1200_v54 = vadd.f32 1.0, %v3293_v42  ;;  %v3295_v55 = vpop.eup %3294 }
 0x15d   : > { %v1201_v56 = vadd.f32 1.0, %v3295_v55  ;;  %v3297_v57 = vpop.eup %3296 }
 0x15e   : > { %3300 = vrcp.f32 %v1200_v54  ;;  %v3299_v58 = vpop.eup %3298  ;;  %v1214_v60 = vadd.f32 1.0, %v3297_v57 }
 0x15f   : > { %3302 = vrcp.f32 %v1201_v56  ;;  %v1215_v62 = vadd.f32 1.0, %v3299_v58  ;;  %v1263_v56 = vunpack.c.l.bf16 %v1258_v53 }
 0x160   : > { %3304 = vrcp.f32 %v1214_v60 }
 0x161   : > { %3306 = vrcp.f32 %v1215_v62  ;;  %v1261_v62 = vunpack.c.h.bf16 %v1256_v49 }
 0x16b   : > { %v3301_v1 = vpop.eup %3300 }
 0x16c   : > { %v1222_v3 = vmul.f32 %v3301_v1, %v1220_v63  ;;  %v3303_v5 = vpop.eup %3302 }
 0x16d   : > { %v1223_v17 = vmul.f32 %v3303_v5, %v1221_v4  ;;  %v3305_v44 = vpop.eup %3304 }
 0x16e   : > { %v1224_v8 = vadd.f32 %v1222_v3, %v975_v2  ;;  %v3307_v9 = vpop.eup %3306  ;;  %v1228_v25 = vsub.f32 1.0, %v3305_v44  ;;  %v1232_v19 = vmul.f32 0.0, %v3305_v44  ;;  %v1264_v2 = vunpack.c.h.bf16 %v1258_v53 }
 0x16f   : > { %v1225_v43 = vadd.f32 %v1223_v17, %v978_v10  ;;  %v1229_v37 = vsub.f32 1.0, %v3307_v9  ;;  %v1233_v45 = vmul.f32 0.0, %v3307_v9 }
 0x170   : > { %3308 = vtanh.f32 %v1224_v8 }
 0x171   : > { %3310 = vtanh.f32 %v1225_v43 }
 0x17d   : > { %v3309_v38 = vpop.eup %3308 }
 0x17e   : > { %v1230_v40 = vmul.f32 %v3309_v38, %v1228_v25  ;;  %v3311_v39 = vpop.eup %3310  ;;  %v1257_v38 = vld [vmem:[%s4105_s30 + $0x8] ss:$12 sps:$4 sm:$0xff]   ;;  %s1569_s30 = sshra.s32 %s2744_s12, 3 }
 0x17f   : > { %v1231_v41 = vmul.f32 %v3311_v39, %v1229_v37  ;;  %s2846_s7 = smul.u32 12, %s1569_s30 }
 0x180   : > { %v4056_v46 = vadd.f32 %v1232_v19, %v1230_v40 }
 0x181   : > { %v4058_v47 = vadd.f32 %v1233_v45, %v1231_v41  ;;  %v1262_v41 = vunpack.c.l.bf16 %v1257_v38 }
 0x183   : > { %v1236_v48 = vpack.c.bf16 %v4058_v47, %v4056_v46 }
 0x185   : > { %2871 = vst [vmem:[%s1246_s2] sm:$0xff] %v1236_v48   ;;  %1299 = vmatmul.mubr.bf16.vlgmr.msra.gmra.mxu1 %v1236_v48  ;;  %3043 = vmatmul.mubr.bf16.vlgmr.msra.gmra.mxu0 %v1236_v48  ;;  %s1410_s2 = sshra.s32 %s2734_s11, 3  ;;  %s2849_s11 = sshll.u32 %s3970_s28, 3 }
 0x186   : > { %1426 = vmatpush1.bf16.msra.mxu1 %v3805_v11  ;;  %3047 = vmatpush3.bf16.msra.mxu0 %v3807_v12  ;;  %s2842_s29 = smul.u32 12, %s1410_s2  ;;  %s1722_s2 = scalar_lea.vmem %s4060_s1, %s2849_s11 [#allocation7] }
 0x187   : > { %1427 = vmatprep.subr.bf16.mxu1 %v3809_v13  ;;  %3048 = vmatprep.subr.bf16.mxu0 %v3621_v6  ;;  %s2755_s28 = sshll.u32 %s3974_s0, 4 }
 0x188   : > { %1457 = vmatprep.mubr.bf16.mxu1 %v3620_v0  ;;  %3062 = vmatprep.mubr.msk.bf16.mxu0 %vm3622_vm1, %v3621_v6  ;;  %s4160_s16 = scalar_lea.vmem [#allocation2], %s2842_s29  ;;  %s1728_s29 = sshra.s32 %s2755_s28, 3 }
 0x18a   : > { %1428 = vmatpush1.bf16.msra.mxu1 %v3816_v14  ;;  %3049 = vmatpush3.bf16.msra.mxu0 %v3818_v15 }
 0x18b   : > { %1429 = vmatprep.subr.bf16.mxu1 %v3822_v16  ;;  %3050 = vmatprep.subr.bf16.mxu0 %v3621_v6 }
 0x18e   : > { %1430 = vmatpush1.bf16.msra.mxu1 %v3828_v18  ;;  %3051 = vmatpush3.bf16.msra.mxu0 %v3839_v21 }
 0x18f   : > { %1431 = vmatprep.subr.bf16.mxu1 %v3837_v20  ;;  %3052 = vmatprep.subr.bf16.mxu0 %v3621_v6 }
 0x192   : > { %1432 = vmatpush1.bf16.msra.mxu1 %v3845_v22  ;;  %3053 = vmatpush3.bf16.msra.mxu0 %v3852_v24 }
 0x193   : > { %1433 = vmatprep.subr.bf16.mxu1 %v3849_v23  ;;  %3054 = vmatprep.subr.bf16.mxu0 %v3621_v6 }
 0x196   : > { %1434 = vmatpush1.bf16.msra.mxu1 %v3859_v26  ;;  %3055 = vmatpush3.bf16.msra.mxu0 %v3867_v28 }
 0x197   : > { %1435 = vmatprep.subr.bf16.mxu1 %v3862_v27  ;;  %3056 = vmatprep.subr.bf16.mxu0 %v3621_v6 }
 0x19a   : > { %1436 = vmatpush1.bf16.msra.mxu1 %v3871_v29  ;;  %3057 = vmatpush3.bf16.msra.mxu0 %v3887_v33 }
 0x19b   : > { %1437 = vmatprep.subr.bf16.mxu1 %v3876_v30  ;;  %3058 = vmatprep.subr.bf16.mxu0 %v3621_v6 }
 0x19e   : > { %1438 = vmatpush1.bf16.msra.mxu1 %v3881_v31  ;;  %3059 = vmatpush3.bf16.msra.mxu0 %v3898_v35 }
 0x19f   : > { %1439 = vmatprep.subr.bf16.mxu1 %v3885_v32  ;;  %3060 = vmatprep.subr.bf16.mxu0 %v3621_v6 }
 0x1a2   : > { %1440 = vmatpush1.bf16.msra.mxu1 %v3893_v34  ;;  %3061 = vmatpush3.bf16.msra.mxu0 %v3905_v36 }
 0x1a3   : > { %1584 = vmatprep.subr.bf16.mxu1 %v3786_v7  ;;  %3066 = vmatprep.subr.bf16.mxu0 %v3621_v6 }
 0x245   : > { %v1300_v51 = vpop.f32.mrf.mxu1  ;;  %v1343_v52 = vpop.f32.mrf.mxu0 }
 0x246   : > { %v1350_v42 = vadd.f32 %v1300_v51, %v1260_v50  ;;  %v1378_v37 = vadd.f32 %v4046_v59, %v1343_v52  ;;  %v1265_v51 = vunpack.c.h.bf16 %v1257_v38 }
 0x247   : > { %v1302_v54 = vpop.f32.mrf.mxu1  ;;  %v3044_v7 = vpop.f32.mrf.mxu0 }
 0x248   : > { %v2725_v55 = vmul.f32 -1.442695, %v1350_v42  ;;  %v1364_v3 = vadd.f32 %v1302_v54, %v1261_v62 }
 0x249   : > { %v1304_v57 = vpop.f32.mrf.mxu1  ;;  %v1346_v58 = vpop.f32.mrf.mxu0 }
 0x24a   : > { %3312 = vpow2.f32 %v2725_v55  ;;  %v1351_v60 = vadd.f32 %v1304_v57, %v1263_v56  ;;  %v2727_v5 = vmul.f32 -1.442695, %v1364_v3  ;;  %v1379_v49 = vadd.f32 %v4046_v59, %v1346_v58 }
 0x24b   : > { %v3045_v61 = vpop.f32.mrf.mxu0  ;;  %v1306_v1 = vpop.f32.mrf.mxu1 }
 0x24c   : > { %v2726_v63 = vmul.f32 -1.442695, %v1351_v60  ;;  %v1365_v4 = vadd.f32 %v1306_v1, %v1264_v2 }
 0x24e   : > { %3314 = vpow2.f32 %v2726_v63  ;;  %v2728_v8 = vmul.f32 -1.442695, %v1365_v4 }
 0x24f   : > { %3316 = vpow2.f32 %v2727_v5 }
 0x250   : > { %3318 = vpow2.f32 %v2728_v8 }
 0x257   : > { %v3313_v10 = vpop.eup %3312 }
 0x258   : > { %v1358_v17 = vadd.f32 1.0, %v3313_v10  ;;  %v1416_v10 = vld [vmem:[%s4160_s16 + $0x8] ss:$12 sps:$4 sm:$0xff]  }
 0x25a   : > { %3320 = vrcp.f32 %v1358_v17 }
 0x25b   : > { %v3315_v43 = vpop.eup %3314 }
 0x25c   : > { %v1359_v44 = vadd.f32 1.0, %v3315_v43  ;;  %v3317_v9 = vpop.eup %3316 }
 0x25d   : > { %v3319_v25 = vpop.eup %3318  ;;  %v1372_v40 = vadd.f32 1.0, %v3317_v9 }
 0x25e   : > { %3322 = vrcp.f32 %v1359_v44  ;;  %v1373_v39 = vadd.f32 1.0, %v3319_v25  ;;  %v1421_v25 = vunpack.c.l.bf16 %v1416_v10 }
 0x25f   : > { %3324 = vrcp.f32 %v1372_v40 }
 0x260   : > { %3326 = vrcp.f32 %v1373_v39  ;;  %v1424_v39 = vunpack.c.h.bf16 %v1416_v10 }
 0x267   : > { %v3321_v19 = vpop.eup %3320 }
 0x268   : > { %v1380_v45 = vmul.f32 %v3321_v19, %v1378_v37 }
 0x26a   : > { %v1382_v48 = vadd.f32 %v1380_v45, %v1262_v41 }
 0x26b   : > { %v3323_v50 = vpop.eup %3322 }
 0x26c   : > { %3328 = vtanh.f32 %v1382_v48  ;;  %v1381_v53 = vmul.f32 %v3323_v50, %v1379_v49  ;;  %v3325_v54 = vpop.eup %3324 }
 0x26d   : > { %v3327_v52 = vpop.eup %3326  ;;  %v1386_v55 = vsub.f32 1.0, %v3325_v54  ;;  %v1390_v62 = vmul.f32 %v3325_v54, %v4056_v46 }
 0x26e   : > { %v1383_v42 = vadd.f32 %v1381_v53, %v1265_v51  ;;  %v1387_v56 = vsub.f32 1.0, %v3327_v52  ;;  %v1391_v58 = vmul.f32 %v3327_v52, %v4058_v47 }
 0x270   : > { %3330 = vtanh.f32 %v1383_v42 }
 0x279   : > { %v3329_v7 = vpop.eup %3328 }
 0x27a   : > { %v1388_v57 = vmul.f32 %v3329_v7, %v1386_v55 }
 0x27c   : > { %v4115_v63 = vadd.f32 %v1390_v62, %v1388_v57  ;;  %v4180_v62 = vld [vmem:[#allocation4 + $0xb0] ss:$12 sps:$4 sm:$0xff]  }
 0x27d   : > { %v3331_v60 = vpop.eup %3330 }
 0x27e   : > { %v1389_v61 = vmul.f32 %v3331_v60, %v1387_v56 }
 0x280   : > { %v4117_v1 = vadd.f32 %v1391_v58, %v1389_v61  ;;  %v4177_v61 = vld [vmem:[#allocation4 + $0xa8] ss:$12 sps:$4 sm:$0xff]  }
 0x281   : > { %v4183_v58 = vld [vmem:[#allocation4 + $0x94] ss:$12 sps:$4 sm:$0xff]  }
 0x282   : > { %v1394_v2 = vpack.c.bf16 %v4117_v1, %v4115_v63 }
 0x284   : > { %2876 = vst [vmem:[%s1404_s14] sm:$0xff] %v1394_v2   ;;  %1458 = vmatmul.mubr.bf16.vlgmr.msra.gmra.mxu1 %v1394_v2  ;;  %3063 = vmatmul.mubr.bf16.vlgmr.msra.gmra.mxu0 %v1394_v2  ;;  %v4196_v2 = vld [vmem:[#allocation4 + $0x7c] ss:$12 sps:$4 sm:$0xff]   ;;  %s4259_s14 = scalar_lea.vmem [#allocation2], %s2846_s7 }
 0x285   : > { %1585 = vmatpush1.bf16.msra.mxu1 %v3805_v11  ;;  %3067 = vmatpush3.bf16.msra.mxu0 %v3807_v12  ;;  %v4155_v11 = vld [vmem:[#allocation4 + $0xac] ss:$12 sps:$4 sm:$0xff]   ;;  %v1415_v12 = vld [vmem:[%s4160_s16] sm:$0xff] }
 0x286   : > { %1586 = vmatprep.subr.bf16.mxu1 %v3809_v13  ;;  %3068 = vmatprep.subr.bf16.mxu0 %v3621_v6  ;;  %v1419_v13 = vunpack.c.l.bf16 %v1415_v12 }
 0x287   : > { %1616 = vmatprep.mubr.bf16.mxu1 %v3620_v0  ;;  %3082 = vmatprep.mubr.msk.bf16.mxu0 %vm3622_vm1, %v3621_v6 }
 0x289   : > { %1587 = vmatpush1.bf16.msra.mxu1 %v3816_v14  ;;  %3069 = vmatpush3.bf16.msra.mxu0 %v3818_v15 }
 0x28a   : > { %1588 = vmatprep.subr.bf16.mxu1 %v3822_v16  ;;  %3070 = vmatprep.subr.bf16.mxu0 %v3621_v6  ;;  %v1417_v16 = vld [vmem:[%s4160_s16 + $0xc] sm:$0xff]  ;;  %s2850_s16 = smul.u32 12, %s1728_s29 }
 0x28c   : > { %s4312_s15 = scalar_lea.vmem [#allocation2], %s2850_s16  ;;  %s2861_s16 = sshll.u32 %s3959_s13, 3 }
 0x28d   : > { %1589 = vmatpush1.bf16.msra.mxu1 %v3828_v18  ;;  %3071 = vmatpush3.bf16.msra.mxu0 %v3839_v21 }
 0x28e   : > { %1590 = vmatprep.subr.bf16.mxu1 %v3837_v20  ;;  %3072 = vmatprep.subr.bf16.mxu0 %v3621_v6 }
 0x291   : > { %1591 = vmatpush1.bf16.msra.mxu1 %v3845_v22  ;;  %3073 = vmatpush3.bf16.msra.mxu0 %v3852_v24 }
 0x292   : > { %1592 = vmatprep.subr.bf16.mxu1 %v3849_v23  ;;  %3074 = vmatprep.subr.bf16.mxu0 %v3621_v6  ;;  %v1422_v23 = vunpack.c.l.bf16 %v1417_v16 }
 0x295   : > { %1593 = vmatpush1.bf16.msra.mxu1 %v3859_v26  ;;  %3075 = vmatpush3.bf16.msra.mxu0 %v3867_v28 }
 0x296   : > { %1594 = vmatprep.subr.bf16.mxu1 %v3862_v27  ;;  %3076 = vmatprep.subr.bf16.mxu0 %v3621_v6 }
 0x299   : > { %1595 = vmatpush1.bf16.msra.mxu1 %v3871_v29  ;;  %3077 = vmatpush3.bf16.msra.mxu0 %v3887_v33  ;;  %v1420_v29 = vunpack.c.h.bf16 %v1415_v12  ;;  %v4200_v12 = vld [vmem:[#allocation4 + $0x78] ss:$12 sps:$4 sm:$0xff]  }
 0x29a   : > { %1596 = vmatprep.subr.bf16.mxu1 %v3876_v30  ;;  %3078 = vmatprep.subr.bf16.mxu0 %v3621_v6 }
 0x29d   : > { %1597 = vmatpush1.bf16.msra.mxu1 %v3881_v31  ;;  %3079 = vmatpush3.bf16.msra.mxu0 %v3898_v35 }
 0x29e   : > { %1598 = vmatprep.subr.bf16.mxu1 %v3885_v32  ;;  %3080 = vmatprep.subr.bf16.mxu0 %v3621_v6  ;;  %v1423_v32 = vunpack.c.h.bf16 %v1417_v16  ;;  %v4213_v16 = vld [vmem:[#allocation4 + $0x68] ss:$12 sps:$4 sm:$0xff]  }
 0x2a1   : > { %1599 = vmatpush1.bf16.msra.mxu1 %v3893_v34  ;;  %3081 = vmatpush3.bf16.msra.mxu0 %v3905_v36 }
 0x2a2   : > { %1743 = vmatprep.subr.bf16.mxu1 %v4155_v11  ;;  %3086 = vmatprep.subr.bf16.mxu0 %v3621_v6 }
 0x344   : > { %v1459_v14 = vpop.f32.mrf.mxu1  ;;  %v1502_v15 = vpop.f32.mrf.mxu0 }
 0x345   : > { %v1509_v18 = vadd.f32 %v1459_v14, %v1419_v13  ;;  %v1537_v17 = vadd.f32 %v4046_v59, %v1502_v15  ;;  %v4203_v13 = vld [vmem:[#allocation4 + $0x80] ss:$12 sps:$4 sm:$0xff]   ;;  %v4206_v14 = vld [vmem:[#allocation4 + $0x64] ss:$12 sps:$4 sm:$0xff]  }
 0x346   : > { %v1461_v20 = vpop.f32.mrf.mxu1  ;;  %v3064_v21 = vpop.f32.mrf.mxu0  ;;  %v4210_v15 = vld [vmem:[#allocation4 + $0x60] ss:$12 sps:$4 sm:$0xff]  }
 0x347   : > { %v2736_v22 = vmul.f32 -1.442695, %v1509_v18  ;;  %v1523_v33 = vadd.f32 %v1461_v20, %v1420_v29  ;;  %v4216_v18 = vld [vmem:[#allocation4 + $0x4c] ss:$12 sps:$4 sm:$0xff]   ;;  %v4220_v20 = vld [vmem:[#allocation4 + $0x48] ss:$12 sps:$4 sm:$0xff]  }
 0x348   : > { %v1463_v24 = vpop.f32.mrf.mxu1  ;;  %v1505_v26 = vpop.f32.mrf.mxu0  ;;  %v4223_v21 = vld [vmem:[#allocation4 + $0x50] ss:$12 sps:$4 sm:$0xff]  }
 0x349   : > { %3332 = vpow2.f32 %v2736_v22  ;;  %v1510_v27 = vadd.f32 %v1463_v24, %v1422_v23  ;;  %v2738_v35 = vmul.f32 -1.442695, %v1523_v33  ;;  %v1538_v40 = vadd.f32 %v4046_v59, %v1505_v26  ;;  %v4226_v22 = vld [vmem:[#allocation4 + $0x34] ss:$12 sps:$4 sm:$0xff]   ;;  %v4230_v23 = vld [vmem:[#allocation4 + $0x30] ss:$12 sps:$4 sm:$0xff]  }
 0x34a   : > { %v3065_v28 = vpop.f32.mrf.mxu0  ;;  %v1465_v31 = vpop.f32.mrf.mxu1  ;;  %v4233_v24 = vld [vmem:[#allocation4 + $0x38] ss:$12 sps:$4 sm:$0xff]   ;;  %v4236_v26 = vld [vmem:[#allocation4 + $0x1c] ss:$12 sps:$4 sm:$0xff]  }
 0x34b   : > { %v2737_v30 = vmul.f32 -1.442695, %v1510_v27  ;;  %v1524_v34 = vadd.f32 %v1465_v31, %v1423_v32  ;;  %v4240_v27 = vld [vmem:[#allocation4 + $0x18] ss:$12 sps:$4 sm:$0xff]   ;;  %v4243_v28 = vld [vmem:[#allocation4 + $0x20] ss:$12 sps:$4 sm:$0xff]  }
 0x34c   : > { %v4246_v29 = vld [vmem:[#allocation4 + $0x4] ss:$12 sps:$4 sm:$0xff]   ;;  %v4253_v31 = vld [vmem:[#allocation4 + $0x8] ss:$12 sps:$4 sm:$0xff]  }
 0x34d   : > { %3334 = vpow2.f32 %v2737_v30  ;;  %v2739_v36 = vmul.f32 -1.442695, %v1524_v34  ;;  %v4250_v30 = vld [vmem:[#allocation4] ss:$12 sps:$4 sm:$0xff]  }
 0x34e   : > { %3336 = vpow2.f32 %v2738_v35  ;;  %v1574_v32 = vld [vmem:[%s4259_s14] sm:$0xff] }
 0x34f   : > { %3338 = vpow2.f32 %v2739_v36  ;;  %v1578_v33 = vunpack.c.l.bf16 %v1574_v32  ;;  %v1576_v36 = vld [vmem:[%s4259_s14 + $0xc] sm:$0xff] }
 0x356   : > { %v3333_v46 = vpop.eup %3332 }
 0x357   : > { %v1517_v47 = vadd.f32 1.0, %v3333_v46 }
 0x359   : > { %3340 = vrcp.f32 %v1517_v47 }
 0x35a   : > { %v3335_v3 = vpop.eup %3334 }
 0x35b   : > { %v1518_v4 = vadd.f32 1.0, %v3335_v3  ;;  %v3337_v5 = vpop.eup %3336 }
 0x35c   : > { %v3339_v8 = vpop.eup %3338  ;;  %v1531_v43 = vadd.f32 1.0, %v3337_v5  ;;  %v1581_v5 = vunpack.c.l.bf16 %v1576_v36 }
 0x35d   : > { %3342 = vrcp.f32 %v1518_v4  ;;  %v1532_v9 = vadd.f32 1.0, %v3339_v8 }
 0x35e   : > { %3344 = vrcp.f32 %v1531_v43 }
 0x35f   : > { %3346 = vrcp.f32 %v1532_v9 }
 0x366   : > { %v3341_v44 = vpop.eup %3340 }
 0x367   : > { %v1539_v38 = vmul.f32 %v3341_v44, %v1537_v17  ;;  %v1579_v44 = vunpack.c.h.bf16 %v1574_v32 }
 0x369   : > { %v1541_v37 = vadd.f32 %v1539_v38, %v1421_v25  ;;  %v1582_v38 = vunpack.c.h.bf16 %v1576_v36 }
 0x36a   : > { %v3343_v19 = vpop.eup %3342 }
 0x36b   : > { %3348 = vtanh.f32 %v1541_v37  ;;  %v1540_v41 = vmul.f32 %v3343_v19, %v1538_v40  ;;  %v3345_v48 = vpop.eup %3344 }
 0x36c   : > { %v3347_v49 = vpop.eup %3346  ;;  %v1545_v51 = vsub.f32 1.0, %v3345_v48  ;;  %v1549_v7 = vmul.f32 %v3345_v48, %v4115_v63  ;;  %v4190_v63 = vld [vmem:[#allocation4 + $0x90] ss:$12 sps:$4 sm:$0xff]  }
 0x36d   : > { %v1542_v45 = vadd.f32 %v1540_v41, %v1424_v39  ;;  %v1546_v53 = vsub.f32 1.0, %v3347_v49  ;;  %v1550_v55 = vmul.f32 %v3347_v49, %v4117_v1  ;;  %v4193_v1 = vld [vmem:[#allocation4 + $0x98] ss:$12 sps:$4 sm:$0xff]  }
 0x36f   : > { %3350 = vtanh.f32 %v1542_v45 }
 0x378   : > { %v3349_v50 = vpop.eup %3348 }
 0x379   : > { %v1547_v42 = vmul.f32 %v3349_v50, %v1545_v51 }
 0x37b   : > { %v4170_v56 = vadd.f32 %v1549_v7, %v1547_v42 }
 0x37c   : > { %v3351_v54 = vpop.eup %3350 }
 0x37d   : > { %v1548_v52 = vmul.f32 %v3351_v54, %v1546_v53  ;;  %v1575_v53 = vld [vmem:[%s4259_s14 + $0x8] ss:$12 sps:$4 sm:$0xff]  }
 0x37e   : > { %v1583_v36 = vunpack.c.h.bf16 %v1575_v53 }
 0x37f   : > { %v4172_v57 = vadd.f32 %v1550_v55, %v1548_v52  ;;  %v1580_v55 = vunpack.c.l.bf16 %v1575_v53 }
 0x381   : > { %v1553_v60 = vpack.c.bf16 %v4172_v57, %v4170_v56 }
 0x383   : > { %2881 = vst [vmem:[%s1563_s19] sm:$0xff] %v1553_v60   ;;  %1617 = vmatmul.mubr.bf16.vlgmr.msra.gmra.mxu1 %v1553_v60  ;;  %3083 = vmatmul.mubr.bf16.vlgmr.msra.gmra.mxu0 %v1553_v60  ;;  %s2853_s19 = sshll.u32 %s3974_s0, 3  ;;  %s2765_s0 = sshll.u32 %s3955_s17, 4 }
 0x384   : > { %1744 = vmatpush1.bf16.msra.mxu1 %v4177_v61  ;;  %3087 = vmatpush3.bf16.msra.mxu0 %v4180_v62  ;;  %s1881_s12 = scalar_lea.vmem %s4060_s1, %s2853_s19 [#allocation7]  ;;  %s1887_s30 = sshra.s32 %s2765_s0, 3 }
 0x385   : > { %1745 = vmatprep.subr.bf16.mxu1 %v4183_v58  ;;  %3088 = vmatprep.subr.bf16.mxu0 %v3621_v6  ;;  %s2854_s7 = smul.u32 12, %s1887_s30  ;;  %s2785_s19 = sshll.u32 %s3962_s18, 4 }
 0x386   : > { %1775 = vmatprep.mubr.bf16.mxu1 %v3620_v0  ;;  %3102 = vmatprep.mubr.msk.bf16.mxu0 %vm3622_vm1, %v3621_v6  ;;  %s2865_s30 = sshll.u32 %s3962_s18, 3  ;;  %s2797_s18 = sshll.u32 %s3607_s24, 6 }
 0x387   : > { %s4365_s14 = scalar_lea.vmem [#allocation2], %s2854_s7  ;;  %s2627_s7 = sshll.u32 %s4052_s20, 4 }
 0x388   : > { %1746 = vmatpush1.bf16.msra.mxu1 %v4190_v63  ;;  %3089 = vmatpush3.bf16.msra.mxu0 %v4193_v1 }
 0x389   : > { %1747 = vmatprep.subr.bf16.mxu1 %v4196_v2  ;;  %3090 = vmatprep.subr.bf16.mxu0 %v3621_v6 }
 0x38c   : > { %1748 = vmatpush1.bf16.msra.mxu1 %v4200_v12  ;;  %3091 = vmatpush3.bf16.msra.mxu0 %v4203_v13 }
 0x38d   : > { %1749 = vmatprep.subr.bf16.mxu1 %v4206_v14  ;;  %3092 = vmatprep.subr.bf16.mxu0 %v3621_v6 }
 0x390   : > { %1750 = vmatpush1.bf16.msra.mxu1 %v4210_v15  ;;  %3093 = vmatpush3.bf16.msra.mxu0 %v4213_v16 }
 0x391   : > { %1751 = vmatprep.subr.bf16.mxu1 %v4216_v18  ;;  %3094 = vmatprep.subr.bf16.mxu0 %v3621_v6 }
 0x394   : > { %1752 = vmatpush1.bf16.msra.mxu1 %v4220_v20  ;;  %3095 = vmatpush3.bf16.msra.mxu0 %v4223_v21 }
 0x395   : > { %1753 = vmatprep.subr.bf16.mxu1 %v4226_v22  ;;  %3096 = vmatprep.subr.bf16.mxu0 %v3621_v6 }
 0x398   : > { %1754 = vmatpush1.bf16.msra.mxu1 %v4230_v23  ;;  %3097 = vmatpush3.bf16.msra.mxu0 %v4233_v24 }
 0x399   : > { %1755 = vmatprep.subr.bf16.mxu1 %v4236_v26  ;;  %3098 = vmatprep.subr.bf16.mxu0 %v3621_v6 }
 0x39c   : > { %1756 = vmatpush1.bf16.msra.mxu1 %v4240_v27  ;;  %3099 = vmatpush3.bf16.msra.mxu0 %v4243_v28 }
 0x39d   : > { %1757 = vmatprep.subr.bf16.mxu1 %v4246_v29  ;;  %3100 = vmatprep.subr.bf16.mxu0 %v3621_v6 }
 0x3a0   : > { %1758 = vmatpush1.bf16.msra.mxu1 %v4250_v30  ;;  %3101 = vmatpush3.bf16.msra.mxu0 %v4253_v31 }
 0x3a1   : > { %1902 = vmatprep.subr.bf16.mxu1 %v4155_v11  ;;  %3106 = vmatprep.subr.bf16.mxu0 %v3621_v6 }
 0x443   : > { %v1618_v34 = vpop.f32.mrf.mxu1  ;;  %v1661_v35 = vpop.f32.mrf.mxu0 }
 0x444   : > { %v1668_v46 = vadd.f32 %v1618_v34, %v1578_v33  ;;  %v1696_v42 = vadd.f32 %v4046_v59, %v1661_v35 }
 0x445   : > { %v1620_v47 = vpop.f32.mrf.mxu1  ;;  %v3084_v3 = vpop.f32.mrf.mxu0 }
 0x446   : > { %v2746_v4 = vmul.f32 -1.442695, %v1668_v46  ;;  %v1682_v37 = vadd.f32 %v1620_v47, %v1579_v44 }
 0x447   : > { %v1622_v8 = vpop.f32.mrf.mxu1  ;;  %v1664_v10 = vpop.f32.mrf.mxu0 }
 0x448   : > { %3352 = vpow2.f32 %v2746_v4  ;;  %v1669_v17 = vadd.f32 %v1622_v8, %v1581_v5  ;;  %v2748_v19 = vmul.f32 -1.442695, %v1682_v37  ;;  %v1697_v33 = vadd.f32 %v4046_v59, %v1664_v10 }
 0x449   : > { %v3085_v43 = vpop.f32.mrf.mxu0  ;;  %v1624_v25 = vpop.f32.mrf.mxu1 }
 0x44a   : > { %v2747_v9 = vmul.f32 -1.442695, %v1669_v17  ;;  %v1683_v40 = vadd.f32 %v1624_v25, %v1582_v38 }
 0x44c   : > { %3354 = vpow2.f32 %v2747_v9  ;;  %v2749_v39 = vmul.f32 -1.442695, %v1683_v40 }
 0x44d   : > { %3356 = vpow2.f32 %v2748_v19 }
 0x44e   : > { %3358 = vpow2.f32 %v2749_v39  ;;  %v1735_v39 = vld [vmem:[%s4312_s15 + $0xc] sm:$0xff] }
 0x455   : > { %v3353_v41 = vpop.eup %3352 }
 0x456   : > { %v1676_v45 = vadd.f32 1.0, %v3353_v41 }
 0x458   : > { %3360 = vrcp.f32 %v1676_v45 }
 0x459   : > { %v3355_v48 = vpop.eup %3354 }
 0x45a   : > { %v1677_v49 = vadd.f32 1.0, %v3355_v48  ;;  %v3357_v50 = vpop.eup %3356 }
 0x45b   : > { %v3359_v51 = vpop.eup %3358  ;;  %v1690_v54 = vadd.f32 1.0, %v3357_v50  ;;  %v1740_v50 = vunpack.c.l.bf16 %v1735_v39 }
 0x45c   : > { %3362 = vrcp.f32 %v1677_v49  ;;  %v1691_v7 = vadd.f32 1.0, %v3359_v51 }
 0x45d   : > { %3364 = vrcp.f32 %v1690_v54 }
 0x45e   : > { %3366 = vrcp.f32 %v1691_v7 }
 0x465   : > { %v3361_v52 = vpop.eup %3360 }
 0x466   : > { %v1698_v60 = vmul.f32 %v3361_v52, %v1696_v42 }
 0x468   : > { %v1700_v32 = vadd.f32 %v1698_v60, %v1580_v55  ;;  %v1741_v60 = vunpack.c.h.bf16 %v1735_v39 }
 0x469   : > { %v3363_v34 = vpop.eup %3362 }
 0x46a   : > { %3368 = vtanh.f32 %v1700_v32  ;;  %v1699_v46 = vmul.f32 %v3363_v34, %v1697_v33  ;;  %v3365_v3 = vpop.eup %3364 }
 0x46b   : > { %v3367_v35 = vpop.eup %3366  ;;  %v1704_v5 = vsub.f32 1.0, %v3365_v3  ;;  %v1708_v9 = vmul.f32 %v3365_v3, %v4170_v56  ;;  %v1733_v56 = vld [vmem:[%s4312_s15] sm:$0xff] }
 0x46c   : > { %v1701_v47 = vadd.f32 %v1699_v46, %v1583_v36  ;;  %v1705_v8 = vsub.f32 1.0, %v3367_v35  ;;  %v1709_v10 = vmul.f32 %v3367_v35, %v4172_v57  ;;  %v1737_v57 = vunpack.c.l.bf16 %v1733_v56 }
 0x46d   : > { %v1738_v52 = vunpack.c.h.bf16 %v1733_v56 }
 0x46e   : > { %3370 = vtanh.f32 %v1701_v47 }
 0x477   : > { %v3369_v4 = vpop.eup %3368 }
 0x478   : > { %v1706_v17 = vmul.f32 %v3369_v4, %v1704_v5 }
 0x47a   : > { %v4269_v25 = vadd.f32 %v1708_v9, %v1706_v17 }
 0x47b   : > { %v3371_v43 = vpop.eup %3370 }
 0x47c   : > { %v1707_v44 = vmul.f32 %v3371_v43, %v1705_v8  ;;  %v1734_v8 = vld [vmem:[%s4312_s15 + $0x8] ss:$12 sps:$4 sm:$0xff]   ;;  %s2199_s15 = scalar_lea.vmem %s4060_s1, %s2861_s16 [#allocation7] }
 0x47d   : > { %v1742_v39 = vunpack.c.h.bf16 %v1734_v8 }
 0x47e   : > { %v4271_v38 = vadd.f32 %v1709_v10, %v1707_v44  ;;  %v1739_v10 = vunpack.c.l.bf16 %v1734_v8 }
 0x480   : > { %v1712_v37 = vpack.c.bf16 %v4271_v38, %v4269_v25 }
 0x482   : > { %2886 = vst [vmem:[%s1722_s2] sm:$0xff] %v1712_v37   ;;  %1776 = vmatmul.mubr.bf16.vlgmr.msra.gmra.mxu1 %v1712_v37  ;;  %3103 = vmatmul.mubr.bf16.vlgmr.msra.gmra.mxu0 %v1712_v37 }
 0x483   : > { %1903 = vmatpush1.bf16.msra.mxu1 %v4177_v61  ;;  %3107 = vmatpush3.bf16.msra.mxu0 %v4180_v62 }
 0x484   : > { %1904 = vmatprep.subr.bf16.mxu1 %v4183_v58  ;;  %3108 = vmatprep.subr.bf16.mxu0 %v3621_v6 }
 0x485   : > { %1934 = vmatprep.mubr.bf16.mxu1 %v3620_v0  ;;  %3122 = vmatprep.mubr.msk.bf16.mxu0 %vm3622_vm1, %v3621_v6 }
 0x487   : > { %1905 = vmatpush1.bf16.msra.mxu1 %v4190_v63  ;;  %3109 = vmatpush3.bf16.msra.mxu0 %v4193_v1 }
 0x488   : > { %1906 = vmatprep.subr.bf16.mxu1 %v4196_v2  ;;  %3110 = vmatprep.subr.bf16.mxu0 %v3621_v6 }
 0x48b   : > { %1907 = vmatpush1.bf16.msra.mxu1 %v4200_v12  ;;  %3111 = vmatpush3.bf16.msra.mxu0 %v4203_v13 }
 0x48c   : > { %1908 = vmatprep.subr.bf16.mxu1 %v4206_v14  ;;  %3112 = vmatprep.subr.bf16.mxu0 %v3621_v6 }
 0x48f   : > { %1909 = vmatpush1.bf16.msra.mxu1 %v4210_v15  ;;  %3113 = vmatpush3.bf16.msra.mxu0 %v4213_v16 }
 0x490   : > { %1910 = vmatprep.subr.bf16.mxu1 %v4216_v18  ;;  %3114 = vmatprep.subr.bf16.mxu0 %v3621_v6 }
 0x493   : > { %1911 = vmatpush1.bf16.msra.mxu1 %v4220_v20  ;;  %3115 = vmatpush3.bf16.msra.mxu0 %v4223_v21 }
 0x494   : > { %1912 = vmatprep.subr.bf16.mxu1 %v4226_v22  ;;  %3116 = vmatprep.subr.bf16.mxu0 %v3621_v6 }
 0x497   : > { %1913 = vmatpush1.bf16.msra.mxu1 %v4230_v23  ;;  %3117 = vmatpush3.bf16.msra.mxu0 %v4233_v24 }
 0x498   : > { %1914 = vmatprep.subr.bf16.mxu1 %v4236_v26  ;;  %3118 = vmatprep.subr.bf16.mxu0 %v3621_v6 }
 0x49b   : > { %1915 = vmatpush1.bf16.msra.mxu1 %v4240_v27  ;;  %3119 = vmatpush3.bf16.msra.mxu0 %v4243_v28 }
 0x49c   : > { %1916 = vmatprep.subr.bf16.mxu1 %v4246_v29  ;;  %3120 = vmatprep.subr.bf16.mxu0 %v3621_v6 }
 0x49f   : > { %1917 = vmatpush1.bf16.msra.mxu1 %v4250_v30  ;;  %3121 = vmatpush3.bf16.msra.mxu0 %v4253_v31 }
 0x4a0   : > { %2061 = vmatprep.subr.bf16.mxu1 %v4155_v11  ;;  %3126 = vmatprep.subr.bf16.mxu0 %v3621_v6 }
 0x542   : > { %v1777_v40 = vpop.f32.mrf.mxu1  ;;  %v1820_v19 = vpop.f32.mrf.mxu0 }
 0x543   : > { %v1827_v41 = vadd.f32 %v1777_v40, %v1737_v57  ;;  %v1855_v17 = vadd.f32 %v4046_v59, %v1820_v19 }
 0x544   : > { %v1779_v45 = vpop.f32.mrf.mxu1  ;;  %v3104_v48 = vpop.f32.mrf.mxu0 }
 0x545   : > { %v2757_v49 = vmul.f32 -1.442695, %v1827_v41  ;;  %v1841_v32 = vadd.f32 %v1779_v45, %v1738_v52 }
 0x546   : > { %v1781_v51 = vpop.f32.mrf.mxu1  ;;  %v1823_v53 = vpop.f32.mrf.mxu0 }
 0x547   : > { %3372 = vpow2.f32 %v2757_v49  ;;  %v1828_v42 = vadd.f32 %v1781_v51, %v1740_v50  ;;  %v2759_v34 = vmul.f32 -1.442695, %v1841_v32  ;;  %v1856_v57 = vadd.f32 %v4046_v59, %v1823_v53 }
 0x548   : > { %v3105_v54 = vpop.f32.mrf.mxu0  ;;  %v1783_v55 = vpop.f32.mrf.mxu1 }
 0x549   : > { %v2758_v7 = vmul.f32 -1.442695, %v1828_v42  ;;  %v1842_v33 = vadd.f32 %v1783_v55, %v1741_v60 }
 0x54b   : > { %3374 = vpow2.f32 %v2758_v7  ;;  %v2760_v36 = vmul.f32 -1.442695, %v1842_v33 }
 0x54c   : > { %3376 = vpow2.f32 %v2759_v34  ;;  %v1894_v34 = vld [vmem:[%s4365_s14 + $0xc] sm:$0xff] }
 0x54d   : > { %3378 = vpow2.f32 %v2760_v36 }
 0x554   : > { %v3373_v46 = vpop.eup %3372 }
 0x555   : > { %v1835_v47 = vadd.f32 1.0, %v3373_v46 }
 0x557   : > { %3380 = vrcp.f32 %v1835_v47 }
 0x558   : > { %v3375_v3 = vpop.eup %3374 }
 0x559   : > { %v1836_v35 = vadd.f32 1.0, %v3375_v3  ;;  %v3377_v4 = vpop.eup %3376 }
 0x55a   : > { %v3379_v5 = vpop.eup %3378  ;;  %v1849_v43 = vadd.f32 1.0, %v3377_v4 }
 0x55b   : > { %3382 = vrcp.f32 %v1836_v35  ;;  %v1850_v9 = vadd.f32 1.0, %v3379_v5  ;;  %v1899_v35 = vunpack.c.l.bf16 %v1894_v34 }
 0x55c   : > { %3384 = vrcp.f32 %v1849_v43 }
 0x55d   : > { %3386 = vrcp.f32 %v1850_v9  ;;  %v1900_v9 = vunpack.c.h.bf16 %v1894_v34 }
 0x564   : > { %v3381_v44 = vpop.eup %3380 }
 0x565   : > { %v1857_v37 = vmul.f32 %v3381_v44, %v1855_v17 }
 0x567   : > { %v1859_v56 = vadd.f32 %v1857_v37, %v1739_v10 }
 0x568   : > { %v3383_v40 = vpop.eup %3382 }
 0x569   : > { %3388 = vtanh.f32 %v1859_v56  ;;  %v1858_v41 = vmul.f32 %v3383_v40, %v1856_v57  ;;  %v3385_v48 = vpop.eup %3384 }
 0x56a   : > { %v3387_v19 = vpop.eup %3386  ;;  %v1863_v50 = vsub.f32 1.0, %v3385_v48  ;;  %v1867_v7 = vmul.f32 %v3385_v48, %v4269_v25  ;;  %v1892_v25 = vld [vmem:[%s4365_s14] sm:$0xff] }
 0x56b   : > { %v1860_v45 = vadd.f32 %v1858_v41, %v1742_v39  ;;  %v1864_v51 = vsub.f32 1.0, %v3387_v19  ;;  %v1868_v59 = vmul.f32 %v3387_v19, %v4271_v38  ;;  %v1896_v38 = vunpack.c.l.bf16 %v1892_v25 }
 0x56c   : > { %v1897_v17 = vunpack.c.h.bf16 %v1892_v25 }
 0x56d   : > { %3390 = vtanh.f32 %v1860_v45 }
 0x576   : > { %v3389_v49 = vpop.eup %3388 }
 0x577   : > { %v1865_v42 = vmul.f32 %v3389_v49, %v1863_v50  ;;  %v1893_v49 = vld [vmem:[%s4365_s14 + $0x8] ss:$12 sps:$4 sm:$0xff]   ;;  %v4371_v50 = vld [vmem:[%s4043_s27] ss:$0 sm:$0xff]  ;;  %s2857_s27 = sshll.u32 %s3955_s17, 3  ;;  %s2775_s17 = sshll.u32 %s3959_s13, 4 }
 0x578   : > { %s2040_s11 = scalar_lea.vmem %s4060_s1, %s2857_s27 [#allocation7]  ;;  %s2046_s2 = sshra.s32 %s2775_s17, 3 }
 0x579   : > { %v4322_v53 = vadd.f32 %v1867_v7, %v1865_v42  ;;  %v1898_v7 = vunpack.c.l.bf16 %v1893_v49  ;;  %s2858_s28 = smul.u32 12, %s2046_s2  ;;  %s4448_s14 = scalar_lea.vmem %s4060_s1, %s2865_s30 [#allocation7] }
 0x57a   : > { %v3391_v54 = vpop.eup %3390  ;;  %s2866_s27 = sshll.u32 %s3607_s24, 8  ;;  %s360_s17 = scalar_lea.vmem [#allocation8], %s2627_s7 }
 0x57b   : > { %v1866_v52 = vmul.f32 %v3391_v54, %v1864_v51  ;;  %s4419_s29 = scalar_lea.vmem [#allocation2], %s2858_s28  ;;  %s2406_s2 = sshll.u32 %s360_s17, 4  ;;  %s4459_s2 = int_to_ptr.vmem [resolvable:$true] %s2406_s2 }
 0x57c   : > { %s4457_s16 = scalar_lea.hbm %s4546_s6, %s2866_s27  ;;  %s2371_s24 = scalar_lea.sflag [#allocation9], %s4052_s20 }
 0x57d   : > { %v4324_v55 = vadd.f32 %v1868_v59, %v1866_v52 }
 0x57f   : > { %v1871_v60 = vpack.c.bf16 %v4324_v55, %v4322_v53 }
 0x581   : > { %2891 = vst [vmem:[%s1881_s12] sm:$0xff] %v1871_v60   ;;  %1935 = vmatmul.mubr.bf16.vlgmr.msra.gmra.mxu1 %v1871_v60  ;;  %3123 = vmatmul.mubr.bf16.vlgmr.msra.gmra.mxu0 %v1871_v60  ;;  %s2205_s12 = sshra.s32 %s2785_s19, 3  ;;  %s4466_s19 = scalar_lea.hbm %s4545_s5, %s2797_s18 }
 0x582   : > { %2062 = vmatpush1.bf16.msra.mxu1 %v4177_v61  ;;  %3127 = vmatpush3.bf16.msra.mxu0 %v4180_v62  ;;  %s2862_s0 = smul.u32 12, %s2205_s12  ;;  %s3505_s12 = scalar_lea.vmem %s4459_s2, 256 }
 0x583   : > { %2063 = vmatprep.subr.bf16.mxu1 %v4183_v58  ;;  %3128 = vmatprep.subr.bf16.mxu0 %v3621_v6  ;;  %p3506_p7 = scmp.ne.s32.totalorder %s4459_s2, %s3505_s12 }
 0x584   : > { %2093 = vmatprep.mubr.bf16.mxu1 %v3620_v0  ;;  %3142 = vmatprep.mubr.msk.bf16.mxu0 %vm3622_vm1, %v3621_v6  ;;  %s4437_s13 = scalar_lea.vmem [#allocation2], %s2862_s0  ;;  %s3624_s0 = smov [#allocation8]  }
 0x585   : > { %p3507_p12 = pnand %p3506_p7, %p4566_p11 }
 0x586   : > { %2064 = vmatpush1.bf16.msra.mxu1 %v4190_v63  ;;  %3129 = vmatpush3.bf16.msra.mxu0 %v4193_v1 }
 0x587   : > { %2065 = vmatprep.subr.bf16.mxu1 %v4196_v2  ;;  %3130 = vmatprep.subr.bf16.mxu0 %v3621_v6  ;;  %p3508_p0 = pneg %p3507_p12 }
 0x58a   : > { %2066 = vmatpush1.bf16.msra.mxu1 %v4200_v12  ;;  %3131 = vmatpush3.bf16.msra.mxu0 %v4203_v13 }
 0x58b   : > { %2067 = vmatprep.subr.bf16.mxu1 %v4206_v14  ;;  %3132 = vmatprep.subr.bf16.mxu0 %v3621_v6 }
 0x58e   : > { %2068 = vmatpush1.bf16.msra.mxu1 %v4210_v15  ;;  %3133 = vmatpush3.bf16.msra.mxu0 %v4213_v16 }
 0x58f   : > { %2069 = vmatprep.subr.bf16.mxu1 %v4216_v18  ;;  %3134 = vmatprep.subr.bf16.mxu0 %v3621_v6 }
 0x592   : > { %2070 = vmatpush1.bf16.msra.mxu1 %v4220_v20  ;;  %3135 = vmatpush3.bf16.msra.mxu0 %v4223_v21 }
 0x593   : > { %2071 = vmatprep.subr.bf16.mxu1 %v4226_v22  ;;  %3136 = vmatprep.subr.bf16.mxu0 %v3621_v6 }
 0x596   : > { %2072 = vmatpush1.bf16.msra.mxu1 %v4230_v23  ;;  %3137 = vmatpush3.bf16.msra.mxu0 %v4233_v24 }
 0x597   : > { %2073 = vmatprep.subr.bf16.mxu1 %v4236_v26  ;;  %3138 = vmatprep.subr.bf16.mxu0 %v3621_v6 }
 0x59a   : > { %2074 = vmatpush1.bf16.msra.mxu1 %v4240_v27  ;;  %3139 = vmatpush3.bf16.msra.mxu0 %v4243_v28 }
 0x59b   : > { %2075 = vmatprep.subr.bf16.mxu1 %v4246_v29  ;;  %3140 = vmatprep.subr.bf16.mxu0 %v3621_v6 }
 0x59e   : > { %2076 = vmatpush1.bf16.msra.mxu1 %v4250_v30  ;;  %3141 = vmatpush3.bf16.msra.mxu0 %v4253_v31 }
 0x59f   : > { %2220 = vmatprep.subr.bf16.mxu1 %v4155_v11  ;;  %3146 = vmatprep.subr.bf16.mxu0 %v3621_v6 }
 0x641   : > { %v1936_v32 = vpop.f32.mrf.mxu1  ;;  %v1979_v33 = vpop.f32.mrf.mxu0 }
 0x642   : > { %v1986_v36 = vadd.f32 %v1936_v32, %v1896_v38  ;;  %v2014_v51 = vadd.f32 %v4371_v50, %v1979_v33  ;;  %v1901_v32 = vunpack.c.h.bf16 %v1893_v49 }
 0x643   : > { %v1938_v46 = vpop.f32.mrf.mxu1  ;;  %v3124_v47 = vpop.f32.mrf.mxu0 }
 0x644   : > { %v2767_v3 = vmul.f32 -1.442695, %v1986_v36  ;;  %v2000_v10 = vadd.f32 %v1938_v46, %v1897_v17 }
 0x645   : > { %v1940_v11 = vpop.f32.mrf.mxu1  ;;  %v1982_v4 = vpop.f32.mrf.mxu0 }
 0x646   : > { %3392 = vpow2.f32 %v2767_v3  ;;  %v1987_v5 = vadd.f32 %v1940_v11, %v1899_v35  ;;  %v2769_v56 = vmul.f32 -1.442695, %v2000_v10  ;;  %v2015_v25 = vadd.f32 %v4371_v50, %v1982_v4 }
 0x647   : > { %v3125_v8 = vpop.f32.mrf.mxu0  ;;  %v1942_v44 = vpop.f32.mrf.mxu1 }
 0x648   : > { %v2768_v43 = vmul.f32 -1.442695, %v1987_v5  ;;  %v2001_v37 = vadd.f32 %v1942_v44, %v1900_v9 }
 0x64a   : > { %3394 = vpow2.f32 %v2768_v43  ;;  %v2770_v57 = vmul.f32 -1.442695, %v2001_v37  ;;  %v2052_v37 = vld [vmem:[%s4419_s29 + $0x8] ss:$12 sps:$4 sm:$0xff]  }
 0x64b   : > { %3396 = vpow2.f32 %v2769_v56 }
 0x64c   : > { %3398 = vpow2.f32 %v2770_v57 }
 0x653   : > { %v3393_v40 = vpop.eup %3392 }
 0x654   : > { %v1994_v39 = vadd.f32 1.0, %v3393_v40 }
 0x656   : > { %3400 = vrcp.f32 %v1994_v39 }
 0x657   : > { %v3395_v41 = vpop.eup %3394 }
 0x658   : > { %v1995_v45 = vadd.f32 1.0, %v3395_v41  ;;  %v3397_v48 = vpop.eup %3396  ;;  %v2057_v41 = vunpack.c.l.bf16 %v2052_v37 }
 0x659   : > { %v3399_v19 = vpop.eup %3398  ;;  %v2008_v42 = vadd.f32 1.0, %v3397_v48 }
 0x65a   : > { %3402 = vrcp.f32 %v1995_v45  ;;  %v2009_v52 = vadd.f32 1.0, %v3399_v19 }
 0x65b   : > { %3404 = vrcp.f32 %v2008_v42 }
 0x65c   : > { %3406 = vrcp.f32 %v2009_v52 }
 0x663   : > { %v3401_v54 = vpop.eup %3400 }
 0x664   : > { %v2016_v59 = vmul.f32 %v3401_v54, %v2014_v51  ;;  %v2060_v51 = vunpack.c.h.bf16 %v2052_v37 }
 0x666   : > { %v2018_v60 = vadd.f32 %v2016_v59, %v1898_v7 }
 0x667   : > { %v3403_v38 = vpop.eup %3402 }
 0x668   : > { %3408 = vtanh.f32 %v2018_v60  ;;  %v2017_v34 = vmul.f32 %v3403_v38, %v2015_v25  ;;  %v3405_v46 = vpop.eup %3404 }
 0x669   : > { %v3407_v33 = vpop.eup %3406  ;;  %v2022_v3 = vsub.f32 1.0, %v3405_v46  ;;  %v2026_v17 = vmul.f32 %v3405_v46, %v4322_v53 }
 0x66a   : > { %v2019_v36 = vadd.f32 %v2017_v34, %v1901_v32  ;;  %v2023_v35 = vsub.f32 1.0, %v3407_v33  ;;  %v2027_v4 = vmul.f32 %v3407_v33, %v4324_v55 }
 0x66c   : > { %3410 = vtanh.f32 %v2019_v36 }
 0x675   : > { %v3409_v47 = vpop.eup %3408 }
 0x676   : > { %v2024_v11 = vmul.f32 %v3409_v47, %v2022_v3 }
 0x678   : > { %v4378_v43 = vadd.f32 %v2026_v17, %v2024_v11  ;;  %v2212_v17 = vld [vmem:[%s4437_s13 + $0xc] sm:$0xff] }
 0x679   : > { %v3411_v5 = vpop.eup %3410 }
 0x67a   : > { %v2025_v8 = vmul.f32 %v3411_v5, %v2023_v35  ;;  %v2210_v35 = vld [vmem:[%s4437_s13] sm:$0xff] }
 0x67b   : > { %v2214_v11 = vunpack.c.l.bf16 %v2210_v35 }
 0x67c   : > { %v4380_v44 = vadd.f32 %v2027_v4, %v2025_v8 }
 0x67e   : > { %v2030_v9 = vpack.c.bf16 %v4380_v44, %v4378_v43 }
 0x680   : > { %2896 = vst [vmem:[%s2040_s11] sm:$0xff] %v2030_v9   ;;  %2094 = vmatmul.mubr.bf16.vlgmr.msra.gmra.mxu1 %v2030_v9  ;;  %3143 = vmatmul.mubr.bf16.vlgmr.msra.gmra.mxu0 %v2030_v9  ;;  %s2390_s11 = sshll.u32 %s4060_s1, 4  ;;  %s4461_s11 = int_to_ptr.vmem [resolvable:$true] %s2390_s11 }
 0x681   : > { %2221 = vmatpush1.bf16.msra.mxu1 %v4177_v61  ;;  %3147 = vmatpush3.bf16.msra.mxu0 %v4180_v62 }
 0x682   : > { %2222 = vmatprep.subr.bf16.mxu1 %v4183_v58  ;;  %3148 = vmatprep.subr.bf16.mxu0 %v3621_v6 }
 0x683   : > { %2252 = vmatprep.mubr.bf16.mxu1 %v3620_v0  ;;  %3162 = vmatprep.mubr.msk.bf16.mxu0 %vm3622_vm1, %v3621_v6  ;;  %v2051_v0 = vld [vmem:[%s4419_s29] sm:$0xff] }
 0x684   : > { %v2055_v61 = vunpack.c.l.bf16 %v2051_v0 }
 0x685   : > { %2223 = vmatpush1.bf16.msra.mxu1 %v4190_v63  ;;  %3149 = vmatpush3.bf16.msra.mxu0 %v4193_v1  ;;  %v2053_v63 = vld [vmem:[%s4419_s29 + $0xc] sm:$0xff] }
 0x686   : > { %2224 = vmatprep.subr.bf16.mxu1 %v4196_v2  ;;  %3150 = vmatprep.subr.bf16.mxu0 %v3621_v6 }
 0x689   : > { %2225 = vmatpush1.bf16.msra.mxu1 %v4200_v12  ;;  %3151 = vmatpush3.bf16.msra.mxu0 %v4203_v13  ;;  %v2058_v13 = vunpack.c.l.bf16 %v2053_v63 }
 0x68a   : > { %2226 = vmatprep.subr.bf16.mxu1 %v4206_v14  ;;  %3152 = vmatprep.subr.bf16.mxu0 %v3621_v6 }
 0x68d   : > { %2227 = vmatpush1.bf16.msra.mxu1 %v4210_v15  ;;  %3153 = vmatpush3.bf16.msra.mxu0 %v4213_v16 }
 0x68e   : > { %2228 = vmatprep.subr.bf16.mxu1 %v4216_v18  ;;  %3154 = vmatprep.subr.bf16.mxu0 %v3621_v6 }
 0x691   : > { %2229 = vmatpush1.bf16.msra.mxu1 %v4220_v20  ;;  %3155 = vmatpush3.bf16.msra.mxu0 %v4223_v21  ;;  %v2056_v20 = vunpack.c.h.bf16 %v2051_v0  ;;  %v2217_v0 = vunpack.c.l.bf16 %v2212_v17 }
 0x692   : > { %2230 = vmatprep.subr.bf16.mxu1 %v4226_v22  ;;  %3156 = vmatprep.subr.bf16.mxu0 %v3621_v6 }
 0x695   : > { %2231 = vmatpush1.bf16.msra.mxu1 %v4230_v23  ;;  %3157 = vmatpush3.bf16.msra.mxu0 %v4233_v24  ;;  %v2059_v23 = vunpack.c.h.bf16 %v2053_v63 }
 0x696   : > { %2232 = vmatprep.subr.bf16.mxu1 %v4236_v26  ;;  %3158 = vmatprep.subr.bf16.mxu0 %v3621_v6 }
 0x699   : > { %2233 = vmatpush1.bf16.msra.mxu1 %v4240_v27  ;;  %3159 = vmatpush3.bf16.msra.mxu0 %v4243_v28 }
 0x69a   : > { %2234 = vmatprep.subr.bf16.mxu1 %v4246_v29  ;;  %3160 = vmatprep.subr.bf16.mxu0 %v3621_v6 }
 0x69d   : > { %2235 = vmatpush1.bf16.msra.mxu1 %v4250_v30  ;;  %3161 = vmatpush3.bf16.msra.mxu0 %v4253_v31 }
 0x740   : > { %v2095_v62 = vpop.f32.mrf.mxu1  ;;  %v2138_v58 = vpop.f32.mrf.mxu0 }
 0x741   : > { %v2145_v1 = vadd.f32 %v2095_v62, %v2055_v61  ;;  %v2173_v56 = vadd.f32 %v4371_v50, %v2138_v58  ;;  %v2215_v58 = vunpack.c.h.bf16 %v2210_v35 }
 0x742   : > { %v2097_v2 = vpop.f32.mrf.mxu1  ;;  %v3144_v12 = vpop.f32.mrf.mxu0 }
 0x743   : > { %v2777_v6 = vmul.f32 -1.442695, %v2145_v1  ;;  %v2159_v24 = vadd.f32 %v2097_v2, %v2056_v20 }
 0x744   : > { %v2099_v14 = vpop.f32.mrf.mxu1  ;;  %v2141_v15 = vpop.f32.mrf.mxu0 }
 0x745   : > { %3412 = vpow2.f32 %v2777_v6  ;;  %v2146_v16 = vadd.f32 %v2099_v14, %v2058_v13  ;;  %v2779_v27 = vmul.f32 -1.442695, %v2159_v24  ;;  %v2174_v19 = vadd.f32 %v4371_v50, %v2141_v15 }
 0x746   : > { %v3145_v18 = vpop.f32.mrf.mxu0  ;;  %v2101_v22 = vpop.f32.mrf.mxu1  ;;  %v2218_v13 = vunpack.c.h.bf16 %v2212_v17 }
 0x747   : > { %v2778_v21 = vmul.f32 -1.442695, %v2146_v16  ;;  %v2160_v26 = vadd.f32 %v2101_v22, %v2059_v23 }
 0x749   : > { %3414 = vpow2.f32 %v2778_v21  ;;  %v2780_v28 = vmul.f32 -1.442695, %v2160_v26 }
 0x74a   : > { %3416 = vpow2.f32 %v2779_v27  ;;  %v2211_v27 = vld [vmem:[%s4437_s13 + $0x8] ss:$12 sps:$4 sm:$0xff]   ;;  %s3509_s13 = sshll.u32 %s3624_s0, 4  ;;  %s3510_s13 = int_to_ptr.vmem [resolvable:$false] %s3509_s13 }
 0x74b   : > { %3418 = vpow2.f32 %v2780_v28  ;;  %s3511_s30 = scalar_lea.vmem %s3510_s13, 512  ;;  %p3512_p2 = scmp.lt.s32.totalorder %s4459_s2, %s3510_s13 }
 0x74c   : > { %p3513_p6 = scmp.lt.s32.totalorder %s3511_s30, %s3505_s12 }
 0x74e   : > { %p3514_p9 = por %p3513_p6, %p3512_p2 }
 0x750   : > { %p3515_p10 = pnand %p3514_p9, %p3508_p0 }
 0x752   : > { %v3413_v29 = vpop.eup %3412 }
 0x753   : > { %v2153_v30 = vadd.f32 1.0, %v3413_v29 }
 0x755   : > { %3420 = vrcp.f32 %v2153_v30 }
 0x756   : > { %v3415_v31 = vpop.eup %3414 }
 0x757   : > { %v2154_v53 = vadd.f32 1.0, %v3415_v31  ;;  %v3417_v55 = vpop.eup %3416  ;;  %v2216_v31 = vunpack.c.l.bf16 %v2211_v27 }
 0x758   : > { %v3419_v10 = vpop.eup %3418  ;;  %v2167_v57 = vadd.f32 1.0, %v3417_v55 }
 0x759   : > { %3422 = vrcp.f32 %v2154_v53  ;;  %v2168_v39 = vadd.f32 1.0, %v3419_v10 }
 0x75a   : > { %3424 = vrcp.f32 %v2167_v57 }
 0x75b   : > { %3426 = vrcp.f32 %v2168_v39 }
 0x762   : > { %v3421_v40 = vpop.eup %3420 }
 0x763   : > { %v2175_v45 = vmul.f32 %v3421_v40, %v2173_v56  ;;  %v2219_v56 = vunpack.c.h.bf16 %v2211_v27 }
 0x765   : > { %v2177_v48 = vadd.f32 %v2175_v45, %v2057_v41 }
 0x766   : > { %v3423_v49 = vpop.eup %3422 }
 0x767   : > { %3428 = vtanh.f32 %v2177_v48  ;;  %v2176_v42 = vmul.f32 %v3423_v49, %v2174_v19  ;;  %v3425_v52 = vpop.eup %3424 }
 0x768   : > { %v3427_v7 = vpop.eup %3426  ;;  %v2181_v60 = vsub.f32 1.0, %v3425_v52  ;;  %v2185_v36 = vmul.f32 %v3425_v52, %v4378_v43 }
 0x769   : > { %v2178_v54 = vadd.f32 %v2176_v42, %v2060_v51  ;;  %v2182_v25 = vsub.f32 1.0, %v3427_v7  ;;  %v2186_v46 = vmul.f32 %v3427_v7, %v4380_v44 }
 0x76b   : > { %3430 = vtanh.f32 %v2178_v54 }
 0x774   : > { %v3429_v59 = vpop.eup %3428 }
 0x775   : > { %v2183_v38 = vmul.f32 %v3429_v59, %v2181_v60 }
 0x777   : > { %v4429_v33 = vadd.f32 %v2185_v36, %v2183_v38 }
 0x778   : > { %v3431_v32 = vpop.eup %3430 }
 0x779   : > { %v2184_v34 = vmul.f32 %v3431_v32, %v2182_v25 }
 0x77b   : > { %v4431_v47 = vadd.f32 %v2186_v46, %v2184_v34 }
 0x77d   : > { %v2189_v3 = vpack.c.bf16 %v4431_v47, %v4429_v33 }
 0x77f   : > { %2901 = vst [vmem:[%s2199_s15] sm:$0xff] %v2189_v3   ;;  %2253 = vmatmul.mubr.bf16.vlgmr.msra.gmra.mxu1 %v2189_v3  ;;  %3163 = vmatmul.mubr.bf16.vlgmr.msra.gmra.mxu0 %v2189_v3 }
 0x83f   : > { %v2254_v5 = vpop.f32.mrf.mxu1  ;;  %v2297_v8 = vpop.f32.mrf.mxu0 }
 0x840   : > { %v2304_v4 = vadd.f32 %v2254_v5, %v2214_v11  ;;  %v2332_v28 = vadd.f32 %v4371_v50, %v2297_v8 }
 0x841   : > { %v2256_v43 = vpop.f32.mrf.mxu1  ;;  %v3164_v44 = vpop.f32.mrf.mxu0 }
 0x842   : > { %v2787_v9 = vmul.f32 -1.442695, %v2304_v4  ;;  %v2318_v2 = vadd.f32 %v2256_v43, %v2215_v58 }
 0x843   : > { %v2258_v61 = vpop.f32.mrf.mxu1  ;;  %v2300_v62 = vpop.f32.mrf.mxu0 }
 0x844   : > { %3432 = vpow2.f32 %v2787_v9  ;;  %v2305_v63 = vadd.f32 %v2258_v61, %v2217_v0  ;;  %v2789_v15 = vmul.f32 -1.442695, %v2318_v2  ;;  %v2333_v10 = vadd.f32 %v4371_v50, %v2300_v62 }
 0x845   : > { %v3165_v1 = vpop.f32.mrf.mxu0  ;;  %v2260_v6 = vpop.f32.mrf.mxu1 }
 0x846   : > { %v2788_v12 = vmul.f32 -1.442695, %v2305_v63  ;;  %v2319_v14 = vadd.f32 %v2260_v6, %v2218_v13 }
 0x848   : > { %3434 = vpow2.f32 %v2788_v12  ;;  %v2790_v16 = vmul.f32 -1.442695, %v2319_v14 }
 0x849   : > { %3436 = vpow2.f32 %v2789_v15 }
 0x84a   : > { %3438 = vpow2.f32 %v2790_v16 }
 0x851   : > { %v3433_v18 = vpop.eup %3432 }
 0x852   : > { %v2312_v20 = vadd.f32 1.0, %v3433_v18 }
 0x854   : > { %3440 = vrcp.f32 %v2312_v20 }
 0x855   : > { %v3435_v21 = vpop.eup %3434 }
 0x856   : > { %v2313_v22 = vadd.f32 1.0, %v3435_v21  ;;  %v3437_v23 = vpop.eup %3436 }
 0x857   : > { %v3439_v24 = vpop.eup %3438  ;;  %v2326_v26 = vadd.f32 1.0, %v3437_v23 }
 0x858   : > { %3442 = vrcp.f32 %v2313_v22  ;;  %v2327_v30 = vadd.f32 1.0, %v3439_v24 }
 0x859   : > { %3444 = vrcp.f32 %v2326_v26 }
 0x85a   : > { %3446 = vrcp.f32 %v2327_v30 }
 0x861   : > { %v3441_v29 = vpop.eup %3440 }
 0x862   : > { %v2334_v53 = vmul.f32 %v3441_v29, %v2332_v28 }
 0x864   : > { %v2336_v55 = vadd.f32 %v2334_v53, %v2216_v31 }
 0x865   : > { %v3443_v37 = vpop.eup %3442 }
 0x866   : > { %3448 = vtanh.f32 %v2336_v55  ;;  %v2335_v57 = vmul.f32 %v3443_v37, %v2333_v10  ;;  %v3445_v39 = vpop.eup %3444 }
 0x867   : > { %v3447_v41 = vpop.eup %3446  ;;  %v2340_v45 = vsub.f32 1.0, %v3445_v39  ;;  %v2344_v50 = vmul.f32 %v3445_v39, %v4429_v33 }
 0x868   : > { %v2337_v40 = vadd.f32 %v2335_v57, %v2219_v56  ;;  %v2341_v51 = vsub.f32 1.0, %v3447_v41  ;;  %v2345_v52 = vmul.f32 %v3447_v41, %v4431_v47 }
 0x86a   : > { %3450 = vtanh.f32 %v2337_v40 }
 0x873   : > { %v3449_v48 = vpop.eup %3448 }
 0x874   : > { %v2342_v19 = vmul.f32 %v3449_v48, %v2340_v45 }
 0x876   : > { %v2346_v49 = vadd.f32 %v2344_v50, %v2342_v19 }
 0x877   : > { %v3451_v42 = vpop.eup %3450 }
 0x878   : > { %v2343_v54 = vmul.f32 %v3451_v42, %v2341_v51  ;;  %2363 = vst [vmem:[%s360_s17] sm:$0xff] %v2346_v49 }
 0x87a   : > { %v2347_v7 = vadd.f32 %v2345_v52, %v2343_v54 }
 0x87c   : > { %v2905_v59 = vpack.c.bf16 %v2347_v7, %v2346_v49  ;;  %2364 = vst [vmem:[%s360_s17 + $0x8] sm:$0xff] %v2347_v7 }
 0x87d   : > { %3518 = shalt.err (!%p3515_p10)
}
 0x87e   : > { %s3519_s7 = scalar_lea.hbm %s4457_s16, 256  ;;  %s3523_s18 = scalar_lea.hbm %s4546_s6, 512 }
 0x87f   : > { %p3520_p13 = scmp.ne.s32.totalorder %s4457_s16, %s3519_s7  ;;  %p3524_p5 = scmp.lt.s32.totalorder %s4457_s16, %s4546_s6 }
 0x880   : > { %p3525_p4 = scmp.lt.s32.totalorder %s3523_s18, %s3519_s7 }
 0x881   : > { %p3521_p1 = pnand %p3520_p13, %p4566_p11 }
 0x882   : > { %p3526_p8 = por %p3525_p4, %p3524_p5 }
 0x883   : > { %p3522_p3 = pneg %p3521_p1 }
 0x885   : > { %p3527_p7 = pnand %p3526_p8, %p3522_p3 }
 0x887   : > { %3530 = shalt.err (!%p3527_p7)
}
 0x888   : > { %s3625_s1 = smov 128   ;;  %s3626_s15 = smov 8   ;;  %2906 = vst [vmem:[%s4448_s14] sm:$0xff] %v2905_v59  }
 0x889   : > { %3174 = dma.vmem_to_hbm [thread:$0]  (%p4566_p11), %s4459_s2, 256, %s4457_s16, %s2371_s24, %s3625_s1, %s3625_s1, %s3626_s15  }
 0x88a   : > { %s2366_s12 = scalar_lea.sflag [#allocation6], %s4052_s20  ;;  %s3531_s0 = scalar_lea.vmem %s4461_s11, 1024 }
 0x88b   : > { %p3532_p12 = scmp.ne.s32.totalorder %s4461_s11, %s3531_s0  ;;  %s3627_s13 = smov [#allocation7]  }
 0x88c   : > { %s3535_s30 = sshll.u32 %s3627_s13, 4  ;;  %s3536_s30 = int_to_ptr.vmem [resolvable:$false] %s3535_s30 }
 0x88d   : > { %p3533_p0 = pnand %p3532_p12, %p4566_p11  ;;  %s3537_s7 = scalar_lea.vmem %s3536_s30, 2048 }
 0x88e   : > { %p3538_p6 = scmp.lt.s32.totalorder %s4461_s11, %s3536_s30  ;;  %p3539_p9 = scmp.lt.s32.totalorder %s3537_s7, %s3531_s0 }
 0x88f   : > { %p3534_p2 = pneg %p3533_p0 }
 0x890   : > { %p3540_p10 = por %p3539_p9, %p3538_p6 }
 0x892   : > { %p3541_p13 = pnand %p3540_p10, %p3534_p2 }
 0x894   : > { %3544 = shalt.err (!%p3541_p13)
}
 0x895   : > { %s3545_s14 = scalar_lea.hbm %s4466_s19, 1024  ;;  %s3549_s24 = scalar_lea.hbm %s4545_s5, 2048 }
 0x896   : > { %p3546_p1 = scmp.ne.s32.totalorder %s4466_s19, %s3545_s14  ;;  %p3550_p4 = scmp.lt.s32.totalorder %s4466_s19, %s4545_s5 }
 0x897   : > { %p3551_p8 = scmp.lt.s32.totalorder %s3549_s24, %s3545_s14 }
 0x898   : > { %p3547_p3 = pnand %p3546_p1, %p4566_p11 }
 0x899   : > { %p3552_p7 = por %p3551_p8, %p3550_p4 }
 0x89a   : > { %p3548_p5 = pneg %p3547_p3 }
 0x89c   : > { %p3553_p12 = pnand %p3552_p7, %p3548_p5 }
 0x89e   : > { %3556 = shalt.err (!%p3553_p12)
}
 0x89f   : > { %s3628_s18 = smov 64   ;;  %s3629_s28 = smov 4  }
 0x8a0   : > { %3173 = dma.vmem_to_hbm [thread:$0]  (%p4566_p11), %s4461_s11, 1024, %s4466_s19, %s2366_s12, %s3628_s18, %s3625_s1, %s3629_s28  }
 0x8a1 PF: > { %p3188_p0 = scmp.ge.s32.totalorder %s3615_s26, 2  ;;  %s2421_s29 = sand.u32 1, %s3595_s21  }
 0x8a2   : > { %p4567_p2 = scmp.ne.s32.totalorder %s4557_s9, 0  ;;  %s2422_s15 = scalar_lea.sflag [#allocation6], %s2421_s29 }
 0x8a4   : > { %p3182_p6 = pnand %p3188_p0, %p4567_p2 }
 0x8a6   : > { %p3183_p9 = pneg %p3182_p6 }
 0x8a8   : > { %3586 = dma.done.wait (%p3183_p9), %s2422_s15, 1024  }
 0x8a9   : > { %3588 = vsyncadd (%p3183_p9), %s2422_s15, 4294966272  ;;  %s2431_s0 = scalar_lea.sflag [#allocation9], %s2421_s29 }
 0x8aa   : > { %3590 = dma.done.wait (%p3183_p9), %s2431_s0, 256  }
 0x8ab   : > { %3592 = vsyncadd (%p3183_p9), %s2431_s0, 4294967040  ;;  %s24_s26 = sadd.s32 1, %s3615_s26   ;;  %s4568_s8 = sld [smem:[#allocation13_spill]] }
 0x8ac   : > { %p21_p10 = scmp.ge.s32.totalorder %s24_s26, 4   ;;  %s4569_s21 = smov %s3599_s22 }
 0x8ad   : > { %s4570_s22 = smov %s3603_s23  ;;  %s4571_s23 = smov %s3720_s10 }
 0x8ae   : > { %s4572_s24 = smov %s3611_s25  ;;  %23 = sbr.rel (!%p21_p10) target bundleno = 11 (0xb), region = 127 }
 0x8b1   : > { %s4573_s25 = smov %s4568_s8 }
 0x8b3   :  { %2436 = vsyncpa [#allocation5], 1 }
 0x8b4   :  { %2438 = vsyncpa [#allocation5 + $0x1], 1 }
 0x8b5   :  { %2439 = vsyncpa [#allocation6], 1 }
 0x8b6   :  { %2441 = vsyncpa [#allocation6 + $0x1], 1 }
 0x8b7   :  { %2442 = vsyncpa [#allocation9], 1 }
 0x8b8   :  { %2444 = vsyncpa [#allocation9 + $0x1], 1 }

// kernel: tpu_custom_call.1
= control target key start
LH: loop header
LB: loop body
LE: loop exit
PB: predicated region body
PF: predicated region fallthrough
CT: control target
= control target key end

     0   :  { %s4602_s0 = inlined_call_operand.vmem [shape: bf16[128,16], index: 0, kind: input, shape index: {}]   ;;  %s4603_s1 = inlined_call_operand.vmem [shape: bf16[2,16,384], index: 1, kind: input, shape index: {}]   ;;  %s4604_s2 = inlined_call_operand.hbm [shape: bf16[2,128,384], index: 2, kind: input, shape index: {}]   ;;  %s4605_s3 = inlined_call_operand.vmem [shape: f32[2,1,384], index: 3, kind: input, shape index: {}]   ;;  %s4606_s4 = inlined_call_operand.vmem [shape: f32[2,1,128], index: 4, kind: input, shape index: {}]   ;;  %s4607_s5 = inlined_call_operand.hbm [shape: bf16[8,16,256], index: 5, kind: output, shape index: {0}]   ;;  %s4608_s6 = inlined_call_operand.hbm [shape: f32[2,16,128], index: 6, kind: output, shape index: {1}]  }
   0x1   :  { %4611 = sst [smem:[#allocation16_spill]] %s4602_s0 }
   0x2   :  { %4612 = sst [smem:[#allocation17_spill]] %s4603_s1 }
   0x3   :  { %4613 = sst [smem:[#allocation18_spill]] %s4604_s2 }
   0x4   :  { %12 = vsyncpa [#allocation5], 0 }
   0x5   :  { %14 = vsyncpa [#allocation5 + $0x1], 0 }
   0x6   :  { %15 = vsyncpa [#allocation6], 0 }
   0x7   :  { %17 = vsyncpa [#allocation6 + $0x1], 0 }
   0x8   :  { %18 = vsyncpa [#allocation9], 0 }
   0x9   :  { %20 = vsyncpa [#allocation9 + $0x1], 0  ;;  %s3684_s21 = smov 0   ;;  %s3686_s22 = smov 0  }
   0xa   :  { %s3688_s23 = smov 0   ;;  %s3690_s24 = smov 0  }
   0xb   :  { %s3692_s25 = smov 0   ;;  %s3694_s26 = smov 0  }
   0xc LB: > { %4614 = sst [smem:[#allocation13_spill]] %s3630_s25  ;;  %s2636_s27 = sadd.s32 4294967295, %s3634_s26   ;;  %s3634_s26 = sphi %s3694_s26, %s26_s26   ;;  %s3630_s25 = sphi %s3692_s25, %s4628_s25   ;;  %s3626_s24 = sphi %s3690_s24, %s4627_s24   ;;  %s3622_s23 = sphi %s3688_s23, %s4631_s23   ;;  %s3618_s22 = sphi %s3686_s22, %s4630_s22   ;;  %s3614_s21 = sphi %s3684_s21, %s4629_s21  }
   0xd   : > { %s2637_s28 = sadd.s32 4294967294, %s3634_s26   ;;  %s38_s29 = sadd.s32 1, %s3630_s25 }
   0xe   : > { %s105_s30 = sadd.s32 1, %s3622_s23  ;;  %p40_p0 = scmp.ge.s32.totalorder %s38_s29, 2 }
   0xf   : > { %p112_p1 = scmp.ne.s32.totalorder %s3622_s23, %s3618_s22  ;;  %p113_p2 = scmp.eq.s32.totalorder %s3634_s26, 0 }
  0x10   : > { %p118_p3 = scmp.ne.s32.totalorder %s3618_s22, %s3614_s21  ;;  %s4633_s29 = smov (%p40_p0, %s38_s29), 0 }
  0x11   : > { %4615 = sst [smem:[#allocation14_spill]] %s4633_s29  ;;  %p3725_p4 = por %p113_p2, %p112_p1 }
  0x12   : > { %p119_p5 = scmp.eq.s32.totalorder %s2636_s27, 0  ;;  %s102_s8 = ssub.s32 %s3630_s25, %s4633_s29 }
  0x13   : > { %p204_p6 = scmp.eq.s32.totalorder %s2636_s27, 1  ;;  %p103_p7 = scmp.eq.s32.totalorder %s102_s8, 0 }
  0x14   : > { %p3731_p8 = por %p119_p5, %p118_p3  ;;  %p210_p10 = scmp.eq.s32.totalorder %s2637_s28, 1 }
  0x15   : > { %p3735_p9 = por %p204_p6, %p112_p1  ;;  %p3207_p13 = scmp.lt.s32.totalorder %s3634_s26, 2 }
  0x16   : > { %s3740_s11 = scalar_select %p103_p7, %s3622_s23, %s105_s30  }
  0x17   : > { %p3742_p11 = por %p210_p10, %p118_p3  ;;  %s281_s13 = sand.u32 1, %s3622_s23  }
  0x18   : > { %4619 = sst [smem:[#allocation15_spill]] %s3740_s11  ;;  %s3185_s14 = smul.u32 192, %s281_s13 }
  0x19   : > { %s3186_s15 = smul.u32 3072, %s3630_s25  ;;  %p3752_p0 = pnand %p3207_p13, %p3725_p4 }
  0x1a   : > { %s4622_s2 = sld [smem:[#allocation18_spill]]  ;;  %s285_s20 = scalar_lea.vmem [#allocation4], %s3185_s14 }
  0x1b   : > { %s292_s27 = sshll.u32 %s285_s20, 4  ;;  %p2642_p1 = scmp.ge.s32.totalorder %s3634_s26, 1  ;;  %s293_s27 = int_to_ptr.vmem [resolvable:$true] %s292_s27 }
  0x1c   : > { %s282_s28 = scalar_lea.sflag [#allocation5], %s281_s13  ;;  %p3498_p2 = pneg %p3752_p0 }
  0x1d   : > { %s3509_s30 = scalar_lea.vmem %s293_s27, 3072  ;;  %s3636_s7 = smov [#allocation4]  }
  0x1e   : > { %p3510_p3 = scmp.ne.s32.totalorder %s293_s27, %s3509_s30  ;;  %s3514_s8 = sshll.u32 %s3636_s7, 4  ;;  %s3515_s8 = int_to_ptr.vmem [resolvable:$false] %s3514_s8 }
  0x1f   : > { %s3516_s29 = scalar_lea.vmem %s3515_s8, 6144  ;;  %p3517_p4 = scmp.lt.s32.totalorder %s293_s27, %s3515_s8 }
  0x20   : > { %s291_s19 = scalar_lea.hbm %s4622_s2, %s3186_s15  ;;  %p3512_p5 = pnand %p3510_p3, %p3498_p2 }
  0x21   : > { %p3518_p7 = scmp.lt.s32.totalorder %s3516_s29, %s3509_s30 }
  0x22   : > { %p3513_p6 = pneg %p3512_p5 }
  0x23   : > { %p3519_p10 = por %p3518_p7, %p3517_p4 }
  0x25   : > { %p3520_p13 = pnand %p3519_p10, %p3513_p6 }
  0x27   : > { %3523 = shalt.err (!%p3520_p13)
}
  0x28   : > { %s3637_s14 = smov 192   ;;  %s3638_s13 = smov 12  }
  0x29   : > { %3199 = dma.hbm_to_vmem [thread:$0]  (!%p3752_p0), %s291_s19, 3072, %s293_s27, %s282_s28, %s3637_s14, %s3637_s14, %s3638_s13  }
  0x2a   : > { %p313_p12 = scmp.lt.s32.totalorder %s3634_s26, 3 }
  0x2c   : > { %p314_p2 = pnand %p2642_p1, %p313_p12 }
  0x2d   : > { %s3768_s15 = sand.u32 (!%p314_p2), 1, %s3618_s22  }
  0x2e   : > { %317 = sbr.rel (%p314_p2) target bundleno = 2196 (0x894), region = 40  ;;  %s320_s17 = scalar_lea.sflag (!%p314_p2), [#allocation5], %s3768_s15 }
  0x2f   : > { %s3187_s29 = smul.u32 (!%p314_p2), 192, %s3768_s15 }
  0x31   : > { %s3772_s18 = scalar_lea.vmem (!%p314_p2), [#allocation4], %s3187_s29 }
  0x33   : > { %3601 = dma.done.wait (%p3731_p8), %s320_s17, 3072  }
  0x34   : > { %3603 = vsyncadd (%p3731_p8), %s320_s17, 4294964224  ;;  %p392_p0 = scmp.lt.s32.totalorder %s3626_s24, 1  ;;  %v3639_v0 = vmov 0   ;;  %s4623_s1 = sld [smem:[#allocation17_spill]]  ;;  %vm509_vm0 = vcmask 130048   ;;  %v3640_v6 = vmov 0.0   ;;  %v438_v38 = vlaneseq }
  0x35   : > { %566 = vmatprep.mubr.bf16.mxu0 %v3639_v0  ;;  %626 = vmatprep.mubr.bf16.mxu1 %v3639_v0  ;;  %s4624_s0 = sld [smem:[#allocation16_spill]]  ;;  %v3803_v7 = vld [vmem:[%s3772_s18 + $0xac] ss:$12 sps:$4 sm:$0xff]   ;;  %v3823_v11 = vld [vmem:[%s3772_s18 + $0xa8] ss:$12 sps:$4 sm:$0xff]   ;;  %vm3641_vm1 = vmmov 0  }
  0x36   : > { %s3782_s16 = scalar_select %p392_p0, %s3626_s24, 1  ;;  %v3826_v12 = vld [vmem:[%s3772_s18 + $0xb0] ss:$12 sps:$4 sm:$0xff]   ;;  %v3829_v13 = vld [vmem:[%s3772_s18 + $0x94] ss:$12 sps:$4 sm:$0xff]   ;;  %v3642_v37 = vmov 0.0|0.0  }
  0x37   : > { %v3837_v14 = vld [vmem:[%s3772_s18 + $0x90] ss:$12 sps:$4 sm:$0xff]   ;;  %v3840_v15 = vld [vmem:[%s3772_s18 + $0x98] ss:$12 sps:$4 sm:$0xff]   ;;  %v3865_v21 = vld [vmem:[%s3772_s18 + $0x80] ss:$12 sps:$4 sm:$0xff]  }
  0x38   : > { %s3188_s19 = smul.u32 24, %s3782_s16  ;;  %v3845_v16 = vld [vmem:[%s3772_s18 + $0x7c] ss:$12 sps:$4 sm:$0xff]   ;;  %v3852_v18 = vld [vmem:[%s3772_s18 + $0x78] ss:$12 sps:$4 sm:$0xff]   ;;  %s2706_s14 = sshll.u32 %s3626_s24, 1 }
  0x39   : > { %v3862_v20 = vld [vmem:[%s3772_s18 + $0x64] ss:$12 sps:$4 sm:$0xff]   ;;  %v3872_v22 = vld [vmem:[%s3772_s18 + $0x60] ss:$12 sps:$4 sm:$0xff]   ;;  %v3881_v24 = vld [vmem:[%s3772_s18 + $0x68] ss:$12 sps:$4 sm:$0xff]  }
  0x3a   : > { %s396_s28 = scalar_lea.vmem %s4623_s1, %s3188_s19  ;;  %v3877_v23 = vld [vmem:[%s3772_s18 + $0x4c] ss:$12 sps:$4 sm:$0xff]   ;;  %v3889_v26 = vld [vmem:[%s3772_s18 + $0x48] ss:$12 sps:$4 sm:$0xff]   ;;  %v3899_v28 = vld [vmem:[%s3772_s18 + $0x50] ss:$12 sps:$4 sm:$0xff]  }
  0x3b   : > { %v3267_v1 = vld [vmem:[%s396_s28 + $0x4] ss:$12 sps:$4 sm:$0xff]   ;;  %v3269_v2 = vld [vmem:[%s396_s28] ss:$12 sps:$4 sm:$0xff]   ;;  %v3272_v5 = vld [vmem:[%s396_s28 + $0x8] ss:$12 sps:$4 sm:$0xff]  }
  0x3c   : > { %548 = vmatprep.subr.bf16.mxu0 %v3267_v1  ;;  %3183 = vmatprep.subr.bf16.mxu1 %v3267_v1  ;;  %v3270_v3 = vld [vmem:[%s4624_s0] sm:$0xff]   ;;  %v3794_v4 = vld [vmem:[%s4624_s0 + $0x30] sm:$0xff]   ;;  %v3273_v8 = vld [vmem:[%s4624_s0 + $0x8] sm:$0xff]   ;;  %s3987_s13 = ssub.s32 1, %s2706_s14  ;;  %s3990_s29 = smul.u32 7, %s3626_s24  ;;  %v439_v39 = vshrl.u32 %v438_v38, 7 }
  0x3d   : > { %549 = vmatpush1.bf16.msra.mxu0 %v3269_v2  ;;  %3184 = vmatpush1.bf16.msra.mxu1 %v3269_v2  ;;  %v3811_v9 = vld [vmem:[%s4624_s0 + $0x38] sm:$0xff]   ;;  %v3275_v10 = vld [vmem:[%s4624_s0 + $0x10] sm:$0xff]   ;;  %v3286_v19 = vld [vmem:[%s4624_s0 + $0x20] sm:$0xff]   ;;  %s1901_s17 = smul.u32 5, %s3987_s13  ;;  %s2750_s30 = sshll.u32 %s3987_s13, 1 }
  0x3e   : > { %3023 = vmatprep.subr.bf16.mxu0 %v3640_v6  ;;  %3005 = vmatprep.subr.bf16.mxu1 %v3272_v5  ;;  %v3281_v17 = vld [vmem:[%s4624_s0 + $0x18] sm:$0xff]   ;;  %v3289_v25 = vld [vmem:[%s4624_s0 + $0x28] sm:$0xff]   ;;  %v3893_v27 = vld [vmem:[%s3772_s18 + $0x34] ss:$12 sps:$4 sm:$0xff]   ;;  %s2060_s19 = smul.u32 6, %s3987_s13  ;;  %s4006_s7 = sadd.s32 %s2750_s30, %s3990_s29  ;;  %v440_v40 = vsub.s32 0, %v439_v39 }
  0x3f   : > { %v3904_v29 = vld [vmem:[%s3772_s18 + $0x30] ss:$12 sps:$4 sm:$0xff]   ;;  %v3916_v31 = vld [vmem:[%s3772_s18 + $0x18] ss:$12 sps:$4 sm:$0xff]   ;;  %v3931_v34 = vld [vmem:[%s3772_s18] ss:$12 sps:$4 sm:$0xff]   ;;  %s3995_s20 = sadd.s32 %s1901_s17, %s3990_s29  ;;  %s4083_s30 = scalar_lea.vmem %s4606_s4, %s3782_s16 }
  0x40   : > { %2657 = vmatmul.mubr.msk.bf16.vlgmr.msra.gmra.mxu0 %vm509_vm0, %v3270_v3  ;;  %2663 = vmatmul.mubr.msk.bf16.vlgmr.msra.gmra.mxu1 %vm509_vm0, %v3794_v4  ;;  %v3910_v30 = vld [vmem:[%s3772_s18 + $0x1c] ss:$12 sps:$4 sm:$0xff]   ;;  %v3921_v32 = vld [vmem:[%s3772_s18 + $0x4] ss:$12 sps:$4 sm:$0xff]   ;;  %v3937_v35 = vld [vmem:[%s3772_s18 + $0x20] ss:$12 sps:$4 sm:$0xff]   ;;  %s3999_s28 = sadd.s32 %s2060_s19, %s3990_s29 }
  0x41   : > { %576 = vmatprep.mubr.bf16.mxu0 %v3639_v0  ;;  %3006 = vmatpush3.bf16.msra.mxu1 %v3272_v5  ;;  %v3924_v33 = vld [vmem:[%s3772_s18 + $0x38] ss:$12 sps:$4 sm:$0xff]   ;;  %v3945_v36 = vld [vmem:[%s3772_s18 + $0x8] ss:$12 sps:$4 sm:$0xff]   ;;  %s2219_s27 = smul.u32 7, %s3987_s13  ;;  %s2771_s0 = sshll.u32 %s3987_s13, 2 }
  0x42   : > { %636 = vmatprep.mubr.bf16.mxu1 %v3639_v0  ;;  %1125 = vmatprep.subr.bf16.mxu1 %v3803_v7  ;;  %s1583_s8 = smul.u32 3, %s3987_s13  ;;  %s4014_s1 = sadd.s32 %s2771_s0, %s3990_s29  ;;  %v444_v41 = vsub.s32 1, %v439_v39  ;;  %v448_v2 = vsub.s32 2, %v439_v39 }
  0x43   : > { %3024 = vmatpush3.bf16.msra.mxu0 %v3826_v12  ;;  %s4002_s9 = sadd.s32 %s2219_s27, %s3990_s29  ;;  %s3189_s2 = smul.u32 3, %s3782_s16 }
  0x44   : > { %3025 = vmatprep.subr.bf16.mxu0 %v3640_v6  ;;  %s4010_s14 = sadd.s32 %s1583_s8, %s3990_s29  ;;  %s980_s0 = smul.u32 112, %s3626_s24 }
  0x45   : > { %s400_s11 = scalar_lea.vmem %s4605_s3, %s3189_s2  ;;  %s2643_s16 = sshll.u32 %s3768_s15, 6 }
  0x46   : > { %v436_v42 = vld [vmem:[%s400_s11] sm:$0x7]  ;;  %s981_s2 = sshra.s32 %s980_s0, 3  ;;  %s2854_s8 = smul.u32 56, %s3626_s24 }
  0x47   : > { %3026 = vmatpush3.bf16.msra.mxu0 %v3840_v15  ;;  %v4020_v43 = vrot.slane %v436_v42, %v440_v40  ;;  %v4022_v44 = vrot.slane %v436_v42, %v444_v41  ;;  %v4036_v38 = vrot.slane %v436_v42, %v448_v2  ;;  %s2851_s25 = smul.u32 12, %s981_s2  ;;  %s4097_s17 = scalar_lea.vmem [#allocation7], %s2643_s16 }
  0x48   : > { %2658 = vmatmul.mubr.msk.bf16.gmra.mxu0 %vm509_vm0, %v3273_v8  ;;  %2664 = vmatmul.mubr.msk.bf16.gmra.mxu1 %vm509_vm0, %v3811_v9  ;;  %s1263_s0 = scalar_lea.vmem %s4097_s17, %s2854_s8 [#allocation7]  ;;  %s4139_s2 = sadd.s32 %s3987_s13, %s3990_s29 }
  0x49   : > { %586 = vmatprep.mubr.bf16.mxu0 %v3639_v0  ;;  %3007 = vmatprep.mubr.msk.bf16.mxu1 %vm509_vm0, %v3270_v3  ;;  %s4075_s11 = scalar_lea.vmem [#allocation2], %s2851_s25  ;;  %s2740_s25 = sshll.u32 %s4139_s2, 4 }
  0x4a   : > { %3027 = vmatprep.subr.bf16.mxu0 %v3640_v6  ;;  %s2858_s13 = sshll.u32 %s4139_s2, 3  ;;  %s2751_s16 = sshll.u32 %s4006_s7, 4 }
  0x4b   : > { %3028 = vmatpush3.bf16.msra.mxu0 %v3865_v21  ;;  %s1421_s29 = scalar_lea.vmem %s4097_s17, %s2858_s13 [#allocation7]  ;;  %s1427_s8 = sshra.s32 %s2751_s16, 3 }
  0x4c   : > { %3029 = vmatprep.subr.bf16.mxu0 %v3640_v6 }
  0x4f   : > { %3030 = vmatpush3.bf16.msra.mxu0 %v3881_v24 }
  0x50   : > { %2659 = vmatmul.mubr.msk.bf16.gmra.mxu0 %vm509_vm0, %v3275_v10  ;;  %3008 = vmatmul.mubr.msk.bf16.vlgmr.msra.gmra.mxu1 %vm509_vm0, %v3273_v8 }
  0x51   : > { %1126 = vmatpush1.bf16.msra.mxu1 %v3823_v11  ;;  %596 = vmatprep.mubr.bf16.mxu0 %v3639_v0 }
  0x52   : > { %3011 = vmatprep.mubr.msk.bf16.mxu1 %vm509_vm0, %v3275_v10  ;;  %1127 = vmatprep.subr.bf16.mxu1 %v3829_v13 }
  0x53   : > { %3031 = vmatprep.subr.bf16.mxu0 %v3640_v6 }
  0x54   : > { %3032 = vmatpush3.bf16.msra.mxu0 %v3899_v28 }
  0x55   : > { %1128 = vmatpush1.bf16.msra.mxu1 %v3837_v14  ;;  %3033 = vmatprep.subr.bf16.mxu0 %v3640_v6 }
  0x56   : > { %1129 = vmatprep.subr.bf16.mxu1 %v3845_v16 }
  0x58   : > { %2660 = vmatmul.mubr.msk.bf16.gmra.mxu0 %vm509_vm0, %v3281_v17  ;;  %3012 = vmatmul.mubr.msk.bf16.gmra.mxu1 %vm509_vm0, %v3281_v17 }
  0x59   : > { %1130 = vmatpush1.bf16.msra.mxu1 %v3852_v18  ;;  %606 = vmatprep.mubr.bf16.mxu0 %v3639_v0 }
  0x5a   : > { %3015 = vmatprep.mubr.msk.bf16.mxu1 %vm509_vm0, %v3286_v19  ;;  %1131 = vmatprep.subr.bf16.mxu1 %v3862_v20 }
  0x5b   : > { %3034 = vmatpush3.bf16.msra.mxu0 %v3924_v33 }
  0x5c   : > { %3035 = vmatprep.subr.bf16.mxu0 %v3640_v6 }
  0x5d   : > { %1132 = vmatpush1.bf16.msra.mxu1 %v3872_v22 }
  0x5e   : > { %1133 = vmatprep.subr.bf16.mxu1 %v3877_v23 }
  0x5f   : > { %3036 = vmatpush3.bf16.msra.mxu0 %v3937_v35 }
  0x60   : > { %2661 = vmatmul.mubr.msk.bf16.gmra.mxu0 %vm509_vm0, %v3286_v19  ;;  %3016 = vmatmul.mubr.msk.bf16.gmra.mxu1 %vm509_vm0, %v3289_v25 }
  0x61   : > { %1134 = vmatpush1.bf16.msra.mxu1 %v3889_v26  ;;  %616 = vmatprep.mubr.bf16.mxu0 %v3639_v0 }
  0x62   : > { %3019 = vmatprep.mubr.msk.bf16.mxu1 %vm509_vm0, %v3794_v4  ;;  %1135 = vmatprep.subr.bf16.mxu1 %v3893_v27 }
  0x63   : > { %3037 = vmatprep.subr.bf16.mxu0 %v3640_v6 }
  0x64   : > { %3038 = vmatpush3.bf16.msra.mxu0 %v3945_v36 }
  0x65   : > { %1136 = vmatpush1.bf16.msra.mxu1 %v3904_v29  ;;  %3043 = vmatprep.subr.bf16.mxu0 %v3640_v6 }
  0x66   : > { %1137 = vmatprep.subr.bf16.mxu1 %v3910_v30 }
  0x68   : > { %2662 = vmatmul.mubr.msk.bf16.gmra.mxu0 %vm509_vm0, %v3289_v25  ;;  %3020 = vmatmul.mubr.msk.bf16.gmra.mxu1 %vm509_vm0, %v3811_v9 }
  0x69   : > { %1138 = vmatpush1.bf16.msra.mxu1 %v3916_v31  ;;  %1157 = vmatprep.mubr.bf16.mxu1 %v3639_v0 }
  0x6a   : > { %1139 = vmatprep.subr.bf16.mxu1 %v3921_v32  ;;  %3039 = vmatprep.mubr.msk.bf16.mxu0 %vm3641_vm1, %v3640_v6 }
  0x6d   : > { %1140 = vmatpush1.bf16.msra.mxu1 %v3931_v34 }
  0x6e   : > { %1283 = vmatprep.subr.bf16.mxu1 %v3803_v7 }
  0x70   : > { %1158 = vmatmul.mubr.bf16.vlgmr.msra.gmra.mxu1 %v3642_v37  ;;  %3040 = vmatmul.mubr.bf16.vlgmr.msra.gmra.mxu0 %v3642_v37 }
  0x71   : > { %1284 = vmatpush1.bf16.msra.mxu1 %v3823_v11  ;;  %1315 = vmatprep.mubr.bf16.mxu1 %v3639_v0 }
  0x72   : > { %1285 = vmatprep.subr.bf16.mxu1 %v3829_v13  ;;  %3044 = vmatpush3.bf16.msra.mxu0 %v3826_v12 }
  0x73   : > { %3045 = vmatprep.subr.bf16.mxu0 %v3640_v6  ;;  %3059 = vmatprep.mubr.msk.bf16.mxu0 %vm3641_vm1, %v3640_v6 }
  0x75   : > { %1286 = vmatpush1.bf16.msra.mxu1 %v3837_v14 }
  0x76   : > { %1287 = vmatprep.subr.bf16.mxu1 %v3845_v16  ;;  %3046 = vmatpush3.bf16.msra.mxu0 %v3840_v15 }
  0x77   : > { %3047 = vmatprep.subr.bf16.mxu0 %v3640_v6 }
  0x79   : > { %1288 = vmatpush1.bf16.msra.mxu1 %v3852_v18 }
  0x7a   : > { %1289 = vmatprep.subr.bf16.mxu1 %v3862_v20  ;;  %3048 = vmatpush3.bf16.msra.mxu0 %v3865_v21 }
  0x7b   : > { %3049 = vmatprep.subr.bf16.mxu0 %v3640_v6 }
  0x7d   : > { %1290 = vmatpush1.bf16.msra.mxu1 %v3872_v22 }
  0x7e   : > { %1291 = vmatprep.subr.bf16.mxu1 %v3877_v23  ;;  %3050 = vmatpush3.bf16.msra.mxu0 %v3881_v24 }
  0x7f   : > { %3051 = vmatprep.subr.bf16.mxu0 %v3640_v6 }
  0x81   : > { %1292 = vmatpush1.bf16.msra.mxu1 %v3889_v26 }
  0x82   : > { %1293 = vmatprep.subr.bf16.mxu1 %v3893_v27  ;;  %3052 = vmatpush3.bf16.msra.mxu0 %v3899_v28 }
  0x83   : > { %3053 = vmatprep.subr.bf16.mxu0 %v3640_v6 }
  0x85   : > { %1294 = vmatpush1.bf16.msra.mxu1 %v3904_v29 }
  0x86   : > { %1295 = vmatprep.subr.bf16.mxu1 %v3910_v30  ;;  %3054 = vmatpush3.bf16.msra.mxu0 %v3924_v33 }
  0x87   : > { %3055 = vmatprep.subr.bf16.mxu0 %v3640_v6 }
  0x89   : > { %1296 = vmatpush1.bf16.msra.mxu1 %v3916_v31 }
  0x8a   : > { %1297 = vmatprep.subr.bf16.mxu1 %v3921_v32  ;;  %3056 = vmatpush3.bf16.msra.mxu0 %v3937_v35 }
  0x8b   : > { %3057 = vmatprep.subr.bf16.mxu0 %v3640_v6 }
  0x8d   : > { %1298 = vmatpush1.bf16.msra.mxu1 %v3931_v34 }
  0x8e   : > { %1442 = vmatprep.subr.bf16.mxu1 %v3803_v7  ;;  %3058 = vmatpush3.bf16.msra.mxu0 %v3945_v36 }
  0x8f   : > { %3063 = vmatprep.subr.bf16.mxu0 %v3640_v6 }
 0x100   : > { %v568_v45 = vpop.f32.mrf.mxu0  ;;  %v628_v46 = vpop.f32.mrf.mxu1 }
 0x101   : > { %v569_v49 = vadd.f32 %v568_v45, %v4020_v43  ;;  %v629_v50 = vadd.f32 %v628_v46, %v4020_v43 }
 0x102   : > { %v570_v47 = vpop.f32.mrf.mxu0  ;;  %v630_v48 = vpop.f32.mrf.mxu1 }
 0x103   : > { %v571_v51 = vadd.f32 %v570_v47, %v4022_v44  ;;  %v631_v52 = vadd.f32 %v630_v48, %v4022_v44 }
 0x104   : > { %v572_v53 = vpop.f32.mrf.mxu0  ;;  %v632_v54 = vpop.f32.mrf.mxu1 }
 0x105   : > { %v2819_v55 = vpack.c.bf16 %v571_v51, %v569_v49  ;;  %v2843_v56 = vpack.c.bf16 %v631_v52, %v629_v50  ;;  %v573_v59 = vadd.f32 %v572_v53, %v4020_v43  ;;  %v633_v60 = vadd.f32 %v632_v54, %v4020_v43 }
 0x106   : > { %v574_v57 = vpop.f32.mrf.mxu0  ;;  %v634_v58 = vpop.f32.mrf.mxu1 }
 0x107   : > { %904 = vst [vmem:[#allocation2] sm:$0xff] %v2819_v55  ;;  %928 = vst [vmem:[#allocation2 + $0x90] sm:$0xff] %v2843_v56  ;;  %v575_v61 = vadd.f32 %v574_v57, %v4022_v44  ;;  %v635_v62 = vadd.f32 %v634_v58, %v4022_v44 }
 0x108   : > { %v578_v63 = vpop.f32.mrf.mxu0  ;;  %v638_v1 = vpop.f32.mrf.mxu1 }
 0x109   : > { %v2821_v3 = vpack.c.bf16 %v575_v61, %v573_v59  ;;  %v2845_v4 = vpack.c.bf16 %v635_v62, %v633_v60  ;;  %v579_v9 = vadd.f32 %v578_v63, %v4020_v43  ;;  %v639_v10 = vadd.f32 %v638_v1, %v4020_v43 }
 0x10a   : > { %v580_v5 = vpop.f32.mrf.mxu0  ;;  %v640_v8 = vpop.f32.mrf.mxu1 }
 0x10b   : > { %906 = vst [vmem:[#allocation2 + $0xc] sm:$0xff] %v2821_v3  ;;  %930 = vst [vmem:[#allocation2 + $0x9c] sm:$0xff] %v2845_v4  ;;  %v581_v17 = vadd.f32 %v580_v5, %v4022_v44  ;;  %v641_v19 = vadd.f32 %v640_v8, %v4022_v44 }
 0x10c   : > { %v582_v25 = vpop.f32.mrf.mxu0  ;;  %v642_v37 = vpop.f32.mrf.mxu1 }
 0x10d   : > { %v2823_v40 = vpack.c.bf16 %v581_v17, %v579_v9  ;;  %v2847_v39 = vpack.c.bf16 %v641_v19, %v639_v10  ;;  %v583_v46 = vadd.f32 %v582_v25, %v4020_v43  ;;  %v643_v47 = vadd.f32 %v642_v37, %v4020_v43 }
 0x10e   : > { %v584_v41 = vpop.f32.mrf.mxu0  ;;  %v644_v45 = vpop.f32.mrf.mxu1 }
 0x10f   : > { %908 = vst [vmem:[#allocation2 + $0x18] sm:$0xff] %v2823_v40  ;;  %932 = vst [vmem:[#allocation2 + $0xa8] sm:$0xff] %v2847_v39  ;;  %v585_v48 = vadd.f32 %v584_v41, %v4022_v44  ;;  %v645_v49 = vadd.f32 %v644_v45, %v4022_v44 }
 0x110   : > { %v588_v50 = vpop.f32.mrf.mxu0  ;;  %v3009_v51 = vpop.f32.mrf.mxu1 }
 0x111   : > { %v2825_v52 = vpack.c.bf16 %v585_v48, %v583_v46  ;;  %v2849_v53 = vpack.c.bf16 %v645_v49, %v643_v47  ;;  %v690_v42 = vadd.f32 %v3009_v51, %v4036_v38  ;;  %v589_v56 = vadd.f32 %v588_v50, %v4020_v43 }
 0x112   : > { %v590_v54 = vpop.f32.mrf.mxu0  ;;  %v681_v55 = vpop.f32.mrf.mxu1 }
 0x113   : > { %910 = vst [vmem:[#allocation2 + $0x24] sm:$0xff] %v2825_v52  ;;  %934 = vst [vmem:[#allocation2 + $0xb4] sm:$0xff] %v2849_v53  ;;  %v2824_v57 = vpack.c.bf16 %v690_v42, %v690_v42  ;;  %v591_v58 = vadd.f32 %v590_v54, %v4022_v44  ;;  %v682_v59 = vadd.f32 %v681_v55, %v4036_v38 }
 0x114   : > { %v592_v60 = vpop.f32.mrf.mxu0  ;;  %v3010_v61 = vpop.f32.mrf.mxu1 }
 0x115   : > { %909 = vst [vmem:[#allocation2 + $0x20] sm:$0xf] %v2824_v57  ;;  %v2827_v62 = vpack.c.bf16 %v591_v58, %v589_v56  ;;  %v2820_v63 = vpack.c.bf16 %v682_v59, %v682_v59  ;;  %v693_v1 = vadd.f32 %v3010_v61, %v4036_v38  ;;  %v593_v4 = vadd.f32 %v592_v60, %v4020_v43 }
 0x116   : > { %v594_v2 = vpop.f32.mrf.mxu0  ;;  %v684_v3 = vpop.f32.mrf.mxu1 }
 0x117   : > { %912 = vst [vmem:[#allocation2 + $0x30] sm:$0xff] %v2827_v62  ;;  %905 = vst [vmem:[#allocation2 + $0x8] sm:$0xf] %v2820_v63  ;;  %v2826_v5 = vpack.c.bf16 %v693_v1, %v693_v1  ;;  %v595_v8 = vadd.f32 %v594_v2, %v4022_v44  ;;  %v685_v9 = vadd.f32 %v684_v3, %v4036_v38 }
 0x118   : > { %v598_v10 = vpop.f32.mrf.mxu0  ;;  %v3013_v17 = vpop.f32.mrf.mxu1 }
 0x119   : > { %911 = vst [vmem:[#allocation2 + $0x2c] sm:$0xf] %v2826_v5  ;;  %v2829_v19 = vpack.c.bf16 %v595_v8, %v593_v4  ;;  %v2822_v25 = vpack.c.bf16 %v685_v9, %v685_v9  ;;  %v706_v37 = vadd.f32 %v3013_v17, %v4036_v38  ;;  %v599_v41 = vadd.f32 %v598_v10, %v4020_v43 }
 0x11a   : > { %v600_v40 = vpop.f32.mrf.mxu0  ;;  %v697_v39 = vpop.f32.mrf.mxu1 }
 0x11b   : > { %914 = vst [vmem:[#allocation2 + $0x3c] sm:$0xff] %v2829_v19  ;;  %907 = vst [vmem:[#allocation2 + $0x14] sm:$0xf] %v2822_v25  ;;  %v2832_v45 = vpack.c.bf16 %v706_v37, %v706_v37  ;;  %v601_v46 = vadd.f32 %v600_v40, %v4022_v44  ;;  %v698_v47 = vadd.f32 %v697_v39, %v4036_v38 }
 0x11c   : > { %v602_v48 = vpop.f32.mrf.mxu0  ;;  %v3014_v49 = vpop.f32.mrf.mxu1 }
 0x11d   : > { %917 = vst [vmem:[#allocation2 + $0x50] sm:$0xf] %v2832_v45  ;;  %v2831_v50 = vpack.c.bf16 %v601_v46, %v599_v41  ;;  %v2828_v51 = vpack.c.bf16 %v698_v47, %v698_v47  ;;  %v709_v52 = vadd.f32 %v3014_v49, %v4036_v38  ;;  %v603_v54 = vadd.f32 %v602_v48, %v4020_v43 }
 0x11e   : > { %v604_v53 = vpop.f32.mrf.mxu0  ;;  %v700_v42 = vpop.f32.mrf.mxu1 }
 0x11f   : > { %916 = vst [vmem:[#allocation2 + $0x48] sm:$0xff] %v2831_v50  ;;  %913 = vst [vmem:[#allocation2 + $0x38] sm:$0xf] %v2828_v51  ;;  %v2834_v55 = vpack.c.bf16 %v709_v52, %v709_v52  ;;  %v605_v56 = vadd.f32 %v604_v53, %v4022_v44  ;;  %v701_v57 = vadd.f32 %v700_v42, %v4036_v38 }
 0x120   : > { %v608_v58 = vpop.f32.mrf.mxu0  ;;  %v3017_v59 = vpop.f32.mrf.mxu1 }
 0x121   : > { %919 = vst [vmem:[#allocation2 + $0x5c] sm:$0xf] %v2834_v55  ;;  %v2833_v60 = vpack.c.bf16 %v605_v56, %v603_v54  ;;  %v2830_v61 = vpack.c.bf16 %v701_v57, %v701_v57  ;;  %v722_v62 = vadd.f32 %v3017_v59, %v4036_v38  ;;  %v609_v2 = vadd.f32 %v608_v58, %v4020_v43 }
 0x122   : > { %v610_v63 = vpop.f32.mrf.mxu0  ;;  %v713_v1 = vpop.f32.mrf.mxu1 }
 0x123   : > { %918 = vst [vmem:[#allocation2 + $0x54] sm:$0xff] %v2833_v60  ;;  %915 = vst [vmem:[#allocation2 + $0x44] sm:$0xf] %v2830_v61  ;;  %v2840_v3 = vpack.c.bf16 %v722_v62, %v722_v62  ;;  %v611_v4 = vadd.f32 %v610_v63, %v4022_v44  ;;  %v714_v5 = vadd.f32 %v713_v1, %v4036_v38 }
 0x124   : > { %v612_v8 = vpop.f32.mrf.mxu0  ;;  %v3018_v9 = vpop.f32.mrf.mxu1 }
 0x125   : > { %925 = vst [vmem:[#allocation2 + $0x80] sm:$0xf] %v2840_v3  ;;  %v2835_v10 = vpack.c.bf16 %v611_v4, %v609_v2  ;;  %v2836_v17 = vpack.c.bf16 %v714_v5, %v714_v5  ;;  %v725_v19 = vadd.f32 %v3018_v9, %v4036_v38  ;;  %v613_v40 = vadd.f32 %v612_v8, %v4020_v43 }
 0x126   : > { %v614_v25 = vpop.f32.mrf.mxu0  ;;  %v716_v37 = vpop.f32.mrf.mxu1 }
 0x127   : > { %920 = vst [vmem:[#allocation2 + $0x60] sm:$0xff] %v2835_v10  ;;  %921 = vst [vmem:[#allocation2 + $0x68] sm:$0xf] %v2836_v17  ;;  %v2842_v39 = vpack.c.bf16 %v725_v19, %v725_v19  ;;  %v615_v41 = vadd.f32 %v614_v25, %v4022_v44  ;;  %v717_v45 = vadd.f32 %v716_v37, %v4036_v38 }
 0x128   : > { %v618_v46 = vpop.f32.mrf.mxu0  ;;  %v3021_v47 = vpop.f32.mrf.mxu1 }
 0x129   : > { %927 = vst [vmem:[#allocation2 + $0x8c] sm:$0xf] %v2842_v39  ;;  %v2837_v48 = vpack.c.bf16 %v615_v41, %v613_v40  ;;  %v2838_v49 = vpack.c.bf16 %v717_v45, %v717_v45  ;;  %v738_v50 = vadd.f32 %v3021_v47, %v4036_v38  ;;  %v619_v53 = vadd.f32 %v618_v46, %v4020_v43 }
 0x12a   : > { %v620_v51 = vpop.f32.mrf.mxu0  ;;  %v729_v52 = vpop.f32.mrf.mxu1 }
 0x12b   : > { %922 = vst [vmem:[#allocation2 + $0x6c] sm:$0xff] %v2837_v48  ;;  %923 = vst [vmem:[#allocation2 + $0x74] sm:$0xf] %v2838_v49  ;;  %v2848_v42 = vpack.c.bf16 %v738_v50, %v738_v50  ;;  %v621_v54 = vadd.f32 %v620_v51, %v4022_v44  ;;  %v730_v55 = vadd.f32 %v729_v52, %v4036_v38 }
 0x12c   : > { %v622_v56 = vpop.f32.mrf.mxu0  ;;  %v3022_v57 = vpop.f32.mrf.mxu1 }
 0x12d   : > { %933 = vst [vmem:[#allocation2 + $0xb0] sm:$0xf] %v2848_v42  ;;  %v2839_v58 = vpack.c.bf16 %v621_v54, %v619_v53  ;;  %v2844_v59 = vpack.c.bf16 %v730_v55, %v730_v55  ;;  %v741_v60 = vadd.f32 %v3022_v57, %v4036_v38  ;;  %v623_v63 = vadd.f32 %v622_v56, %v4020_v43 }
 0x12e   : > { %v624_v61 = vpop.f32.mrf.mxu0  ;;  %v732_v62 = vpop.f32.mrf.mxu1 }
 0x12f   : > { %924 = vst [vmem:[#allocation2 + $0x78] sm:$0xff] %v2839_v58  ;;  %929 = vst [vmem:[#allocation2 + $0x98] sm:$0xf] %v2844_v59  ;;  %v2850_v1 = vpack.c.bf16 %v741_v60, %v741_v60  ;;  %v625_v2 = vadd.f32 %v624_v61, %v4022_v44  ;;  %v733_v3 = vadd.f32 %v732_v62, %v4036_v38  ;;  %v4086_v59 = vld [vmem:[%s4083_s30] ss:$0 sm:$0xff] }
 0x130   : > { %v1159_v8 = vpop.f32.mrf.mxu1  ;;  %v1202_v9 = vpop.f32.mrf.mxu0 }
 0x131   : > { %935 = vst [vmem:[#allocation2 + $0xbc] sm:$0xf] %v2850_v1  ;;  %v2841_v4 = vpack.c.bf16 %v625_v2, %v623_v63  ;;  %v2846_v5 = vpack.c.bf16 %v733_v3, %v733_v3  ;;  %v1237_v63 = vadd.f32 %v4086_v59, %v1202_v9 }
 0x132   : > { %v3041_v10 = vpop.f32.mrf.mxu0  ;;  %v1161_v17 = vpop.f32.mrf.mxu1 }
 0x133   : > { %926 = vst [vmem:[#allocation2 + $0x84] sm:$0xff] %v2841_v4  ;;  %931 = vst [vmem:[#allocation2 + $0xa4] sm:$0xf] %v2846_v5 }
 0x134   : > { %v1205_v19 = vpop.f32.mrf.mxu0  ;;  %v1163_v40 = vpop.f32.mrf.mxu1 }
 0x135   : > { %v1238_v4 = vadd.f32 %v4086_v59, %v1205_v19 }
 0x136   : > { %v3042_v37 = vpop.f32.mrf.mxu0  ;;  %v1165_v50 = vpop.f32.mrf.mxu1 }
 0x13a   : > { %v986_v43 = vld [vmem:[%s4075_s11] sm:$0xff]  ;;  %v988_v44 = vld [vmem:[%s4075_s11 + $0xc] sm:$0xff]  ;;  %v987_v61 = vld [vmem:[%s4075_s11 + $0x8] ss:$12 sps:$4 sm:$0xff]   ;;  %s1268_s11 = sshra.s32 %s2740_s25, 3  ;;  %s2862_s25 = sshll.u32 %s4006_s7, 3 }
 0x13b   : > { %v990_v25 = vunpack.c.l.bf16 %v986_v43  ;;  %v993_v38 = vunpack.c.l.bf16 %v988_v44  ;;  %v991_v46 = vunpack.c.h.bf16 %v986_v43  ;;  %v994_v48 = vunpack.c.h.bf16 %v988_v44  ;;  %s2855_s19 = smul.u32 12, %s1268_s11  ;;  %s1580_s11 = scalar_lea.vmem %s4097_s17, %s2862_s25 [#allocation7] }
 0x13c   : > { %v992_v2 = vunpack.c.l.bf16 %v987_v61  ;;  %v995_v10 = vunpack.c.h.bf16 %v987_v61  ;;  %s2761_s7 = sshll.u32 %s4010_s14, 4 }
 0x13d   : > { %v1209_v39 = vadd.f32 %v1159_v8, %v990_v25  ;;  %v1210_v41 = vadd.f32 %v1163_v40, %v993_v38  ;;  %v1223_v49 = vadd.f32 %v1161_v17, %v991_v46  ;;  %v1224_v51 = vadd.f32 %v1165_v50, %v994_v48  ;;  %s4142_s27 = scalar_lea.vmem [#allocation2], %s2855_s19  ;;  %s1586_s19 = sshra.s32 %s2761_s7, 3 }
 0x13f   : > { %v2732_v45 = vmul.f32 -1.442695, %v1209_v39  ;;  %v2733_v47 = vmul.f32 -1.442695, %v1210_v41  ;;  %v2734_v52 = vmul.f32 -1.442695, %v1223_v49 }
 0x140   : > { %v2735_v53 = vmul.f32 -1.442695, %v1224_v51  ;;  %v1273_v49 = vld [vmem:[%s4142_s27] sm:$0xff] }
 0x141   : > { %3311 = vpow2.f32 %v2732_v45  ;;  %v1277_v50 = vunpack.c.l.bf16 %v1273_v49 }
 0x142   : > { %3313 = vpow2.f32 %v2733_v47 }
 0x143   : > { %3315 = vpow2.f32 %v2734_v52 }
 0x144   : > { %3317 = vpow2.f32 %v2735_v53  ;;  %v1275_v53 = vld [vmem:[%s4142_s27 + $0xc] sm:$0xff] }
 0x14e   : > { %v3312_v42 = vpop.eup %3311 }
 0x14f   : > { %v1217_v54 = vadd.f32 1.0, %v3312_v42  ;;  %v3314_v55 = vpop.eup %3313 }
 0x150   : > { %v1218_v56 = vadd.f32 1.0, %v3314_v55  ;;  %v3316_v57 = vpop.eup %3315 }
 0x151   : > { %3319 = vrcp.f32 %v1217_v54  ;;  %v3318_v58 = vpop.eup %3317  ;;  %v1231_v60 = vadd.f32 1.0, %v3316_v57 }
 0x152   : > { %3321 = vrcp.f32 %v1218_v56  ;;  %v1232_v62 = vadd.f32 1.0, %v3318_v58  ;;  %v1280_v56 = vunpack.c.l.bf16 %v1275_v53 }
 0x153   : > { %3323 = vrcp.f32 %v1231_v60 }
 0x154   : > { %3325 = vrcp.f32 %v1232_v62  ;;  %v1278_v62 = vunpack.c.h.bf16 %v1273_v49 }
 0x15e   : > { %v3320_v1 = vpop.eup %3319 }
 0x15f   : > { %v1239_v3 = vmul.f32 %v3320_v1, %v1237_v63  ;;  %v3322_v5 = vpop.eup %3321 }
 0x160   : > { %v1240_v17 = vmul.f32 %v3322_v5, %v1238_v4  ;;  %v3324_v44 = vpop.eup %3323 }
 0x161   : > { %v1241_v8 = vadd.f32 %v1239_v3, %v992_v2  ;;  %v3326_v25 = vpop.eup %3325  ;;  %v1245_v38 = vsub.f32 1.0, %v3324_v44  ;;  %v1249_v39 = vmul.f32 0.0, %v3324_v44  ;;  %v1281_v2 = vunpack.c.h.bf16 %v1275_v53 }
 0x162   : > { %v1242_v43 = vadd.f32 %v1240_v17, %v995_v10  ;;  %v1246_v37 = vsub.f32 1.0, %v3326_v25  ;;  %v1250_v45 = vmul.f32 0.0, %v3326_v25 }
 0x163   : > { %3327 = vtanh.f32 %v1241_v8 }
 0x164   : > { %3329 = vtanh.f32 %v1242_v43 }
 0x170   : > { %v3328_v9 = vpop.eup %3327 }
 0x171   : > { %v1247_v40 = vmul.f32 %v3328_v9, %v1245_v38  ;;  %v3330_v41 = vpop.eup %3329  ;;  %v1274_v9 = vld [vmem:[%s4142_s27 + $0x8] ss:$12 sps:$4 sm:$0xff]   ;;  %s2863_s27 = smul.u32 12, %s1586_s19 }
 0x172   : > { %v1248_v19 = vmul.f32 %v3330_v41, %v1246_v37 }
 0x173   : > { %v4093_v46 = vadd.f32 %v1249_v39, %v1247_v40  ;;  %s4320_s13 = scalar_lea.vmem [#allocation2], %s2863_s27 }
 0x174   : > { %v4095_v47 = vadd.f32 %v1250_v45, %v1248_v19  ;;  %v1279_v19 = vunpack.c.l.bf16 %v1274_v9 }
 0x176   : > { %v1253_v48 = vpack.c.bf16 %v4095_v47, %v4093_v46 }
 0x178   : > { %2888 = vst [vmem:[%s1263_s0] sm:$0xff] %v1253_v48   ;;  %1316 = vmatmul.mubr.bf16.vlgmr.msra.gmra.mxu1 %v1253_v48  ;;  %3060 = vmatmul.mubr.bf16.vlgmr.msra.gmra.mxu0 %v1253_v48  ;;  %s2859_s0 = smul.u32 12, %s1427_s8 }
 0x179   : > { %1443 = vmatpush1.bf16.msra.mxu1 %v3823_v11  ;;  %3064 = vmatpush3.bf16.msra.mxu0 %v3826_v12 }
 0x17a   : > { %1444 = vmatprep.subr.bf16.mxu1 %v3829_v13  ;;  %3065 = vmatprep.subr.bf16.mxu0 %v3640_v6  ;;  %s4198_s2 = scalar_lea.vmem [#allocation2], %s2859_s0 }
 0x17b   : > { %1474 = vmatprep.mubr.bf16.mxu1 %v3639_v0  ;;  %3079 = vmatprep.mubr.msk.bf16.mxu0 %vm3641_vm1, %v3640_v6 }
 0x17d   : > { %1445 = vmatpush1.bf16.msra.mxu1 %v3837_v14  ;;  %3066 = vmatpush3.bf16.msra.mxu0 %v3840_v15 }
 0x17e   : > { %1446 = vmatprep.subr.bf16.mxu1 %v3845_v16  ;;  %3067 = vmatprep.subr.bf16.mxu0 %v3640_v6 }
 0x181   : > { %1447 = vmatpush1.bf16.msra.mxu1 %v3852_v18  ;;  %3068 = vmatpush3.bf16.msra.mxu0 %v3865_v21 }
 0x182   : > { %1448 = vmatprep.subr.bf16.mxu1 %v3862_v20  ;;  %3069 = vmatprep.subr.bf16.mxu0 %v3640_v6 }
 0x185   : > { %1449 = vmatpush1.bf16.msra.mxu1 %v3872_v22  ;;  %3070 = vmatpush3.bf16.msra.mxu0 %v3881_v24 }
 0x186   : > { %1450 = vmatprep.subr.bf16.mxu1 %v3877_v23  ;;  %3071 = vmatprep.subr.bf16.mxu0 %v3640_v6 }
 0x189   : > { %1451 = vmatpush1.bf16.msra.mxu1 %v3889_v26  ;;  %3072 = vmatpush3.bf16.msra.mxu0 %v3899_v28 }
 0x18a   : > { %1452 = vmatprep.subr.bf16.mxu1 %v3893_v27  ;;  %3073 = vmatprep.subr.bf16.mxu0 %v3640_v6 }
 0x18d   : > { %1453 = vmatpush1.bf16.msra.mxu1 %v3904_v29  ;;  %3074 = vmatpush3.bf16.msra.mxu0 %v3924_v33 }
 0x18e   : > { %1454 = vmatprep.subr.bf16.mxu1 %v3910_v30  ;;  %3075 = vmatprep.subr.bf16.mxu0 %v3640_v6 }
 0x191   : > { %1455 = vmatpush1.bf16.msra.mxu1 %v3916_v31  ;;  %3076 = vmatpush3.bf16.msra.mxu0 %v3937_v35 }
 0x192   : > { %1456 = vmatprep.subr.bf16.mxu1 %v3921_v32  ;;  %3077 = vmatprep.subr.bf16.mxu0 %v3640_v6 }
 0x195   : > { %1457 = vmatpush1.bf16.msra.mxu1 %v3931_v34  ;;  %3078 = vmatpush3.bf16.msra.mxu0 %v3945_v36 }
 0x196   : > { %1601 = vmatprep.subr.bf16.mxu1 %v3803_v7  ;;  %3083 = vmatprep.subr.bf16.mxu0 %v3640_v6 }
 0x238   : > { %v1317_v51 = vpop.f32.mrf.mxu1  ;;  %v1360_v52 = vpop.f32.mrf.mxu0 }
 0x239   : > { %v1367_v42 = vadd.f32 %v1317_v51, %v1277_v50  ;;  %v1395_v37 = vadd.f32 %v4086_v59, %v1360_v52  ;;  %v1282_v51 = vunpack.c.h.bf16 %v1274_v9 }
 0x23a   : > { %v1319_v54 = vpop.f32.mrf.mxu1  ;;  %v3061_v7 = vpop.f32.mrf.mxu0 }
 0x23b   : > { %v2742_v55 = vmul.f32 -1.442695, %v1367_v42  ;;  %v1381_v3 = vadd.f32 %v1319_v54, %v1278_v62 }
 0x23c   : > { %v1321_v57 = vpop.f32.mrf.mxu1  ;;  %v1363_v58 = vpop.f32.mrf.mxu0 }
 0x23d   : > { %3331 = vpow2.f32 %v2742_v55  ;;  %v1368_v60 = vadd.f32 %v1321_v57, %v1280_v56  ;;  %v2744_v5 = vmul.f32 -1.442695, %v1381_v3  ;;  %v1396_v49 = vadd.f32 %v4086_v59, %v1363_v58 }
 0x23e   : > { %v3062_v61 = vpop.f32.mrf.mxu0  ;;  %v1323_v1 = vpop.f32.mrf.mxu1 }
 0x23f   : > { %v2743_v63 = vmul.f32 -1.442695, %v1368_v60  ;;  %v1382_v4 = vadd.f32 %v1323_v1, %v1281_v2 }
 0x241   : > { %3333 = vpow2.f32 %v2743_v63  ;;  %v2745_v8 = vmul.f32 -1.442695, %v1382_v4 }
 0x242   : > { %3335 = vpow2.f32 %v2744_v5 }
 0x243   : > { %3337 = vpow2.f32 %v2745_v8 }
 0x24a   : > { %v3332_v10 = vpop.eup %3331 }
 0x24b   : > { %v1375_v17 = vadd.f32 1.0, %v3332_v10  ;;  %v1433_v10 = vld [vmem:[%s4198_s2 + $0x8] ss:$12 sps:$4 sm:$0xff]  }
 0x24d   : > { %3339 = vrcp.f32 %v1375_v17 }
 0x24e   : > { %v3334_v43 = vpop.eup %3333 }
 0x24f   : > { %v1376_v44 = vadd.f32 1.0, %v3334_v43  ;;  %v3336_v25 = vpop.eup %3335 }
 0x250   : > { %v3338_v38 = vpop.eup %3337  ;;  %v1389_v40 = vadd.f32 1.0, %v3336_v25 }
 0x251   : > { %3341 = vrcp.f32 %v1376_v44  ;;  %v1390_v41 = vadd.f32 1.0, %v3338_v38  ;;  %v1438_v38 = vunpack.c.l.bf16 %v1433_v10 }
 0x252   : > { %3343 = vrcp.f32 %v1389_v40 }
 0x253   : > { %3345 = vrcp.f32 %v1390_v41  ;;  %v1441_v41 = vunpack.c.h.bf16 %v1433_v10 }
 0x25a   : > { %v3340_v39 = vpop.eup %3339 }
 0x25b   : > { %v1397_v45 = vmul.f32 %v3340_v39, %v1395_v37 }
 0x25d   : > { %v1399_v48 = vadd.f32 %v1397_v45, %v1279_v19 }
 0x25e   : > { %v3342_v50 = vpop.eup %3341 }
 0x25f   : > { %3347 = vtanh.f32 %v1399_v48  ;;  %v1398_v53 = vmul.f32 %v3342_v50, %v1396_v49  ;;  %v3344_v54 = vpop.eup %3343 }
 0x260   : > { %v3346_v52 = vpop.eup %3345  ;;  %v1403_v55 = vsub.f32 1.0, %v3344_v54  ;;  %v1407_v62 = vmul.f32 %v3344_v54, %v4093_v46 }
 0x261   : > { %v1400_v42 = vadd.f32 %v1398_v53, %v1282_v51  ;;  %v1404_v56 = vsub.f32 1.0, %v3346_v52  ;;  %v1408_v58 = vmul.f32 %v3346_v52, %v4095_v47 }
 0x263   : > { %3349 = vtanh.f32 %v1400_v42 }
 0x26c   : > { %v3348_v7 = vpop.eup %3347 }
 0x26d   : > { %v1405_v57 = vmul.f32 %v3348_v7, %v1403_v55 }
 0x26f   : > { %v4152_v63 = vadd.f32 %v1407_v62, %v1405_v57  ;;  %v4220_v62 = vld [vmem:[%s3772_s18 + $0xb0] ss:$12 sps:$4 sm:$0xff]  }
 0x270   : > { %v3350_v60 = vpop.eup %3349 }
 0x271   : > { %v1406_v61 = vmul.f32 %v3350_v60, %v1404_v56 }
 0x273   : > { %v4154_v1 = vadd.f32 %v1408_v58, %v1406_v61  ;;  %v4216_v61 = vld [vmem:[%s3772_s18 + $0xa8] ss:$12 sps:$4 sm:$0xff]  }
 0x274   : > { %v4224_v58 = vld [vmem:[%s3772_s18 + $0x94] ss:$12 sps:$4 sm:$0xff]  }
 0x275   : > { %v1411_v2 = vpack.c.bf16 %v4154_v1, %v4152_v63 }
 0x277   : > { %2893 = vst [vmem:[%s1421_s29] sm:$0xff] %v1411_v2   ;;  %1475 = vmatmul.mubr.bf16.vlgmr.msra.gmra.mxu1 %v1411_v2  ;;  %3080 = vmatmul.mubr.bf16.vlgmr.msra.gmra.mxu0 %v1411_v2  ;;  %v4240_v2 = vld [vmem:[%s3772_s18 + $0x7c] ss:$12 sps:$4 sm:$0xff]  }
 0x278   : > { %1602 = vmatpush1.bf16.msra.mxu1 %v3823_v11  ;;  %3084 = vmatpush3.bf16.msra.mxu0 %v3826_v12  ;;  %v4193_v11 = vld [vmem:[%s3772_s18 + $0xac] ss:$12 sps:$4 sm:$0xff]   ;;  %v1432_v12 = vld [vmem:[%s4198_s2] sm:$0xff] }
 0x279   : > { %1603 = vmatprep.subr.bf16.mxu1 %v3829_v13  ;;  %3085 = vmatprep.subr.bf16.mxu0 %v3640_v6  ;;  %v1436_v13 = vunpack.c.l.bf16 %v1432_v12 }
 0x27a   : > { %1633 = vmatprep.mubr.bf16.mxu1 %v3639_v0  ;;  %3099 = vmatprep.mubr.msk.bf16.mxu0 %vm3641_vm1, %v3640_v6 }
 0x27c   : > { %1604 = vmatpush1.bf16.msra.mxu1 %v3837_v14  ;;  %3086 = vmatpush3.bf16.msra.mxu0 %v3840_v15 }
 0x27d   : > { %1605 = vmatprep.subr.bf16.mxu1 %v3845_v16  ;;  %3087 = vmatprep.subr.bf16.mxu0 %v3640_v6  ;;  %v1434_v16 = vld [vmem:[%s4198_s2 + $0xc] sm:$0xff]  ;;  %s2870_s2 = sshll.u32 %s4014_s1, 3 }
 0x27e   : > { %s1898_s25 = scalar_lea.vmem %s4097_s17, %s2870_s2 [#allocation7] }
 0x280   : > { %1606 = vmatpush1.bf16.msra.mxu1 %v3852_v18  ;;  %3088 = vmatpush3.bf16.msra.mxu0 %v3865_v21 }
 0x281   : > { %1607 = vmatprep.subr.bf16.mxu1 %v3862_v20  ;;  %3089 = vmatprep.subr.bf16.mxu0 %v3640_v6 }
 0x284   : > { %1608 = vmatpush1.bf16.msra.mxu1 %v3872_v22  ;;  %3090 = vmatpush3.bf16.msra.mxu0 %v3881_v24 }
 0x285   : > { %1609 = vmatprep.subr.bf16.mxu1 %v3877_v23  ;;  %3091 = vmatprep.subr.bf16.mxu0 %v3640_v6  ;;  %v1439_v23 = vunpack.c.l.bf16 %v1434_v16 }
 0x288   : > { %1610 = vmatpush1.bf16.msra.mxu1 %v3889_v26  ;;  %3092 = vmatpush3.bf16.msra.mxu0 %v3899_v28 }
 0x289   : > { %1611 = vmatprep.subr.bf16.mxu1 %v3893_v27  ;;  %3093 = vmatprep.subr.bf16.mxu0 %v3640_v6 }
 0x28c   : > { %1612 = vmatpush1.bf16.msra.mxu1 %v3904_v29  ;;  %3094 = vmatpush3.bf16.msra.mxu0 %v3924_v33  ;;  %v1437_v29 = vunpack.c.h.bf16 %v1432_v12  ;;  %v4245_v12 = vld [vmem:[%s3772_s18 + $0x78] ss:$12 sps:$4 sm:$0xff]  }
 0x28d   : > { %1613 = vmatprep.subr.bf16.mxu1 %v3910_v30  ;;  %3095 = vmatprep.subr.bf16.mxu0 %v3640_v6 }
 0x290   : > { %1614 = vmatpush1.bf16.msra.mxu1 %v3916_v31  ;;  %3096 = vmatpush3.bf16.msra.mxu0 %v3937_v35 }
 0x291   : > { %1615 = vmatprep.subr.bf16.mxu1 %v3921_v32  ;;  %3097 = vmatprep.subr.bf16.mxu0 %v3640_v6  ;;  %v1440_v32 = vunpack.c.h.bf16 %v1434_v16  ;;  %v4262_v16 = vld [vmem:[%s3772_s18 + $0x68] ss:$12 sps:$4 sm:$0xff]  }
 0x294   : > { %1616 = vmatpush1.bf16.msra.mxu1 %v3931_v34  ;;  %3098 = vmatpush3.bf16.msra.mxu0 %v3945_v36 }
 0x295   : > { %1760 = vmatprep.subr.bf16.mxu1 %v4193_v11  ;;  %3103 = vmatprep.subr.bf16.mxu0 %v3640_v6 }
 0x337   : > { %v1476_v14 = vpop.f32.mrf.mxu1  ;;  %v1519_v15 = vpop.f32.mrf.mxu0 }
 0x338   : > { %v1526_v18 = vadd.f32 %v1476_v14, %v1436_v13  ;;  %v1554_v17 = vadd.f32 %v4086_v59, %v1519_v15  ;;  %v4249_v13 = vld [vmem:[%s3772_s18 + $0x80] ss:$12 sps:$4 sm:$0xff]   ;;  %v4253_v14 = vld [vmem:[%s3772_s18 + $0x64] ss:$12 sps:$4 sm:$0xff]  }
 0x339   : > { %v1478_v20 = vpop.f32.mrf.mxu1  ;;  %v3081_v21 = vpop.f32.mrf.mxu0  ;;  %v4258_v15 = vld [vmem:[%s3772_s18 + $0x60] ss:$12 sps:$4 sm:$0xff]  }
 0x33a   : > { %v2753_v22 = vmul.f32 -1.442695, %v1526_v18  ;;  %v1540_v33 = vadd.f32 %v1478_v20, %v1437_v29  ;;  %v4266_v18 = vld [vmem:[%s3772_s18 + $0x4c] ss:$12 sps:$4 sm:$0xff]   ;;  %v4271_v20 = vld [vmem:[%s3772_s18 + $0x48] ss:$12 sps:$4 sm:$0xff]  }
 0x33b   : > { %v1480_v24 = vpop.f32.mrf.mxu1  ;;  %v1522_v26 = vpop.f32.mrf.mxu0  ;;  %v4275_v21 = vld [vmem:[%s3772_s18 + $0x50] ss:$12 sps:$4 sm:$0xff]  }
 0x33c   : > { %3351 = vpow2.f32 %v2753_v22  ;;  %v1527_v27 = vadd.f32 %v1480_v24, %v1439_v23  ;;  %v2755_v35 = vmul.f32 -1.442695, %v1540_v33  ;;  %v1555_v40 = vadd.f32 %v4086_v59, %v1522_v26  ;;  %v4279_v22 = vld [vmem:[%s3772_s18 + $0x34] ss:$12 sps:$4 sm:$0xff]   ;;  %v4284_v23 = vld [vmem:[%s3772_s18 + $0x30] ss:$12 sps:$4 sm:$0xff]  }
 0x33d   : > { %v3082_v28 = vpop.f32.mrf.mxu0  ;;  %v1482_v31 = vpop.f32.mrf.mxu1  ;;  %v4288_v24 = vld [vmem:[%s3772_s18 + $0x38] ss:$12 sps:$4 sm:$0xff]   ;;  %v4292_v26 = vld [vmem:[%s3772_s18 + $0x1c] ss:$12 sps:$4 sm:$0xff]  }
 0x33e   : > { %v2754_v30 = vmul.f32 -1.442695, %v1527_v27  ;;  %v1541_v34 = vadd.f32 %v1482_v31, %v1440_v32  ;;  %v4297_v27 = vld [vmem:[%s3772_s18 + $0x18] ss:$12 sps:$4 sm:$0xff]   ;;  %v4301_v28 = vld [vmem:[%s3772_s18 + $0x20] ss:$12 sps:$4 sm:$0xff]  }
 0x33f   : > { %v4305_v29 = vld [vmem:[%s3772_s18 + $0x4] ss:$12 sps:$4 sm:$0xff]   ;;  %v4314_v31 = vld [vmem:[%s3772_s18 + $0x8] ss:$12 sps:$4 sm:$0xff]  }
 0x340   : > { %3353 = vpow2.f32 %v2754_v30  ;;  %v2756_v36 = vmul.f32 -1.442695, %v1541_v34  ;;  %v4310_v30 = vld [vmem:[%s3772_s18] ss:$12 sps:$4 sm:$0xff]  }
 0x341   : > { %3355 = vpow2.f32 %v2755_v35  ;;  %v1591_v32 = vld [vmem:[%s4320_s13] sm:$0xff] }
 0x342   : > { %3357 = vpow2.f32 %v2756_v36  ;;  %v1595_v33 = vunpack.c.l.bf16 %v1591_v32  ;;  %v1593_v36 = vld [vmem:[%s4320_s13 + $0xc] sm:$0xff] }
 0x349   : > { %v3352_v46 = vpop.eup %3351 }
 0x34a   : > { %v1534_v47 = vadd.f32 1.0, %v3352_v46 }
 0x34c   : > { %3359 = vrcp.f32 %v1534_v47 }
 0x34d   : > { %v3354_v3 = vpop.eup %3353 }
 0x34e   : > { %v1535_v4 = vadd.f32 1.0, %v3354_v3  ;;  %v3356_v5 = vpop.eup %3355 }
 0x34f   : > { %v3358_v8 = vpop.eup %3357  ;;  %v1548_v43 = vadd.f32 1.0, %v3356_v5  ;;  %v1598_v5 = vunpack.c.l.bf16 %v1593_v36 }
 0x350   : > { %3361 = vrcp.f32 %v1535_v4  ;;  %v1549_v25 = vadd.f32 1.0, %v3358_v8 }
 0x351   : > { %3363 = vrcp.f32 %v1548_v43 }
 0x352   : > { %3365 = vrcp.f32 %v1549_v25 }
 0x359   : > { %v3360_v44 = vpop.eup %3359 }
 0x35a   : > { %v1556_v9 = vmul.f32 %v3360_v44, %v1554_v17  ;;  %v1596_v44 = vunpack.c.h.bf16 %v1591_v32 }
 0x35c   : > { %v1558_v37 = vadd.f32 %v1556_v9, %v1438_v38  ;;  %v1599_v9 = vunpack.c.h.bf16 %v1593_v36 }
 0x35d   : > { %v3362_v39 = vpop.eup %3361 }
 0x35e   : > { %3367 = vtanh.f32 %v1558_v37  ;;  %v1557_v19 = vmul.f32 %v3362_v39, %v1555_v40  ;;  %v3364_v48 = vpop.eup %3363 }
 0x35f   : > { %v3366_v49 = vpop.eup %3365  ;;  %v1562_v51 = vsub.f32 1.0, %v3364_v48  ;;  %v1566_v7 = vmul.f32 %v3364_v48, %v4152_v63  ;;  %v4232_v63 = vld [vmem:[%s3772_s18 + $0x90] ss:$12 sps:$4 sm:$0xff]  }
 0x360   : > { %v1559_v45 = vadd.f32 %v1557_v19, %v1441_v41  ;;  %v1563_v53 = vsub.f32 1.0, %v3366_v49  ;;  %v1567_v55 = vmul.f32 %v3366_v49, %v4154_v1  ;;  %v4236_v1 = vld [vmem:[%s3772_s18 + $0x98] ss:$12 sps:$4 sm:$0xff]   ;;  %s2866_s18 = sshll.u32 %s4010_s14, 3  ;;  %s2772_s14 = sshll.u32 %s4014_s1, 4 }
 0x361   : > { %s1739_s29 = scalar_lea.vmem %s4097_s17, %s2866_s18 [#allocation7]  ;;  %s1745_s16 = sshra.s32 %s2772_s14, 3 }
 0x362   : > { %3369 = vtanh.f32 %v1559_v45  ;;  %s2867_s8 = smul.u32 12, %s1745_s16  ;;  %s2782_s1 = sshll.u32 %s3995_s20, 4 }
 0x363   : > { %s2878_s14 = sshll.u32 %s3999_s28, 3 }
 0x364   : > { %s4373_s0 = scalar_lea.vmem [#allocation2], %s2867_s8  ;;  %s2216_s16 = scalar_lea.vmem %s4097_s17, %s2878_s14 [#allocation7] }
 0x365   : > { %s2802_s8 = sshll.u32 %s4002_s9, 4 }
 0x36b   : > { %v3368_v50 = vpop.eup %3367 }
 0x36c   : > { %v1564_v42 = vmul.f32 %v3368_v50, %v1562_v51 }
 0x36e   : > { %v4208_v56 = vadd.f32 %v1566_v7, %v1564_v42 }
 0x36f   : > { %v3370_v54 = vpop.eup %3369 }
 0x370   : > { %v1565_v52 = vmul.f32 %v3370_v54, %v1563_v53  ;;  %v1592_v53 = vld [vmem:[%s4320_s13 + $0x8] ss:$12 sps:$4 sm:$0xff]  }
 0x371   : > { %v1600_v36 = vunpack.c.h.bf16 %v1592_v53 }
 0x372   : > { %v4210_v57 = vadd.f32 %v1567_v55, %v1565_v52  ;;  %v1597_v55 = vunpack.c.l.bf16 %v1592_v53 }
 0x374   : > { %v1570_v60 = vpack.c.bf16 %v4210_v57, %v4208_v56 }
 0x376   : > { %2898 = vst [vmem:[%s1580_s11] sm:$0xff] %v1570_v60   ;;  %1634 = vmatmul.mubr.bf16.vlgmr.msra.gmra.mxu1 %v1570_v60  ;;  %3100 = vmatmul.mubr.bf16.vlgmr.msra.gmra.mxu0 %v1570_v60  ;;  %s1904_s11 = sshra.s32 %s2782_s1, 3  ;;  %s2882_s1 = sshll.u32 %s4002_s9, 3 }
 0x377   : > { %1761 = vmatpush1.bf16.msra.mxu1 %v4216_v61  ;;  %3104 = vmatpush3.bf16.msra.mxu0 %v4220_v62  ;;  %s2871_s7 = smul.u32 12, %s1904_s11  ;;  %s2407_s11 = sshll.u32 %s4097_s17, 4  ;;  %s4513_s11 = int_to_ptr.vmem [resolvable:$true] %s2407_s11 }
 0x378   : > { %1762 = vmatprep.subr.bf16.mxu1 %v4224_v58  ;;  %3105 = vmatprep.subr.bf16.mxu0 %v3640_v6  ;;  %s2814_s9 = sshll.u32 %s3626_s24, 6 }
 0x379   : > { %1792 = vmatprep.mubr.bf16.mxu1 %v3639_v0  ;;  %3119 = vmatprep.mubr.msk.bf16.mxu0 %vm3641_vm1, %v3640_v6  ;;  %s4426_s19 = scalar_lea.vmem [#allocation2], %s2871_s7  ;;  %s4510_s7 = scalar_lea.vmem %s4097_s17, %s2882_s1 [#allocation7] }
 0x37a   : > { %s4527_s14 = scalar_lea.hbm %s4607_s5, %s2814_s9 }
 0x37b   : > { %1763 = vmatpush1.bf16.msra.mxu1 %v4232_v63  ;;  %3106 = vmatpush3.bf16.msra.mxu0 %v4236_v1 }
 0x37c   : > { %1764 = vmatprep.subr.bf16.mxu1 %v4240_v2  ;;  %3107 = vmatprep.subr.bf16.mxu0 %v3640_v6 }
 0x37f   : > { %1765 = vmatpush1.bf16.msra.mxu1 %v4245_v12  ;;  %3108 = vmatpush3.bf16.msra.mxu0 %v4249_v13 }
 0x380   : > { %1766 = vmatprep.subr.bf16.mxu1 %v4253_v14  ;;  %3109 = vmatprep.subr.bf16.mxu0 %v3640_v6 }
 0x383   : > { %1767 = vmatpush1.bf16.msra.mxu1 %v4258_v15  ;;  %3110 = vmatpush3.bf16.msra.mxu0 %v4262_v16 }
 0x384   : > { %1768 = vmatprep.subr.bf16.mxu1 %v4266_v18  ;;  %3111 = vmatprep.subr.bf16.mxu0 %v3640_v6 }
 0x387   : > { %1769 = vmatpush1.bf16.msra.mxu1 %v4271_v20  ;;  %3112 = vmatpush3.bf16.msra.mxu0 %v4275_v21 }
 0x388   : > { %1770 = vmatprep.subr.bf16.mxu1 %v4279_v22  ;;  %3113 = vmatprep.subr.bf16.mxu0 %v3640_v6 }
 0x38b   : > { %1771 = vmatpush1.bf16.msra.mxu1 %v4284_v23  ;;  %3114 = vmatpush3.bf16.msra.mxu0 %v4288_v24 }
 0x38c   : > { %1772 = vmatprep.subr.bf16.mxu1 %v4292_v26  ;;  %3115 = vmatprep.subr.bf16.mxu0 %v3640_v6 }
 0x38f   : > { %1773 = vmatpush1.bf16.msra.mxu1 %v4297_v27  ;;  %3116 = vmatpush3.bf16.msra.mxu0 %v4301_v28 }
 0x390   : > { %1774 = vmatprep.subr.bf16.mxu1 %v4305_v29  ;;  %3117 = vmatprep.subr.bf16.mxu0 %v3640_v6 }
 0x393   : > { %1775 = vmatpush1.bf16.msra.mxu1 %v4310_v30  ;;  %3118 = vmatpush3.bf16.msra.mxu0 %v4314_v31 }
 0x394   : > { %1919 = vmatprep.subr.bf16.mxu1 %v4193_v11  ;;  %3123 = vmatprep.subr.bf16.mxu0 %v3640_v6 }
 0x436   : > { %v1635_v34 = vpop.f32.mrf.mxu1  ;;  %v1678_v35 = vpop.f32.mrf.mxu0 }
 0x437   : > { %v1685_v46 = vadd.f32 %v1635_v34, %v1595_v33  ;;  %v1713_v42 = vadd.f32 %v4086_v59, %v1678_v35 }
 0x438   : > { %v1637_v47 = vpop.f32.mrf.mxu1  ;;  %v3101_v3 = vpop.f32.mrf.mxu0 }
 0x439   : > { %v2763_v4 = vmul.f32 -1.442695, %v1685_v46  ;;  %v1699_v37 = vadd.f32 %v1637_v47, %v1596_v44 }
 0x43a   : > { %v1639_v8 = vpop.f32.mrf.mxu1  ;;  %v1681_v10 = vpop.f32.mrf.mxu0 }
 0x43b   : > { %3371 = vpow2.f32 %v2763_v4  ;;  %v1686_v17 = vadd.f32 %v1639_v8, %v1598_v5  ;;  %v2765_v39 = vmul.f32 -1.442695, %v1699_v37  ;;  %v1714_v33 = vadd.f32 %v4086_v59, %v1681_v10 }
 0x43c   : > { %v3102_v43 = vpop.f32.mrf.mxu0  ;;  %v1641_v38 = vpop.f32.mrf.mxu1 }
 0x43d   : > { %v2764_v25 = vmul.f32 -1.442695, %v1686_v17  ;;  %v1700_v40 = vadd.f32 %v1641_v38, %v1599_v9 }
 0x43f   : > { %3373 = vpow2.f32 %v2764_v25  ;;  %v2766_v41 = vmul.f32 -1.442695, %v1700_v40 }
 0x440   : > { %3375 = vpow2.f32 %v2765_v39 }
 0x441   : > { %3377 = vpow2.f32 %v2766_v41  ;;  %v1752_v41 = vld [vmem:[%s4373_s0 + $0xc] sm:$0xff] }
 0x448   : > { %v3372_v19 = vpop.eup %3371 }
 0x449   : > { %v1693_v45 = vadd.f32 1.0, %v3372_v19 }
 0x44b   : > { %3379 = vrcp.f32 %v1693_v45 }
 0x44c   : > { %v3374_v48 = vpop.eup %3373 }
 0x44d   : > { %v1694_v49 = vadd.f32 1.0, %v3374_v48  ;;  %v3376_v50 = vpop.eup %3375 }
 0x44e   : > { %v3378_v51 = vpop.eup %3377  ;;  %v1707_v54 = vadd.f32 1.0, %v3376_v50  ;;  %v1757_v50 = vunpack.c.l.bf16 %v1752_v41 }
 0x44f   : > { %3381 = vrcp.f32 %v1694_v49  ;;  %v1708_v7 = vadd.f32 1.0, %v3378_v51 }
 0x450   : > { %3383 = vrcp.f32 %v1707_v54 }
 0x451   : > { %3385 = vrcp.f32 %v1708_v7 }
 0x458   : > { %v3380_v52 = vpop.eup %3379 }
 0x459   : > { %v1715_v60 = vmul.f32 %v3380_v52, %v1713_v42 }
 0x45b   : > { %v1717_v32 = vadd.f32 %v1715_v60, %v1597_v55  ;;  %v1758_v60 = vunpack.c.h.bf16 %v1752_v41 }
 0x45c   : > { %v3382_v34 = vpop.eup %3381 }
 0x45d   : > { %3387 = vtanh.f32 %v1717_v32  ;;  %v1716_v46 = vmul.f32 %v3382_v34, %v1714_v33  ;;  %v3384_v3 = vpop.eup %3383 }
 0x45e   : > { %v3386_v35 = vpop.eup %3385  ;;  %v1721_v5 = vsub.f32 1.0, %v3384_v3  ;;  %v1725_v25 = vmul.f32 %v3384_v3, %v4208_v56  ;;  %v1750_v56 = vld [vmem:[%s4373_s0] sm:$0xff] }
 0x45f   : > { %v1718_v47 = vadd.f32 %v1716_v46, %v1600_v36  ;;  %v1722_v8 = vsub.f32 1.0, %v3386_v35  ;;  %v1726_v10 = vmul.f32 %v3386_v35, %v4210_v57  ;;  %v1754_v57 = vunpack.c.l.bf16 %v1750_v56 }
 0x460   : > { %v1755_v52 = vunpack.c.h.bf16 %v1750_v56 }
 0x461   : > { %3389 = vtanh.f32 %v1718_v47 }
 0x46a   : > { %v3388_v4 = vpop.eup %3387 }
 0x46b   : > { %v1723_v17 = vmul.f32 %v3388_v4, %v1721_v5 }
 0x46d   : > { %v4330_v38 = vadd.f32 %v1725_v25, %v1723_v17 }
 0x46e   : > { %v3390_v43 = vpop.eup %3389 }
 0x46f   : > { %v1724_v44 = vmul.f32 %v3390_v43, %v1722_v8  ;;  %v1751_v8 = vld [vmem:[%s4373_s0 + $0x8] ss:$12 sps:$4 sm:$0xff]   ;;  %s2222_s0 = sshra.s32 %s2802_s8, 3  ;;  %s3643_s8 = smov [#allocation8]  }
 0x470   : > { %v1759_v41 = vunpack.c.h.bf16 %v1751_v8  ;;  %s2879_s2 = smul.u32 12, %s2222_s0  ;;  %s3528_s0 = sshll.u32 %s3643_s8, 4  ;;  %s3529_s0 = int_to_ptr.vmem [resolvable:$false] %s3528_s0 }
 0x471   : > { %v4332_v9 = vadd.f32 %v1726_v10, %v1724_v44  ;;  %v1756_v10 = vunpack.c.l.bf16 %v1751_v8 }
 0x473   : > { %v1729_v37 = vpack.c.bf16 %v4332_v9, %v4330_v38 }
 0x475   : > { %2903 = vst [vmem:[%s1739_s29] sm:$0xff] %v1729_v37   ;;  %1793 = vmatmul.mubr.bf16.vlgmr.msra.gmra.mxu1 %v1729_v37  ;;  %3120 = vmatmul.mubr.bf16.vlgmr.msra.gmra.mxu0 %v1729_v37 }
 0x476   : > { %1920 = vmatpush1.bf16.msra.mxu1 %v4216_v61  ;;  %3124 = vmatpush3.bf16.msra.mxu0 %v4220_v62 }
 0x477   : > { %1921 = vmatprep.subr.bf16.mxu1 %v4224_v58  ;;  %3125 = vmatprep.subr.bf16.mxu0 %v3640_v6 }
 0x478   : > { %1951 = vmatprep.mubr.bf16.mxu1 %v3639_v0  ;;  %3139 = vmatprep.mubr.msk.bf16.mxu0 %vm3641_vm1, %v3640_v6 }
 0x47a   : > { %1922 = vmatpush1.bf16.msra.mxu1 %v4232_v63  ;;  %3126 = vmatpush3.bf16.msra.mxu0 %v4236_v1 }
 0x47b   : > { %1923 = vmatprep.subr.bf16.mxu1 %v4240_v2  ;;  %3127 = vmatprep.subr.bf16.mxu0 %v3640_v6 }
 0x47e   : > { %1924 = vmatpush1.bf16.msra.mxu1 %v4245_v12  ;;  %3128 = vmatpush3.bf16.msra.mxu0 %v4249_v13 }
 0x47f   : > { %1925 = vmatprep.subr.bf16.mxu1 %v4253_v14  ;;  %3129 = vmatprep.subr.bf16.mxu0 %v3640_v6 }
 0x482   : > { %1926 = vmatpush1.bf16.msra.mxu1 %v4258_v15  ;;  %3130 = vmatpush3.bf16.msra.mxu0 %v4262_v16 }
 0x483   : > { %1927 = vmatprep.subr.bf16.mxu1 %v4266_v18  ;;  %3131 = vmatprep.subr.bf16.mxu0 %v3640_v6 }
 0x486   : > { %1928 = vmatpush1.bf16.msra.mxu1 %v4271_v20  ;;  %3132 = vmatpush3.bf16.msra.mxu0 %v4275_v21 }
 0x487   : > { %1929 = vmatprep.subr.bf16.mxu1 %v4279_v22  ;;  %3133 = vmatprep.subr.bf16.mxu0 %v3640_v6 }
 0x48a   : > { %1930 = vmatpush1.bf16.msra.mxu1 %v4284_v23  ;;  %3134 = vmatpush3.bf16.msra.mxu0 %v4288_v24 }
 0x48b   : > { %1931 = vmatprep.subr.bf16.mxu1 %v4292_v26  ;;  %3135 = vmatprep.subr.bf16.mxu0 %v3640_v6 }
 0x48e   : > { %1932 = vmatpush1.bf16.msra.mxu1 %v4297_v27  ;;  %3136 = vmatpush3.bf16.msra.mxu0 %v4301_v28 }
 0x48f   : > { %1933 = vmatprep.subr.bf16.mxu1 %v4305_v29  ;;  %3137 = vmatprep.subr.bf16.mxu0 %v3640_v6 }
 0x492   : > { %1934 = vmatpush1.bf16.msra.mxu1 %v4310_v30  ;;  %3138 = vmatpush3.bf16.msra.mxu0 %v4314_v31 }
 0x493   : > { %2078 = vmatprep.subr.bf16.mxu1 %v4193_v11  ;;  %3143 = vmatprep.subr.bf16.mxu0 %v3640_v6 }
 0x535   : > { %v1794_v40 = vpop.f32.mrf.mxu1  ;;  %v1837_v39 = vpop.f32.mrf.mxu0 }
 0x536   : > { %v1844_v19 = vadd.f32 %v1794_v40, %v1754_v57  ;;  %v1872_v17 = vadd.f32 %v4086_v59, %v1837_v39 }
 0x537   : > { %v1796_v45 = vpop.f32.mrf.mxu1  ;;  %v3121_v48 = vpop.f32.mrf.mxu0 }
 0x538   : > { %v2774_v49 = vmul.f32 -1.442695, %v1844_v19  ;;  %v1858_v32 = vadd.f32 %v1796_v45, %v1755_v52 }
 0x539   : > { %v1798_v51 = vpop.f32.mrf.mxu1  ;;  %v1840_v53 = vpop.f32.mrf.mxu0 }
 0x53a   : > { %3391 = vpow2.f32 %v2774_v49  ;;  %v1845_v42 = vadd.f32 %v1798_v51, %v1757_v50  ;;  %v2776_v34 = vmul.f32 -1.442695, %v1858_v32  ;;  %v1873_v57 = vadd.f32 %v4086_v59, %v1840_v53 }
 0x53b   : > { %v3122_v54 = vpop.f32.mrf.mxu0  ;;  %v1800_v55 = vpop.f32.mrf.mxu1 }
 0x53c   : > { %v2775_v7 = vmul.f32 -1.442695, %v1845_v42  ;;  %v1859_v33 = vadd.f32 %v1800_v55, %v1758_v60 }
 0x53e   : > { %3393 = vpow2.f32 %v2775_v7  ;;  %v2777_v36 = vmul.f32 -1.442695, %v1859_v33 }
 0x53f   : > { %3395 = vpow2.f32 %v2776_v34  ;;  %v1911_v34 = vld [vmem:[%s4426_s19 + $0xc] sm:$0xff] }
 0x540   : > { %3397 = vpow2.f32 %v2777_v36 }
 0x547   : > { %v3392_v46 = vpop.eup %3391 }
 0x548   : > { %v1852_v47 = vadd.f32 1.0, %v3392_v46 }
 0x54a   : > { %3399 = vrcp.f32 %v1852_v47 }
 0x54b   : > { %v3394_v3 = vpop.eup %3393 }
 0x54c   : > { %v1853_v35 = vadd.f32 1.0, %v3394_v3  ;;  %v3396_v4 = vpop.eup %3395 }
 0x54d   : > { %v3398_v5 = vpop.eup %3397  ;;  %v1866_v43 = vadd.f32 1.0, %v3396_v4 }
 0x54e   : > { %3401 = vrcp.f32 %v1853_v35  ;;  %v1867_v25 = vadd.f32 1.0, %v3398_v5  ;;  %v1916_v35 = vunpack.c.l.bf16 %v1911_v34 }
 0x54f   : > { %3403 = vrcp.f32 %v1866_v43 }
 0x550   : > { %3405 = vrcp.f32 %v1867_v25  ;;  %v1917_v25 = vunpack.c.h.bf16 %v1911_v34 }
 0x557   : > { %v3400_v44 = vpop.eup %3399 }
 0x558   : > { %v1874_v37 = vmul.f32 %v3400_v44, %v1872_v17 }
 0x55a   : > { %v1876_v56 = vadd.f32 %v1874_v37, %v1756_v10 }
 0x55b   : > { %v3402_v40 = vpop.eup %3401 }
 0x55c   : > { %3407 = vtanh.f32 %v1876_v56  ;;  %v1875_v19 = vmul.f32 %v3402_v40, %v1873_v57  ;;  %v3404_v48 = vpop.eup %3403 }
 0x55d   : > { %v3406_v39 = vpop.eup %3405  ;;  %v1880_v50 = vsub.f32 1.0, %v3404_v48  ;;  %v1884_v7 = vmul.f32 %v3404_v48, %v4330_v38  ;;  %v1909_v38 = vld [vmem:[%s4426_s19] sm:$0xff] }
 0x55e   : > { %v1877_v45 = vadd.f32 %v1875_v19, %v1759_v41  ;;  %v1881_v51 = vsub.f32 1.0, %v3406_v39  ;;  %v1885_v59 = vmul.f32 %v3406_v39, %v4332_v9  ;;  %v1913_v9 = vunpack.c.l.bf16 %v1909_v38 }
 0x55f   : > { %v1914_v17 = vunpack.c.h.bf16 %v1909_v38 }
 0x560   : > { %3409 = vtanh.f32 %v1877_v45 }
 0x569   : > { %v3408_v49 = vpop.eup %3407 }
 0x56a   : > { %v1882_v42 = vmul.f32 %v3408_v49, %v1880_v50  ;;  %v1910_v49 = vld [vmem:[%s4426_s19 + $0x8] ss:$12 sps:$4 sm:$0xff]   ;;  %v4432_v50 = vld [vmem:[%s4083_s30] ss:$0 sm:$0xff]  ;;  %s2874_s30 = sshll.u32 %s3995_s20, 3  ;;  %s2792_s20 = sshll.u32 %s3999_s28, 4 }
 0x56b   : > { %s2057_s27 = scalar_lea.vmem %s4097_s17, %s2874_s30 [#allocation7]  ;;  %s2063_s13 = sshra.s32 %s2792_s20, 3 }
 0x56c   : > { %v4383_v53 = vadd.f32 %v1884_v7, %v1882_v42  ;;  %v1915_v7 = vunpack.c.l.bf16 %v1910_v49  ;;  %s2875_s18 = smul.u32 12, %s2063_s13  ;;  %s4498_s28 = scalar_lea.vmem [#allocation2], %s2879_s2 }
 0x56d   : > { %v3410_v54 = vpop.eup %3409  ;;  %s2883_s19 = sshll.u32 %s3626_s24, 8  ;;  %s2388_s24 = scalar_lea.sflag [#allocation9], %s3768_s15 }
 0x56e   : > { %v1883_v52 = vmul.f32 %v3410_v54, %v1881_v51  ;;  %s4480_s29 = scalar_lea.vmem [#allocation2], %s2875_s18  ;;  %s4520_s17 = scalar_lea.hbm %s4608_s6, %s2883_s19 }
 0x56f   : > { %s3530_s2 = scalar_lea.vmem %s3529_s0, 512 }
 0x570   : > { %v4385_v55 = vadd.f32 %v1885_v59, %v1883_v52 }
 0x572   : > { %v1888_v60 = vpack.c.bf16 %v4385_v55, %v4383_v53 }
 0x574   : > { %2908 = vst [vmem:[%s1898_s25] sm:$0xff] %v1888_v60   ;;  %1952 = vmatmul.mubr.bf16.vlgmr.msra.gmra.mxu1 %v1888_v60  ;;  %3140 = vmatmul.mubr.bf16.vlgmr.msra.gmra.mxu0 %v1888_v60  ;;  %s2644_s25 = sshll.u32 %s3768_s15, 4 }
 0x575   : > { %2079 = vmatpush1.bf16.msra.mxu1 %v4216_v61  ;;  %3144 = vmatpush3.bf16.msra.mxu0 %v4220_v62  ;;  %s377_s30 = scalar_lea.vmem [#allocation8], %s2644_s25 }
 0x576   : > { %2080 = vmatprep.subr.bf16.mxu1 %v4224_v58  ;;  %3145 = vmatprep.subr.bf16.mxu0 %v3640_v6 }
 0x577   : > { %2110 = vmatprep.mubr.bf16.mxu1 %v3639_v0  ;;  %3159 = vmatprep.mubr.msk.bf16.mxu0 %vm3641_vm1, %v3640_v6 }
 0x579   : > { %2081 = vmatpush1.bf16.msra.mxu1 %v4232_v63  ;;  %3146 = vmatpush3.bf16.msra.mxu0 %v4236_v1 }
 0x57a   : > { %2082 = vmatprep.subr.bf16.mxu1 %v4240_v2  ;;  %3147 = vmatprep.subr.bf16.mxu0 %v3640_v6 }
 0x57d   : > { %2083 = vmatpush1.bf16.msra.mxu1 %v4245_v12  ;;  %3148 = vmatpush3.bf16.msra.mxu0 %v4249_v13 }
 0x57e   : > { %2084 = vmatprep.subr.bf16.mxu1 %v4253_v14  ;;  %3149 = vmatprep.subr.bf16.mxu0 %v3640_v6 }
 0x581   : > { %2085 = vmatpush1.bf16.msra.mxu1 %v4258_v15  ;;  %3150 = vmatpush3.bf16.msra.mxu0 %v4262_v16 }
 0x582   : > { %2086 = vmatprep.subr.bf16.mxu1 %v4266_v18  ;;  %3151 = vmatprep.subr.bf16.mxu0 %v3640_v6 }
 0x585   : > { %2087 = vmatpush1.bf16.msra.mxu1 %v4271_v20  ;;  %3152 = vmatpush3.bf16.msra.mxu0 %v4275_v21 }
 0x586   : > { %2088 = vmatprep.subr.bf16.mxu1 %v4279_v22  ;;  %3153 = vmatprep.subr.bf16.mxu0 %v3640_v6 }
 0x589   : > { %2089 = vmatpush1.bf16.msra.mxu1 %v4284_v23  ;;  %3154 = vmatpush3.bf16.msra.mxu0 %v4288_v24 }
 0x58a   : > { %2090 = vmatprep.subr.bf16.mxu1 %v4292_v26  ;;  %3155 = vmatprep.subr.bf16.mxu0 %v3640_v6 }
 0x58d   : > { %2091 = vmatpush1.bf16.msra.mxu1 %v4297_v27  ;;  %3156 = vmatpush3.bf16.msra.mxu0 %v4301_v28 }
 0x58e   : > { %2092 = vmatprep.subr.bf16.mxu1 %v4305_v29  ;;  %3157 = vmatprep.subr.bf16.mxu0 %v3640_v6 }
 0x591   : > { %2093 = vmatpush1.bf16.msra.mxu1 %v4310_v30  ;;  %3158 = vmatpush3.bf16.msra.mxu0 %v4314_v31 }
 0x592   : > { %2237 = vmatprep.subr.bf16.mxu1 %v4193_v11  ;;  %3163 = vmatprep.subr.bf16.mxu0 %v3640_v6 }
 0x634   : > { %v1953_v32 = vpop.f32.mrf.mxu1  ;;  %v1996_v33 = vpop.f32.mrf.mxu0 }
 0x635   : > { %v2003_v36 = vadd.f32 %v1953_v32, %v1913_v9  ;;  %v2031_v51 = vadd.f32 %v4432_v50, %v1996_v33  ;;  %v1918_v32 = vunpack.c.h.bf16 %v1910_v49 }
 0x636   : > { %v1955_v46 = vpop.f32.mrf.mxu1  ;;  %v3141_v47 = vpop.f32.mrf.mxu0 }
 0x637   : > { %v2784_v3 = vmul.f32 -1.442695, %v2003_v36  ;;  %v2017_v10 = vadd.f32 %v1955_v46, %v1914_v17 }
 0x638   : > { %v1957_v11 = vpop.f32.mrf.mxu1  ;;  %v1999_v4 = vpop.f32.mrf.mxu0 }
 0x639   : > { %3411 = vpow2.f32 %v2784_v3  ;;  %v2004_v5 = vadd.f32 %v1957_v11, %v1916_v35  ;;  %v2786_v56 = vmul.f32 -1.442695, %v2017_v10  ;;  %v2032_v38 = vadd.f32 %v4432_v50, %v1999_v4 }
 0x63a   : > { %v3142_v8 = vpop.f32.mrf.mxu0  ;;  %v1959_v44 = vpop.f32.mrf.mxu1 }
 0x63b   : > { %v2785_v43 = vmul.f32 -1.442695, %v2004_v5  ;;  %v2018_v37 = vadd.f32 %v1959_v44, %v1917_v25 }
 0x63d   : > { %3413 = vpow2.f32 %v2785_v43  ;;  %v2787_v57 = vmul.f32 -1.442695, %v2018_v37  ;;  %v2069_v37 = vld [vmem:[%s4480_s29 + $0x8] ss:$12 sps:$4 sm:$0xff]  }
 0x63e   : > { %3415 = vpow2.f32 %v2786_v56 }
 0x63f   : > { %3417 = vpow2.f32 %v2787_v57 }
 0x646   : > { %v3412_v40 = vpop.eup %3411 }
 0x647   : > { %v2011_v41 = vadd.f32 1.0, %v3412_v40 }
 0x649   : > { %3419 = vrcp.f32 %v2011_v41 }
 0x64a   : > { %v3414_v19 = vpop.eup %3413 }
 0x64b   : > { %v2012_v45 = vadd.f32 1.0, %v3414_v19  ;;  %v3416_v48 = vpop.eup %3415  ;;  %v2074_v19 = vunpack.c.l.bf16 %v2069_v37 }
 0x64c   : > { %v3418_v39 = vpop.eup %3417  ;;  %v2025_v42 = vadd.f32 1.0, %v3416_v48 }
 0x64d   : > { %3421 = vrcp.f32 %v2012_v45  ;;  %v2026_v52 = vadd.f32 1.0, %v3418_v39 }
 0x64e   : > { %3423 = vrcp.f32 %v2025_v42 }
 0x64f   : > { %3425 = vrcp.f32 %v2026_v52 }
 0x656   : > { %v3420_v54 = vpop.eup %3419 }
 0x657   : > { %v2033_v59 = vmul.f32 %v3420_v54, %v2031_v51  ;;  %v2077_v51 = vunpack.c.h.bf16 %v2069_v37 }
 0x659   : > { %v2035_v60 = vadd.f32 %v2033_v59, %v1915_v7 }
 0x65a   : > { %v3422_v9 = vpop.eup %3421 }
 0x65b   : > { %3427 = vtanh.f32 %v2035_v60  ;;  %v2034_v34 = vmul.f32 %v3422_v9, %v2032_v38  ;;  %v3424_v46 = vpop.eup %3423 }
 0x65c   : > { %v3426_v33 = vpop.eup %3425  ;;  %v2039_v3 = vsub.f32 1.0, %v3424_v46  ;;  %v2043_v17 = vmul.f32 %v3424_v46, %v4383_v53 }
 0x65d   : > { %v2036_v36 = vadd.f32 %v2034_v34, %v1918_v32  ;;  %v2040_v35 = vsub.f32 1.0, %v3426_v33  ;;  %v2044_v4 = vmul.f32 %v3426_v33, %v4385_v55 }
 0x65f   : > { %3429 = vtanh.f32 %v2036_v36 }
 0x668   : > { %v3428_v47 = vpop.eup %3427 }
 0x669   : > { %v2041_v11 = vmul.f32 %v3428_v47, %v2039_v3 }
 0x66b   : > { %v4439_v43 = vadd.f32 %v2043_v17, %v2041_v11  ;;  %v2229_v17 = vld [vmem:[%s4498_s28 + $0xc] sm:$0xff] }
 0x66c   : > { %v3430_v5 = vpop.eup %3429 }
 0x66d   : > { %v2042_v8 = vmul.f32 %v3430_v5, %v2040_v35  ;;  %v2227_v35 = vld [vmem:[%s4498_s28] sm:$0xff] }
 0x66e   : > { %v2231_v11 = vunpack.c.l.bf16 %v2227_v35 }
 0x66f   : > { %v4441_v44 = vadd.f32 %v2044_v4, %v2042_v8 }
 0x671   : > { %v2047_v25 = vpack.c.bf16 %v4441_v44, %v4439_v43 }
 0x673   : > { %2913 = vst [vmem:[%s2057_s27] sm:$0xff] %v2047_v25   ;;  %2111 = vmatmul.mubr.bf16.vlgmr.msra.gmra.mxu1 %v2047_v25  ;;  %3160 = vmatmul.mubr.bf16.vlgmr.msra.gmra.mxu0 %v2047_v25  ;;  %s2423_s27 = sshll.u32 %s377_s30, 4  ;;  %s4522_s27 = int_to_ptr.vmem [resolvable:$true] %s2423_s27 }
 0x674   : > { %2238 = vmatpush1.bf16.msra.mxu1 %v4216_v61  ;;  %3164 = vmatpush3.bf16.msra.mxu0 %v4220_v62  ;;  %p3531_p3 = scmp.lt.s32.totalorder %s4522_s27, %s3529_s0 }
 0x675   : > { %2239 = vmatprep.subr.bf16.mxu1 %v4224_v58  ;;  %3165 = vmatprep.subr.bf16.mxu0 %v3640_v6 }
 0x676   : > { %2269 = vmatprep.mubr.bf16.mxu1 %v3639_v0  ;;  %3179 = vmatprep.mubr.msk.bf16.mxu0 %vm3641_vm1, %v3640_v6  ;;  %v2068_v0 = vld [vmem:[%s4480_s29] sm:$0xff] }
 0x677   : > { %v2072_v61 = vunpack.c.l.bf16 %v2068_v0 }
 0x678   : > { %2240 = vmatpush1.bf16.msra.mxu1 %v4232_v63  ;;  %3166 = vmatpush3.bf16.msra.mxu0 %v4236_v1  ;;  %v2070_v63 = vld [vmem:[%s4480_s29 + $0xc] sm:$0xff] }
 0x679   : > { %2241 = vmatprep.subr.bf16.mxu1 %v4240_v2  ;;  %3167 = vmatprep.subr.bf16.mxu0 %v3640_v6 }
 0x67c   : > { %2242 = vmatpush1.bf16.msra.mxu1 %v4245_v12  ;;  %3168 = vmatpush3.bf16.msra.mxu0 %v4249_v13  ;;  %v2075_v13 = vunpack.c.l.bf16 %v2070_v63 }
 0x67d   : > { %2243 = vmatprep.subr.bf16.mxu1 %v4253_v14  ;;  %3169 = vmatprep.subr.bf16.mxu0 %v3640_v6 }
 0x680   : > { %2244 = vmatpush1.bf16.msra.mxu1 %v4258_v15  ;;  %3170 = vmatpush3.bf16.msra.mxu0 %v4262_v16 }
 0x681   : > { %2245 = vmatprep.subr.bf16.mxu1 %v4266_v18  ;;  %3171 = vmatprep.subr.bf16.mxu0 %v3640_v6 }
 0x684   : > { %2246 = vmatpush1.bf16.msra.mxu1 %v4271_v20  ;;  %3172 = vmatpush3.bf16.msra.mxu0 %v4275_v21  ;;  %v2073_v20 = vunpack.c.h.bf16 %v2068_v0  ;;  %v2234_v0 = vunpack.c.l.bf16 %v2229_v17 }
 0x685   : > { %2247 = vmatprep.subr.bf16.mxu1 %v4279_v22  ;;  %3173 = vmatprep.subr.bf16.mxu0 %v3640_v6 }
 0x688   : > { %2248 = vmatpush1.bf16.msra.mxu1 %v4284_v23  ;;  %3174 = vmatpush3.bf16.msra.mxu0 %v4288_v24  ;;  %v2076_v23 = vunpack.c.h.bf16 %v2070_v63 }
 0x689   : > { %2249 = vmatprep.subr.bf16.mxu1 %v4292_v26  ;;  %3175 = vmatprep.subr.bf16.mxu0 %v3640_v6 }
 0x68c   : > { %2250 = vmatpush1.bf16.msra.mxu1 %v4297_v27  ;;  %3176 = vmatpush3.bf16.msra.mxu0 %v4301_v28 }
 0x68d   : > { %2251 = vmatprep.subr.bf16.mxu1 %v4305_v29  ;;  %3177 = vmatprep.subr.bf16.mxu0 %v3640_v6 }
 0x690   : > { %2252 = vmatpush1.bf16.msra.mxu1 %v4310_v30  ;;  %3178 = vmatpush3.bf16.msra.mxu0 %v4314_v31 }
 0x733   : > { %v2112_v62 = vpop.f32.mrf.mxu1  ;;  %v2155_v58 = vpop.f32.mrf.mxu0 }
 0x734   : > { %v2162_v1 = vadd.f32 %v2112_v62, %v2072_v61  ;;  %v2190_v56 = vadd.f32 %v4432_v50, %v2155_v58  ;;  %v2232_v58 = vunpack.c.h.bf16 %v2227_v35 }
 0x735   : > { %v2114_v2 = vpop.f32.mrf.mxu1  ;;  %v3161_v12 = vpop.f32.mrf.mxu0 }
 0x736   : > { %v2794_v6 = vmul.f32 -1.442695, %v2162_v1  ;;  %v2176_v24 = vadd.f32 %v2114_v2, %v2073_v20 }
 0x737   : > { %v2116_v14 = vpop.f32.mrf.mxu1  ;;  %v2158_v15 = vpop.f32.mrf.mxu0 }
 0x738   : > { %3431 = vpow2.f32 %v2794_v6  ;;  %v2163_v16 = vadd.f32 %v2116_v14, %v2075_v13  ;;  %v2796_v27 = vmul.f32 -1.442695, %v2176_v24  ;;  %v2191_v39 = vadd.f32 %v4432_v50, %v2158_v15 }
 0x739   : > { %v3162_v18 = vpop.f32.mrf.mxu0  ;;  %v2118_v22 = vpop.f32.mrf.mxu1  ;;  %v2235_v13 = vunpack.c.h.bf16 %v2229_v17 }
 0x73a   : > { %v2795_v21 = vmul.f32 -1.442695, %v2163_v16  ;;  %v2177_v26 = vadd.f32 %v2118_v22, %v2076_v23 }
 0x73c   : > { %3433 = vpow2.f32 %v2795_v21  ;;  %v2797_v28 = vmul.f32 -1.442695, %v2177_v26 }
 0x73d   : > { %3435 = vpow2.f32 %v2796_v27  ;;  %v2228_v27 = vld [vmem:[%s4498_s28 + $0x8] ss:$12 sps:$4 sm:$0xff]  }
 0x73e   : > { %3437 = vpow2.f32 %v2797_v28 }
 0x745   : > { %v3432_v29 = vpop.eup %3431 }
 0x746   : > { %v2170_v30 = vadd.f32 1.0, %v3432_v29 }
 0x748   : > { %3439 = vrcp.f32 %v2170_v30 }
 0x749   : > { %v3434_v31 = vpop.eup %3433 }
 0x74a   : > { %v2171_v53 = vadd.f32 1.0, %v3434_v31  ;;  %v3436_v55 = vpop.eup %3435  ;;  %v2233_v31 = vunpack.c.l.bf16 %v2228_v27 }
 0x74b   : > { %v3438_v10 = vpop.eup %3437  ;;  %v2184_v57 = vadd.f32 1.0, %v3436_v55 }
 0x74c   : > { %3441 = vrcp.f32 %v2171_v53  ;;  %v2185_v41 = vadd.f32 1.0, %v3438_v10 }
 0x74d   : > { %3443 = vrcp.f32 %v2184_v57 }
 0x74e   : > { %3445 = vrcp.f32 %v2185_v41 }
 0x755   : > { %v3440_v40 = vpop.eup %3439 }
 0x756   : > { %v2192_v45 = vmul.f32 %v3440_v40, %v2190_v56  ;;  %v2236_v56 = vunpack.c.h.bf16 %v2228_v27 }
 0x758   : > { %v2194_v48 = vadd.f32 %v2192_v45, %v2074_v19 }
 0x759   : > { %v3442_v49 = vpop.eup %3441 }
 0x75a   : > { %3447 = vtanh.f32 %v2194_v48  ;;  %v2193_v42 = vmul.f32 %v3442_v49, %v2191_v39  ;;  %v3444_v52 = vpop.eup %3443 }
 0x75b   : > { %v3446_v7 = vpop.eup %3445  ;;  %v2198_v60 = vsub.f32 1.0, %v3444_v52  ;;  %v2202_v36 = vmul.f32 %v3444_v52, %v4439_v43 }
 0x75c   : > { %v2195_v54 = vadd.f32 %v2193_v42, %v2077_v51  ;;  %v2199_v38 = vsub.f32 1.0, %v3446_v7  ;;  %v2203_v46 = vmul.f32 %v3446_v7, %v4441_v44 }
 0x75e   : > { %3449 = vtanh.f32 %v2195_v54 }
 0x767   : > { %v3448_v59 = vpop.eup %3447 }
 0x768   : > { %v2200_v9 = vmul.f32 %v3448_v59, %v2198_v60 }
 0x76a   : > { %v4490_v33 = vadd.f32 %v2202_v36, %v2200_v9 }
 0x76b   : > { %v3450_v32 = vpop.eup %3449 }
 0x76c   : > { %v2201_v34 = vmul.f32 %v3450_v32, %v2199_v38 }
 0x76e   : > { %v4492_v47 = vadd.f32 %v2203_v46, %v2201_v34 }
 0x770   : > { %v2206_v3 = vpack.c.bf16 %v4492_v47, %v4490_v33 }
 0x772   : > { %2918 = vst [vmem:[%s2216_s16] sm:$0xff] %v2206_v3   ;;  %2270 = vmatmul.mubr.bf16.vlgmr.msra.gmra.mxu1 %v2206_v3  ;;  %3180 = vmatmul.mubr.bf16.vlgmr.msra.gmra.mxu0 %v2206_v3  ;;  %s3524_s16 = scalar_lea.vmem %s4522_s27, 256 }
 0x773   : > { %p3525_p8 = scmp.ne.s32.totalorder %s4522_s27, %s3524_s16  ;;  %p3532_p5 = scmp.lt.s32.totalorder %s3530_s2, %s3524_s16 }
 0x775   : > { %p3526_p12 = pnand %p3525_p8, %p3735_p9  ;;  %p3533_p6 = por %p3532_p5, %p3531_p3 }
 0x777   : > { %p3527_p1 = pneg %p3526_p12 }
 0x779   : > { %p3534_p4 = pnand %p3533_p6, %p3527_p1 }
 0x832   : > { %v2271_v5 = vpop.f32.mrf.mxu1  ;;  %v2314_v8 = vpop.f32.mrf.mxu0 }
 0x833   : > { %v2321_v4 = vadd.f32 %v2271_v5, %v2231_v11  ;;  %v2349_v28 = vadd.f32 %v4432_v50, %v2314_v8 }
 0x834   : > { %v2273_v43 = vpop.f32.mrf.mxu1  ;;  %v3181_v44 = vpop.f32.mrf.mxu0 }
 0x835   : > { %v2804_v25 = vmul.f32 -1.442695, %v2321_v4  ;;  %v2335_v2 = vadd.f32 %v2273_v43, %v2232_v58 }
 0x836   : > { %v2275_v61 = vpop.f32.mrf.mxu1  ;;  %v2317_v62 = vpop.f32.mrf.mxu0 }
 0x837   : > { %3451 = vpow2.f32 %v2804_v25  ;;  %v2322_v63 = vadd.f32 %v2275_v61, %v2234_v0  ;;  %v2806_v15 = vmul.f32 -1.442695, %v2335_v2  ;;  %v2350_v10 = vadd.f32 %v4432_v50, %v2317_v62 }
 0x838   : > { %v3182_v1 = vpop.f32.mrf.mxu0  ;;  %v2277_v6 = vpop.f32.mrf.mxu1 }
 0x839   : > { %v2805_v12 = vmul.f32 -1.442695, %v2322_v63  ;;  %v2336_v14 = vadd.f32 %v2277_v6, %v2235_v13 }
 0x83b   : > { %3453 = vpow2.f32 %v2805_v12  ;;  %v2807_v16 = vmul.f32 -1.442695, %v2336_v14 }
 0x83c   : > { %3455 = vpow2.f32 %v2806_v15 }
 0x83d   : > { %3457 = vpow2.f32 %v2807_v16 }
 0x844   : > { %v3452_v18 = vpop.eup %3451 }
 0x845   : > { %v2329_v20 = vadd.f32 1.0, %v3452_v18 }
 0x847   : > { %3459 = vrcp.f32 %v2329_v20 }
 0x848   : > { %v3454_v21 = vpop.eup %3453 }
 0x849   : > { %v2330_v22 = vadd.f32 1.0, %v3454_v21  ;;  %v3456_v23 = vpop.eup %3455 }
 0x84a   : > { %v3458_v24 = vpop.eup %3457  ;;  %v2343_v26 = vadd.f32 1.0, %v3456_v23 }
 0x84b   : > { %3461 = vrcp.f32 %v2330_v22  ;;  %v2344_v30 = vadd.f32 1.0, %v3458_v24 }
 0x84c   : > { %3463 = vrcp.f32 %v2343_v26 }
 0x84d   : > { %3465 = vrcp.f32 %v2344_v30 }
 0x854   : > { %v3460_v29 = vpop.eup %3459 }
 0x855   : > { %v2351_v53 = vmul.f32 %v3460_v29, %v2349_v28 }
 0x857   : > { %v2353_v55 = vadd.f32 %v2351_v53, %v2233_v31 }
 0x858   : > { %v3462_v37 = vpop.eup %3461 }
 0x859   : > { %3467 = vtanh.f32 %v2353_v55  ;;  %v2352_v57 = vmul.f32 %v3462_v37, %v2350_v10  ;;  %v3464_v41 = vpop.eup %3463 }
 0x85a   : > { %v3466_v19 = vpop.eup %3465  ;;  %v2357_v45 = vsub.f32 1.0, %v3464_v41  ;;  %v2361_v50 = vmul.f32 %v3464_v41, %v4490_v33 }
 0x85b   : > { %v2354_v40 = vadd.f32 %v2352_v57, %v2236_v56  ;;  %v2358_v51 = vsub.f32 1.0, %v3466_v19  ;;  %v2362_v52 = vmul.f32 %v3466_v19, %v4492_v47 }
 0x85d   : > { %3469 = vtanh.f32 %v2354_v40 }
 0x866   : > { %v3468_v48 = vpop.eup %3467 }
 0x867   : > { %v2359_v39 = vmul.f32 %v3468_v48, %v2357_v45 }
 0x869   : > { %v2363_v49 = vadd.f32 %v2361_v50, %v2359_v39 }
 0x86a   : > { %v3470_v42 = vpop.eup %3469 }
 0x86b   : > { %v2360_v54 = vmul.f32 %v3470_v42, %v2358_v51  ;;  %2380 = vst [vmem:[%s377_s30] sm:$0xff] %v2363_v49 }
 0x86d   : > { %v2364_v7 = vadd.f32 %v2362_v52, %v2360_v54 }
 0x86f   : > { %v2922_v59 = vpack.c.bf16 %v2364_v7, %v2363_v49  ;;  %2381 = vst [vmem:[%s377_s30 + $0x8] sm:$0xff] %v2364_v7 }
 0x870   : > { %3537 = shalt.err (!%p3534_p4)
}
 0x871   : > { %s3538_s28 = scalar_lea.hbm %s4520_s17, 256  ;;  %s3542_s19 = scalar_lea.hbm %s4608_s6, 512 }
 0x872   : > { %p3539_p7 = scmp.ne.s32.totalorder %s4520_s17, %s3538_s28  ;;  %p3543_p2 = scmp.lt.s32.totalorder %s4520_s17, %s4608_s6 }
 0x873   : > { %p3544_p0 = scmp.lt.s32.totalorder %s3542_s19, %s3538_s28 }
 0x874   : > { %p3540_p10 = pnand %p3539_p7, %p3735_p9 }
 0x875   : > { %p3545_p8 = por %p3544_p0, %p3543_p2 }
 0x876   : > { %p3541_p13 = pneg %p3540_p10 }
 0x878   : > { %p3546_p12 = pnand %p3545_p8, %p3541_p13 }
 0x87a   : > { %3549 = shalt.err (!%p3546_p12)
}
 0x87b   : > { %s3644_s20 = smov 128   ;;  %s3645_s13 = smov 8   ;;  %2923 = vst [vmem:[%s4510_s7] sm:$0xff] %v2922_v59  }
 0x87c   : > { %3193 = dma.vmem_to_hbm [thread:$0]  (%p3735_p9), %s4522_s27, 256, %s4520_s17, %s2388_s24, %s3644_s20, %s3644_s20, %s3645_s13  }
 0x87d   : > { %s2383_s18 = scalar_lea.sflag [#allocation6], %s3768_s15  ;;  %s3550_s29 = scalar_lea.vmem %s4513_s11, 1024 }
 0x87e   : > { %p3551_p1 = scmp.ne.s32.totalorder %s4513_s11, %s3550_s29  ;;  %s3646_s16 = smov [#allocation7]  }
 0x87f   : > { %s3554_s8 = sshll.u32 %s3646_s16, 4  ;;  %s3555_s8 = int_to_ptr.vmem [resolvable:$false] %s3554_s8 }
 0x880   : > { %p3552_p3 = pnand %p3551_p1, %p3735_p9  ;;  %s3556_s0 = scalar_lea.vmem %s3555_s8, 2048 }
 0x881   : > { %p3557_p6 = scmp.lt.s32.totalorder %s4513_s11, %s3555_s8  ;;  %p3558_p4 = scmp.lt.s32.totalorder %s3556_s0, %s3550_s29 }
 0x882   : > { %p3553_p5 = pneg %p3552_p3 }
 0x883   : > { %p3559_p7 = por %p3558_p4, %p3557_p6 }
 0x885   : > { %p3560_p10 = pnand %p3559_p7, %p3553_p5 }
 0x887   : > { %3563 = shalt.err (!%p3560_p10)
}
 0x888   : > { %s3564_s7 = scalar_lea.hbm %s4527_s14, 1024  ;;  %s3568_s24 = scalar_lea.hbm %s4607_s5, 2048 }
 0x889   : > { %p3565_p13 = scmp.ne.s32.totalorder %s4527_s14, %s3564_s7  ;;  %p3569_p8 = scmp.lt.s32.totalorder %s4527_s14, %s4607_s5 }
 0x88a   : > { %p3570_p12 = scmp.lt.s32.totalorder %s3568_s24, %s3564_s7 }
 0x88b   : > { %p3566_p2 = pnand %p3565_p13, %p3735_p9 }
 0x88c   : > { %p3571_p1 = por %p3570_p12, %p3569_p8 }
 0x88d   : > { %p3567_p0 = pneg %p3566_p2 }
 0x88f   : > { %p3572_p3 = pnand %p3571_p1, %p3567_p0 }
 0x891   : > { %3575 = shalt.err (!%p3572_p3)
}
 0x892   : > { %s3647_s25 = smov 64   ;;  %s3648_s1 = smov 4  }
 0x893   : > { %3192 = dma.vmem_to_hbm [thread:$0]  (%p3735_p9), %s4513_s11, 1024, %s4527_s14, %s2383_s18, %s3647_s25, %s3644_s20, %s3648_s1  }
 0x894 PF: > { %s2438_s19 = sand.u32 1, %s3614_s21   ;;  %p4625_p5 = scmp.ge.s32.totalorder %s3634_s26, 2 }
 0x895   : > { %s2439_s30 = scalar_lea.sflag [#allocation6], %s2438_s19 }
 0x896   : > { %p3201_p6 = pnand %p4625_p5, %p3742_p11 }
 0x898   : > { %p3202_p4 = pneg %p3201_p6 }
 0x89a   : > { %3605 = dma.done.wait (%p3202_p4), %s2439_s30, 1024  }
 0x89b   : > { %3607 = vsyncadd (%p3202_p4), %s2439_s30, 4294966272  ;;  %s2448_s9 = scalar_lea.sflag [#allocation9], %s2438_s19 }
 0x89c   : > { %3609 = dma.done.wait (%p3202_p4), %s2448_s9, 256  }
 0x89d   : > { %3611 = vsyncadd (%p3202_p4), %s2448_s9, 4294967040  ;;  %s26_s26 = sadd.s32 1, %s3634_s26   ;;  %s4626_s10 = sld [smem:[#allocation15_spill]] }
 0x89e   : > { %p23_p7 = scmp.ge.s32.totalorder %s26_s26, 4   ;;  %s4627_s24 = sld [smem:[#allocation13_spill]] }
 0x89f   : > { %s4628_s25 = sld [smem:[#allocation14_spill]]  ;;  %s4629_s21 = smov %s3618_s22 }
 0x8a0   : > { %s4630_s22 = smov %s3622_s23  ;;  %25 = sbr.rel (!%p23_p7) target bundleno = 12 (0xc), region = 134 }
 0x8a3   : > { %s4631_s23 = smov %s4626_s10 }
 0x8a5   :  { %2453 = vsyncpa [#allocation5], 1 }
 0x8a6   :  { %2455 = vsyncpa [#allocation5 + $0x1], 1 }
 0x8a7   :  { %2456 = vsyncpa [#allocation6], 1 }
 0x8a8   :  { %2458 = vsyncpa [#allocation6 + $0x1], 1 }
 0x8a9   :  { %2459 = vsyncpa [#allocation9], 1 }
 0x8aa   :  { %2461 = vsyncpa [#allocation9 + $0x1], 1 }

</bundles_post_ra>
